<compile_context>
chip_gen: v5e
topology: v5e:2x2
jax: 0.10.0
libtpu: 0.0.40
codegen_flags: <defaults>
</compile_context>

<pallas_src>
import functools

import numpy as np
import jax
import jax.numpy as jnp
from jax.experimental import pallas as pl
from jax.experimental.pallas import tpu as pltpu


# ----------------------------------------------------------------------------
# Fused encoder kernel (one grid step == one batch element)
# ----------------------------------------------------------------------------
def _fused_encoder_kernel(
    xph_ref,                      # (1, 4, Hp*Wp, Cin)  2x2 phase-split pixels (raw, un-normalized)
    spec_ref,                     # (1, C2*H2, W2)      spectrogram
    w0_ref, b0_ref,               # (9*128, 32) bf16, (1, 32) f32
    w1_ref, b1_ref,
    w2_ref, b2_ref,
    w3_ref, b3_ref,
    h_ref,                        # (1, L_last, 32) f32   strided-row conv output
    hc_ref,                       # (1, 1, 1) int32       cross indicator
    pscr_ref,                     # VMEM scratch (L_pad, 9*128) f32  patch matrix
    *, wp, cin, layers, threshold, kpad):
    f32 = jnp.float32
    bf16 = jnp.bfloat16

    # ---- spectrogram indicator: count(x > -0.99) > threshold ----------------
    flags = (spec_ref[0] > -0.99).astype(f32)                 # (C2*H2, W2)
    cnt = jnp.sum(flags, axis=(0, 1), keepdims=True)          # (1, 1), exact small int in f32
    hc_ref[0] = (cnt > threshold).astype(jnp.int32)

    # ---- zero the patch scratch once per step: the 128-wide per-tap column
    # groups are only partially written, and the padded columns are contracted
    # against zero weight rows, so they must hold finite values.
    pscr_ref[...] = jnp.zeros(pscr_ref.shape, f32)

    # ---- layer 0: 3x3 stride-2 conv via the 2x2 phase-split input -----------
    # patch row r = oh*Wp + ow ; tap (dy,dx) lives at phase (dy%2, dx%2),
    # row offset (dy//2)*Wp + (dx//2).
    l0, _, _ = layers[0]
    xb = xph_ref[0].astype(f32) * (1.0 / 255.0) - 0.5          # fused normalization
    for t in range(9):
        dy, dx = divmod(t, 3)
        ph = (dy % 2) * 2 + (dx % 2)
        off = (dy // 2) * wp + (dx // 2)
        pscr_ref[0:l0, t * kpad:t * kpad + cin] = xb[ph, off:off + l0, :]
    a = jnp.dot(pscr_ref[0:l0, :].astype(bf16), w0_ref[...],
                preferred_element_type=f32)
    a = jnp.maximum(a + b0_ref[...], 0.0)                      # (L0, 32)

    # ---- layers 1..3: 3x3 stride-1 convs, in-kernel im2col -------------------
    # activation `a` keeps the "strided rows" layout: row oh*Wp + ow is the
    # value at (oh, ow); rows with ow >= valid width are garbage that valid
    # outputs never read.
    w_refs = (w1_ref, w2_ref, w3_ref)
    b_refs = (b1_ref, b2_ref, b3_ref)
    for li in range(1, 4):
        l, _, _ = layers[li]
        cprev = a.shape[1]
        for t in range(9):
            dy, dx = divmod(t, 3)
            off = dy * wp + dx
            pscr_ref[0:l, t * kpad:t * kpad + cprev] = a[off:off + l, :]
        m = max(l, 8)                                          # avoid M<8 matmul edge case
        z = jnp.dot(pscr_ref[0:m, :].astype(bf16), w_refs[li - 1][...],
                    preferred_element_type=f32)
        z = jnp.maximum(z + b_refs[li - 1][...], 0.0)
        a = z[0:l, :] if m != l else z                         # (L, 32)

    h_ref[0] = a.astype(h_ref.dtype)                           # (L_last, 32)


# ----------------------------------------------------------------------------
# Wrapper: layout plumbing + single pallas_call
# ----------------------------------------------------------------------------
_KPAD = 128  # per-tap column group width in the patch matrix (lane-aligned)


def _build_weight_mat(w):
    """(Cout, Cin, 3, 3) -> (9*_KPAD, Cout) bf16, row = (ky*3+kx)*_KPAD + ci, zero-padded."""
    cout, cin_l, kh, kw = w.shape
    assert cin_l <= _KPAD and cout <= _KPAD
    wt = jnp.transpose(w, (2, 3, 1, 0))                        # (ky, kx, ci, co)
    wt = jnp.pad(wt, ((0, 0), (0, 0), (0, _KPAD - cin_l), (0, 0)))
    return wt.reshape(kh * kw * _KPAD, cout).astype(jnp.bfloat16)


def simple_cross_encoder_forward(obs, params, threshold=1):
    if isinstance(obs, dict):
        pixels, obs_cross = obs["pixels"], obs["spectrogram"]
    else:
        pixels, obs_cross = obs, None

    n, c, h, w = pixels.shape
    assert h % 2 == 0 and w % 2 == 0, "phase-split stride-2 layer assumes even H, W"
    assert len(params) == 4 and [s for (_, _, s) in params] == [2, 1, 1, 1]

    # Static shape bookkeeping for the "strided rows" activation layout.
    hp, wp = h // 2, w // 2
    oh, ow = (h - 3) // 2 + 1, (w - 3) // 2 + 1                # stride-2 layer
    layers = [((oh - 1) * wp + ow, oh, ow)]
    for _ in range(3):                                         # stride-1 layers
        oh, ow = oh - 2, ow - 2
        assert oh >= 1 and ow >= 1, "spatial size too small for the 4-layer stack"
        layers.append(((oh - 1) * wp + ow, oh, ow))
    l_last, h_f, w_f = layers[-1]
    l_pad = ((layers[0][0] + 7) // 8) * 8

    # Layout plumbing (cheap XLA ops on the raw input, no data expansion):
    # NHWC + 2x2 phase split so the stride-2 taps become contiguous in-kernel slices.
    x = pixels.astype(jnp.float32).transpose(0, 2, 3, 1)       # NHWC
    phases = [x[:, py::2, px::2, :].reshape(n, hp * wp, c)
              for py in (0, 1) for px in (0, 1)]
    xph = jnp.stack(phases, axis=1)                            # (N, 4, Hp*Wp, Cin)

    if obs_cross is not None:
        c2, h2, w2 = obs_cross.shape[1:]
        spec2 = obs_cross.astype(jnp.float32).reshape(n, c2 * h2, w2)
    else:
        spec2 = jnp.full((n, 1, 1), -1.0, jnp.float32)         # dummy; result discarded

    w_mats = [_build_weight_mat(wl) for (wl, _, _) in params]
    b_vecs = [bl.reshape(1, -1).astype(jnp.float32) for (_, bl, _) in params]
    cout = w_mats[0].shape[1]

    flops = 2 * n * sum(l * 9 * (c if i == 0 else cout) * cout
                        for i, (l, _, _) in enumerate(layers))
    bytes_accessed = int(xph.size * 4 + spec2.size * 4
                         + sum(wm.size * 2 for wm in w_mats)
                         + sum(bv.size * 4 for bv in b_vecs)
                         + n * l_last * cout * 4 + n * 4)

    kernel = functools.partial(
        _fused_encoder_kernel, wp=wp, cin=c, layers=tuple(layers),
        threshold=threshold, kpad=_KPAD)

    h_raw, hc = pl.pallas_call(
        kernel,
        out_shape=(
            jax.ShapeDtypeStruct((n, l_last, cout), jnp.float32),
            jax.ShapeDtypeStruct((n, 1, 1), jnp.int32),
        ),
        grid=(n,),
        in_specs=[
            pl.BlockSpec((1, 4, hp * wp, c), lambda b: (b, 0, 0, 0)),
            pl.BlockSpec((1,) + spec2.shape[1:], lambda b: (b, 0, 0)),
            pl.BlockSpec(w_mats[0].shape, lambda b: (0, 0)),
            pl.BlockSpec(b_vecs[0].shape, lambda b: (0, 0)),
            pl.BlockSpec(w_mats[1].shape, lambda b: (0, 0)),
            pl.BlockSpec(b_vecs[1].shape, lambda b: (0, 0)),
            pl.BlockSpec(w_mats[2].shape, lambda b: (0, 0)),
            pl.BlockSpec(b_vecs[2].shape, lambda b: (0, 0)),
            pl.BlockSpec(w_mats[3].shape, lambda b: (0, 0)),
            pl.BlockSpec(b_vecs[3].shape, lambda b: (0, 0)),
        ],
        out_specs=(
            pl.BlockSpec((1, l_last, cout), lambda b: (b, 0, 0)),
            pl.BlockSpec((1, 1, 1), lambda b: (b, 0, 0)),
        ),
        scratch_shapes=[pltpu.VMEM((l_pad, 9 * _KPAD), jnp.float32)],
        compiler_params=pltpu.CompilerParams(
            dimension_semantics=("parallel",),
            vmem_limit_bytes=32 * 1024 * 1024,
        ),
        cost_estimate=pl.CostEstimate(
            flops=flops, transcendentals=0, bytes_accessed=bytes_accessed),
    )(xph, spec2, w_mats[0], b_vecs[0], w_mats[1], b_vecs[1],
      w_mats[2], b_vecs[2], w_mats[3], b_vecs[3])

    # Extract valid rows (row index = oh*Wp + ow) and flatten channel-major to
    # match PyTorch's (N, C*OH*OW) view(); one tiny XLA relayout at the very end.
    pad_rows = h_f * wp - l_last
    h_full = jnp.pad(h_raw, ((0, 0), (0, pad_rows), (0, 0)))
    h_nhwc = h_full.reshape(n, h_f, wp, cout)[:, :, :w_f, :]
    h_out = h_nhwc.transpose(0, 3, 1, 2).reshape(n, -1)

    if obs_cross is not None:
        # TODO(synk): PyTorch .long() is int64; JAX x64 is off by default, so int32.
        return h_out, hc.reshape(n)
    return h_out


# ----------------------------------------------------------------------------
# Synthetic parameters + pure-JAX reference (correctness sanity check)
# ----------------------------------------------------------------------------
def init_params(key, cin):
    channels = [cin, 32, 32, 32, 32]
    strides = [2, 1, 1, 1]
    params = []
    for i in range(4):
        key, wk = jax.random.split(key)
        fan_in = channels[i] * 9
        wl = jax.random.normal(
            wk, (channels[i + 1], channels[i], 3, 3), jnp.float32
        ) / np.sqrt(fan_in)
        bl = jnp.zeros((channels[i + 1],), jnp.float32)
        params.append((wl, bl, strides[i]))
    return params


def reference_forward(obs, params, threshold=1):
    pixels, obs_cross = obs["pixels"], obs["spectrogram"]
    h_cross = (
        jnp.sum((obs_cross > -0.99).astype(jnp.int32), axis=(1, 2, 3)) > threshold
    ).astype(jnp.int32)
    x = pixels.astype(jnp.float32) / 255.0 - 0.5
    for (wl, bl, s) in params:
        y = jax.lax.conv_general_dilated(
            x, wl, window_strides=(s, s), padding="VALID",
            dimension_numbers=("NCHW", "OIHW", "NCHW"),
        )
        x = jnp.maximum(y + bl[None, :, None, None], 0.0)
    return x.reshape(x.shape[0], -1), h_cross


if __name__ == "__main__":
    key = jax.random.PRNGKey(0)
    k_pix, k_spec, k_param = jax.random.split(key, 3)

    batch, cin, spatial = 2, 4, 16   # 16 -> 7 -> 5 -> 3 -> 1 through the conv stack
    obs = {
        "pixels": jax.random.uniform(
            k_pix, (batch, cin, spatial, spatial), jnp.float32, 0.0, 255.0
        ),
        "spectrogram": jax.random.uniform(
            k_spec, (batch, 1, 8, 8), jnp.float32, -1.0, 0.0
        ),
    }
    params = init_params(k_param, cin)

    h, h_cross = simple_cross_encoder_forward(obs, params, threshold=1)
    h = jax.block_until_ready(h)
    h_cross = jax.block_until_ready(h_cross)

    h_ref, h_cross_ref = reference_forward(obs, params, threshold=1)
    assert h.shape == (batch, 32 * 1 * 1)
    assert h_cross.shape == (batch,)
    # bf16 MXU inputs with f32 accumulation vs. an all-f32 reference.
    np.testing.assert_allclose(np.asarray(h), np.asarray(h_ref), rtol=2e-2, atol=5e-3)
    np.testing.assert_array_equal(np.asarray(h_cross), np.asarray(h_cross_ref))

    print("KERNEL_OK")
</pallas_src>

<mosaic_0001>
module attributes {stable_mosaic.version = 11 : i64} {
  func.func @_fused_encoder_kernel(%arg0: i32, %arg1: memref<1x4x64x4xf32, #tpu.memory_space<vmem>>, %arg2: memref<1x8x8xf32, #tpu.memory_space<vmem>>, %arg3: memref<1152x32xbf16, #tpu.memory_space<vmem>>, %arg4: memref<1x32xf32, #tpu.memory_space<vmem>>, %arg5: memref<1152x32xbf16, #tpu.memory_space<vmem>>, %arg6: memref<1x32xf32, #tpu.memory_space<vmem>>, %arg7: memref<1152x32xbf16, #tpu.memory_space<vmem>>, %arg8: memref<1x32xf32, #tpu.memory_space<vmem>>, %arg9: memref<1152x32xbf16, #tpu.memory_space<vmem>>, %arg10: memref<1x32xf32, #tpu.memory_space<vmem>>, %arg11: memref<1x1x32xf32, #tpu.memory_space<vmem>>, %arg12: memref<1x1x1xi32, #tpu.memory_space<vmem>>, %arg13: memref<56x1152xf32, #tpu.memory_space<vmem>>) attributes {dimension_semantics = [#tpu.dimension_semantics<parallel>], iteration_bounds = array<i64: 2>, scalar_prefetch = 0 : i64, scratch_operands = 1 : i64, tpu.core_type = #tpu.core_type<tc>, window_params = [{transform_indices = @transform_0, window_bounds = array<i64: 1, 4, 64, 4>}, {transform_indices = @transform_1, window_bounds = array<i64: 1, 8, 8>}, {pipeline_mode = #tpu.pipeline_mode<synchronous>, transform_indices = @transform_2, window_bounds = array<i64: 1152, 32>}, {pipeline_mode = #tpu.pipeline_mode<synchronous>, transform_indices = @transform_3, window_bounds = array<i64: 1, 32>}, {pipeline_mode = #tpu.pipeline_mode<synchronous>, transform_indices = @transform_4, window_bounds = array<i64: 1152, 32>}, {pipeline_mode = #tpu.pipeline_mode<synchronous>, transform_indices = @transform_5, window_bounds = array<i64: 1, 32>}, {pipeline_mode = #tpu.pipeline_mode<synchronous>, transform_indices = @transform_6, window_bounds = array<i64: 1152, 32>}, {pipeline_mode = #tpu.pipeline_mode<synchronous>, transform_indices = @transform_7, window_bounds = array<i64: 1, 32>}, {pipeline_mode = #tpu.pipeline_mode<synchronous>, transform_indices = @transform_8, window_bounds = array<i64: 1152, 32>}, {pipeline_mode = #tpu.pipeline_mode<synchronous>, transform_indices = @transform_9, window_bounds = array<i64: 1, 32>}, {transform_indices = @transform_10, window_bounds = array<i64: 1, 1, 32>}, {transform_indices = @transform_11, window_bounds = array<i64: 1, 1, 1>}]} {
    %c0 = arith.constant 0 : index
    %c0_0 = arith.constant 0 : index
    %c0_1 = arith.constant 0 : index
    %0 = vector.load %arg2[%c0, %c0_0, %c0_1] : memref<1x8x8xf32, #tpu.memory_space<vmem>>, vector<1x8x8xf32>
    %1 = vector.shape_cast %0 : vector<1x8x8xf32> to vector<8x8xf32>
    %cst = arith.constant -9.900000e-01 : f32
    %2 = vector.broadcast %cst : f32 to vector<8x8xf32>
    %3 = arith.cmpf ogt, %1, %2 : vector<8x8xf32>
    %4 = arith.extui %3 : vector<8x8xi1> to vector<8x8xi32>
    %5 = arith.sitofp %4 : vector<8x8xi32> to vector<8x8xf32>
    %6 = vector.shape_cast %5 : vector<8x8xf32> to vector<1x8x8xf32>
    %cst_2 = arith.constant dense<0.000000e+00> : vector<1xf32>
    %7 = vector.multi_reduction <add>, %6, %cst_2 [1, 2] : vector<1x8x8xf32> to vector<1xf32>
    %8 = vector.shape_cast %7 : vector<1xf32> to vector<1x1x1xf32>
    %9 = vector.extract %8[0, 0, 0] : f32 from vector<1x1x1xf32>
    %10 = vector.broadcast %9 : f32 to vector<1x1xf32>
    %cst_3 = arith.constant 1.000000e+00 : f32
    %11 = vector.broadcast %cst_3 : f32 to vector<1x1xf32>
    %12 = arith.cmpf ogt, %10, %11 : vector<1x1xf32>
    %13 = arith.extui %12 : vector<1x1xi1> to vector<1x1xi32>
    %c0_4 = arith.constant 0 : index
    %c0_5 = arith.constant 0 : index
    %c0_6 = arith.constant 0 : index
    %14 = vector.load %arg12[%c0_4, %c0_5, %c0_6] : memref<1x1x1xi32, #tpu.memory_space<vmem>>, vector<1x1x1xi32>
    %15 = vector.shape_cast %14 : vector<1x1x1xi32> to vector<1x1xi32>
    %16 = vector.shape_cast %13 : vector<1x1xi32> to vector<1x1x1xi32>
    tpu.vector_store %arg12[%c0_4, %c0_5, %c0_6], %16 {strides = array<i32>} : memref<1x1x1xi32, #tpu.memory_space<vmem>>, vector<1x1x1xi32>,
    %cst_7 = arith.constant 0.000000e+00 : f32
    %17 = vector.broadcast %cst_7 : f32 to vector<56x1152xf32>
    %c0_8 = arith.constant 0 : index
    %c0_9 = arith.constant 0 : index
    %18 = vector.load %arg13[%c0_8, %c0_9] : memref<56x1152xf32, #tpu.memory_space<vmem>>, vector<56x1152xf32>
    tpu.vector_store %arg13[%c0_8, %c0_9], %17 {strides = array<i32>} : memref<56x1152xf32, #tpu.memory_space<vmem>>, vector<56x1152xf32>,
    %c0_10 = arith.constant 0 : index
    %c0_11 = arith.constant 0 : index
    %c0_12 = arith.constant 0 : index
    %c0_13 = arith.constant 0 : index
    %19 = vector.load %arg1[%c0_10, %c0_11, %c0_12, %c0_13] : memref<1x4x64x4xf32, #tpu.memory_space<vmem>>, vector<1x4x64x4xf32>
    %20 = vector.shape_cast %19 : vector<1x4x64x4xf32> to vector<4x64x4xf32>
    %cst_14 = arith.constant 0.00392156886 : f32
    %21 = vector.broadcast %cst_14 : f32 to vector<4x64x4xf32>
    %22 = arith.mulf %20, %21 : vector<4x64x4xf32>
    %cst_15 = arith.constant 5.000000e-01 : f32
    %23 = vector.broadcast %cst_15 : f32 to vector<4x64x4xf32>
    %24 = arith.subf %22, %23 : vector<4x64x4xf32>
    %25 = vector.extract_strided_slice %24 {offsets = [0, 0, 0], sizes = [1, 55, 4], strides = [1, 1, 1]} : vector<4x64x4xf32> to vector<1x55x4xf32>
    %26 = vector.shape_cast %25 : vector<1x55x4xf32> to vector<55x4xf32>
    %c0_16 = arith.constant 0 : index
    %c0_17 = arith.constant 0 : index
    %27 = vector.load %arg13[%c0_16, %c0_17] : memref<56x1152xf32, #tpu.memory_space<vmem>>, vector<55x4xf32>
    tpu.vector_store %arg13[%c0_16, %c0_17], %26 {strides = array<i32>} : memref<56x1152xf32, #tpu.memory_space<vmem>>, vector<55x4xf32>,
    %28 = vector.extract_strided_slice %24 {offsets = [1, 0, 0], sizes = [1, 55, 4], strides = [1, 1, 1]} : vector<4x64x4xf32> to vector<1x55x4xf32>
    %29 = vector.shape_cast %28 : vector<1x55x4xf32> to vector<55x4xf32>
    %c0_18 = arith.constant 0 : index
    %c128 = arith.constant 128 : index
    %30 = vector.load %arg13[%c0_18, %c128] : memref<56x1152xf32, #tpu.memory_space<vmem>>, vector<55x4xf32>
    tpu.vector_store %arg13[%c0_18, %c128], %29 {strides = array<i32>} : memref<56x1152xf32, #tpu.memory_space<vmem>>, vector<55x4xf32>,
    %31 = vector.extract_strided_slice %24 {offsets = [0, 1, 0], sizes = [1, 55, 4], strides = [1, 1, 1]} : vector<4x64x4xf32> to vector<1x55x4xf32>
    %32 = vector.shape_cast %31 : vector<1x55x4xf32> to vector<55x4xf32>
    %c0_19 = arith.constant 0 : index
    %c256 = arith.constant 256 : index
    %33 = vector.load %arg13[%c0_19, %c256] : memref<56x1152xf32, #tpu.memory_space<vmem>>, vector<55x4xf32>
    tpu.vector_store %arg13[%c0_19, %c256], %32 {strides = array<i32>} : memref<56x1152xf32, #tpu.memory_space<vmem>>, vector<55x4xf32>,
    %34 = vector.extract_strided_slice %24 {offsets = [2, 0, 0], sizes = [1, 55, 4], strides = [1, 1, 1]} : vector<4x64x4xf32> to vector<1x55x4xf32>
    %35 = vector.shape_cast %34 : vector<1x55x4xf32> to vector<55x4xf32>
    %c0_20 = arith.constant 0 : index
    %c384 = arith.constant 384 : index
    %36 = vector.load %arg13[%c0_20, %c384] : memref<56x1152xf32, #tpu.memory_space<vmem>>, vector<55x4xf32>
    tpu.vector_store %arg13[%c0_20, %c384], %35 {strides = array<i32>} : memref<56x1152xf32, #tpu.memory_space<vmem>>, vector<55x4xf32>,
    %37 = vector.extract_strided_slice %24 {offsets = [3, 0, 0], sizes = [1, 55, 4], strides = [1, 1, 1]} : vector<4x64x4xf32> to vector<1x55x4xf32>
    %38 = vector.shape_cast %37 : vector<1x55x4xf32> to vector<55x4xf32>
    %c0_21 = arith.constant 0 : index
    %c512 = arith.constant 512 : index
    %39 = vector.load %arg13[%c0_21, %c512] : memref<56x1152xf32, #tpu.memory_space<vmem>>, vector<55x4xf32>
    tpu.vector_store %arg13[%c0_21, %c512], %38 {strides = array<i32>} : memref<56x1152xf32, #tpu.memory_space<vmem>>, vector<55x4xf32>,
    %40 = vector.extract_strided_slice %24 {offsets = [2, 1, 0], sizes = [1, 55, 4], strides = [1, 1, 1]} : vector<4x64x4xf32> to vector<1x55x4xf32>
    %41 = vector.shape_cast %40 : vector<1x55x4xf32> to vector<55x4xf32>
    %c0_22 = arith.constant 0 : index
    %c640 = arith.constant 640 : index
    %42 = vector.load %arg13[%c0_22, %c640] : memref<56x1152xf32, #tpu.memory_space<vmem>>, vector<55x4xf32>
    tpu.vector_store %arg13[%c0_22, %c640], %41 {strides = array<i32>} : memref<56x1152xf32, #tpu.memory_space<vmem>>, vector<55x4xf32>,
    %43 = vector.extract_strided_slice %24 {offsets = [0, 8, 0], sizes = [1, 55, 4], strides = [1, 1, 1]} : vector<4x64x4xf32> to vector<1x55x4xf32>
    %44 = vector.shape_cast %43 : vector<1x55x4xf32> to vector<55x4xf32>
    %c0_23 = arith.constant 0 : index
    %c768 = arith.constant 768 : index
    %45 = vector.load %arg13[%c0_23, %c768] : memref<56x1152xf32, #tpu.memory_space<vmem>>, vector<55x4xf32>
    tpu.vector_store %arg13[%c0_23, %c768], %44 {strides = array<i32>} : memref<56x1152xf32, #tpu.memory_space<vmem>>, vector<55x4xf32>,
    %46 = vector.extract_strided_slice %24 {offsets = [1, 8, 0], sizes = [1, 55, 4], strides = [1, 1, 1]} : vector<4x64x4xf32> to vector<1x55x4xf32>
    %47 = vector.shape_cast %46 : vector<1x55x4xf32> to vector<55x4xf32>
    %c0_24 = arith.constant 0 : index
    %c896 = arith.constant 896 : index
    %48 = vector.load %arg13[%c0_24, %c896] : memref<56x1152xf32, #tpu.memory_space<vmem>>, vector<55x4xf32>
    tpu.vector_store %arg13[%c0_24, %c896], %47 {strides = array<i32>} : memref<56x1152xf32, #tpu.memory_space<vmem>>, vector<55x4xf32>,
    %49 = vector.extract_strided_slice %24 {offsets = [0, 9, 0], sizes = [1, 55, 4], strides = [1, 1, 1]} : vector<4x64x4xf32> to vector<1x55x4xf32>
    %50 = vector.shape_cast %49 : vector<1x55x4xf32> to vector<55x4xf32>
    %c0_25 = arith.constant 0 : index
    %c1024 = arith.constant 1024 : index
    %51 = vector.load %arg13[%c0_25, %c1024] : memref<56x1152xf32, #tpu.memory_space<vmem>>, vector<55x4xf32>
    tpu.vector_store %arg13[%c0_25, %c1024], %50 {strides = array<i32>} : memref<56x1152xf32, #tpu.memory_space<vmem>>, vector<55x4xf32>,
    %c0_26 = arith.constant 0 : index
    %c0_27 = arith.constant 0 : index
    %52 = vector.load %arg13[%c0_26, %c0_27] : memref<56x1152xf32, #tpu.memory_space<vmem>>, vector<55x1152xf32>
    %53 = arith.truncf %52 : vector<55x1152xf32> to vector<55x1152xbf16>
    %c0_28 = arith.constant 0 : index
    %c0_29 = arith.constant 0 : index
    %54 = vector.load %arg3[%c0_28, %c0_29] : memref<1152x32xbf16, #tpu.memory_space<vmem>>, vector<1152x32xbf16>
    %cst_30 = arith.constant dense<0.000000e+00> : vector<55x32xf32>
    %55 = tpu.matmul %53, %54, %cst_30 {dimension_numbers = #tpu.dot_dimension_numbers<[1], [0], [0], [1], [0, 0, 1, 1], [], []>} : vector<55x1152xbf16>, vector<1152x32xbf16>, vector<55x32xf32> -> vector<55x32xf32>
    %c0_31 = arith.constant 0 : index
    %c0_32 = arith.constant 0 : index
    %56 = vector.load %arg4[%c0_31, %c0_32] : memref<1x32xf32, #tpu.memory_space<vmem>>, vector<1x32xf32>
    %57 = vector.broadcast %56 : vector<1x32xf32> to vector<55x32xf32>
    %58 = arith.addf %55, %57 : vector<55x32xf32>
    %cst_33 = arith.constant 0.000000e+00 : f32
    %59 = vector.broadcast %cst_33 : f32 to vector<55x32xf32>
    %60 = arith.maximumf %58, %59 : vector<55x32xf32>
    %61 = vector.extract_strided_slice %60 {offsets = [0, 0], sizes = [37, 32], strides = [1, 1]} : vector<55x32xf32> to vector<37x32xf32>
    %c0_34 = arith.constant 0 : index
    %c0_35 = arith.constant 0 : index
    %62 = vector.load %arg13[%c0_34, %c0_35] : memref<56x1152xf32, #tpu.memory_space<vmem>>, vector<37x32xf32>
    tpu.vector_store %arg13[%c0_34, %c0_35], %61 {strides = array<i32>} : memref<56x1152xf32, #tpu.memory_space<vmem>>, vector<37x32xf32>,
    %63 = vector.extract_strided_slice %60 {offsets = [1, 0], sizes = [37, 32], strides = [1, 1]} : vector<55x32xf32> to vector<37x32xf32>
    %c0_36 = arith.constant 0 : index
    %c128_37 = arith.constant 128 : index
    %64 = vector.load %arg13[%c0_36, %c128_37] : memref<56x1152xf32, #tpu.memory_space<vmem>>, vector<37x32xf32>
    tpu.vector_store %arg13[%c0_36, %c128_37], %63 {strides = array<i32>} : memref<56x1152xf32, #tpu.memory_space<vmem>>, vector<37x32xf32>,
    %65 = vector.extract_strided_slice %60 {offsets = [2, 0], sizes = [37, 32], strides = [1, 1]} : vector<55x32xf32> to vector<37x32xf32>
    %c0_38 = arith.constant 0 : index
    %c256_39 = arith.constant 256 : index
    %66 = vector.load %arg13[%c0_38, %c256_39] : memref<56x1152xf32, #tpu.memory_space<vmem>>, vector<37x32xf32>
    tpu.vector_store %arg13[%c0_38, %c256_39], %65 {strides = array<i32>} : memref<56x1152xf32, #tpu.memory_space<vmem>>, vector<37x32xf32>,
    %67 = vector.extract_strided_slice %60 {offsets = [8, 0], sizes = [37, 32], strides = [1, 1]} : vector<55x32xf32> to vector<37x32xf32>
    %c0_40 = arith.constant 0 : index
    %c384_41 = arith.constant 384 : index
    %68 = vector.load %arg13[%c0_40, %c384_41] : memref<56x1152xf32, #tpu.memory_space<vmem>>, vector<37x32xf32>
    tpu.vector_store %arg13[%c0_40, %c384_41], %67 {strides = array<i32>} : memref<56x1152xf32, #tpu.memory_space<vmem>>, vector<37x32xf32>,
    %69 = vector.extract_strided_slice %60 {offsets = [9, 0], sizes = [37, 32], strides = [1, 1]} : vector<55x32xf32> to vector<37x32xf32>
    %c0_42 = arith.constant 0 : index
    %c512_43 = arith.constant 512 : index
    %70 = vector.load %arg13[%c0_42, %c512_43] : memref<56x1152xf32, #tpu.memory_space<vmem>>, vector<37x32xf32>
    tpu.vector_store %arg13[%c0_42, %c512_43], %69 {strides = array<i32>} : memref<56x1152xf32, #tpu.memory_space<vmem>>, vector<37x32xf32>,
    %71 = vector.extract_strided_slice %60 {offsets = [10, 0], sizes = [37, 32], strides = [1, 1]} : vector<55x32xf32> to vector<37x32xf32>
    %c0_44 = arith.constant 0 : index
    %c640_45 = arith.constant 640 : index
    %72 = vector.load %arg13[%c0_44, %c640_45] : memref<56x1152xf32, #tpu.memory_space<vmem>>, vector<37x32xf32>
    tpu.vector_store %arg13[%c0_44, %c640_45], %71 {strides = array<i32>} : memref<56x1152xf32, #tpu.memory_space<vmem>>, vector<37x32xf32>,
    %73 = vector.extract_strided_slice %60 {offsets = [16, 0], sizes = [37, 32], strides = [1, 1]} : vector<55x32xf32> to vector<37x32xf32>
    %c0_46 = arith.constant 0 : index
    %c768_47 = arith.constant 768 : index
    %74 = vector.load %arg13[%c0_46, %c768_47] : memref<56x1152xf32, #tpu.memory_space<vmem>>, vector<37x32xf32>
    tpu.vector_store %arg13[%c0_46, %c768_47], %73 {strides = array<i32>} : memref<56x1152xf32, #tpu.memory_space<vmem>>, vector<37x32xf32>,
    %75 = vector.extract_strided_slice %60 {offsets = [17, 0], sizes = [37, 32], strides = [1, 1]} : vector<55x32xf32> to vector<37x32xf32>
    %c0_48 = arith.constant 0 : index
    %c896_49 = arith.constant 896 : index
    %76 = vector.load %arg13[%c0_48, %c896_49] : memref<56x1152xf32, #tpu.memory_space<vmem>>, vector<37x32xf32>
    tpu.vector_store %arg13[%c0_48, %c896_49], %75 {strides = array<i32>} : memref<56x1152xf32, #tpu.memory_space<vmem>>, vector<37x32xf32>,
    %77 = vector.extract_strided_slice %60 {offsets = [18, 0], sizes = [37, 32], strides = [1, 1]} : vector<55x32xf32> to vector<37x32xf32>
    %c0_50 = arith.constant 0 : index
    %c1024_51 = arith.constant 1024 : index
    %78 = vector.load %arg13[%c0_50, %c1024_51] : memref<56x1152xf32, #tpu.memory_space<vmem>>, vector<37x32xf32>
    tpu.vector_store %arg13[%c0_50, %c1024_51], %77 {strides = array<i32>} : memref<56x1152xf32, #tpu.memory_space<vmem>>, vector<37x32xf32>,
    %c0_52 = arith.constant 0 : index
    %c0_53 = arith.constant 0 : index
    %79 = vector.load %arg13[%c0_52, %c0_53] : memref<56x1152xf32, #tpu.memory_space<vmem>>, vector<37x1152xf32>
    %80 = arith.truncf %79 : vector<37x1152xf32> to vector<37x1152xbf16>
    %c0_54 = arith.constant 0 : index
    %c0_55 = arith.constant 0 : index
    %81 = vector.load %arg5[%c0_54, %c0_55] : memref<1152x32xbf16, #tpu.memory_space<vmem>>, vector<1152x32xbf16>
    %cst_56 = arith.constant dense<0.000000e+00> : vector<37x32xf32>
    %82 = tpu.matmul %80, %81, %cst_56 {dimension_numbers = #tpu.dot_dimension_numbers<[1], [0], [0], [1], [0, 0, 1, 1], [], []>} : vector<37x1152xbf16>, vector<1152x32xbf16>, vector<37x32xf32> -> vector<37x32xf32>
    %c0_57 = arith.constant 0 : index
    %c0_58 = arith.constant 0 : index
    %83 = vector.load %arg6[%c0_57, %c0_58] : memref<1x32xf32, #tpu.memory_space<vmem>>, vector<1x32xf32>
    %84 = vector.broadcast %83 : vector<1x32xf32> to vector<37x32xf32>
    %85 = arith.addf %82, %84 : vector<37x32xf32>
    %cst_59 = arith.constant 0.000000e+00 : f32
    %86 = vector.broadcast %cst_59 : f32 to vector<37x32xf32>
    %87 = arith.maximumf %85, %86 : vector<37x32xf32>
    %88 = vector.extract_strided_slice %87 {offsets = [0, 0], sizes = [19, 32], strides = [1, 1]} : vector<37x32xf32> to vector<19x32xf32>
    %c0_60 = arith.constant 0 : index
    %c0_61 = arith.constant 0 : index
    %89 = vector.load %arg13[%c0_60, %c0_61] : memref<56x1152xf32, #tpu.memory_space<vmem>>, vector<19x32xf32>
    tpu.vector_store %arg13[%c0_60, %c0_61], %88 {strides = array<i32>} : memref<56x1152xf32, #tpu.memory_space<vmem>>, vector<19x32xf32>,
    %90 = vector.extract_strided_slice %87 {offsets = [1, 0], sizes = [19, 32], strides = [1, 1]} : vector<37x32xf32> to vector<19x32xf32>
    %c0_62 = arith.constant 0 : index
    %c128_63 = arith.constant 128 : index
    %91 = vector.load %arg13[%c0_62, %c128_63] : memref<56x1152xf32, #tpu.memory_space<vmem>>, vector<19x32xf32>
    tpu.vector_store %arg13[%c0_62, %c128_63], %90 {strides = array<i32>} : memref<56x1152xf32, #tpu.memory_space<vmem>>, vector<19x32xf32>,
    %92 = vector.extract_strided_slice %87 {offsets = [2, 0], sizes = [19, 32], strides = [1, 1]} : vector<37x32xf32> to vector<19x32xf32>
    %c0_64 = arith.constant 0 : index
    %c256_65 = arith.constant 256 : index
    %93 = vector.load %arg13[%c0_64, %c256_65] : memref<56x1152xf32, #tpu.memory_space<vmem>>, vector<19x32xf32>
    tpu.vector_store %arg13[%c0_64, %c256_65], %92 {strides = array<i32>} : memref<56x1152xf32, #tpu.memory_space<vmem>>, vector<19x32xf32>,
    %94 = vector.extract_strided_slice %87 {offsets = [8, 0], sizes = [19, 32], strides = [1, 1]} : vector<37x32xf32> to vector<19x32xf32>
    %c0_66 = arith.constant 0 : index
    %c384_67 = arith.constant 384 : index
    %95 = vector.load %arg13[%c0_66, %c384_67] : memref<56x1152xf32, #tpu.memory_space<vmem>>, vector<19x32xf32>
    tpu.vector_store %arg13[%c0_66, %c384_67], %94 {strides = array<i32>} : memref<56x1152xf32, #tpu.memory_space<vmem>>, vector<19x32xf32>,
    %96 = vector.extract_strided_slice %87 {offsets = [9, 0], sizes = [19, 32], strides = [1, 1]} : vector<37x32xf32> to vector<19x32xf32>
    %c0_68 = arith.constant 0 : index
    %c512_69 = arith.constant 512 : index
    %97 = vector.load %arg13[%c0_68, %c512_69] : memref<56x1152xf32, #tpu.memory_space<vmem>>, vector<19x32xf32>
    tpu.vector_store %arg13[%c0_68, %c512_69], %96 {strides = array<i32>} : memref<56x1152xf32, #tpu.memory_space<vmem>>, vector<19x32xf32>,
    %98 = vector.extract_strided_slice %87 {offsets = [10, 0], sizes = [19, 32], strides = [1, 1]} : vector<37x32xf32> to vector<19x32xf32>
    %c0_70 = arith.constant 0 : index
    %c640_71 = arith.constant 640 : index
    %99 = vector.load %arg13[%c0_70, %c640_71] : memref<56x1152xf32, #tpu.memory_space<vmem>>, vector<19x32xf32>
    tpu.vector_store %arg13[%c0_70, %c640_71], %98 {strides = array<i32>} : memref<56x1152xf32, #tpu.memory_space<vmem>>, vector<19x32xf32>,
    %100 = vector.extract_strided_slice %87 {offsets = [16, 0], sizes = [19, 32], strides = [1, 1]} : vector<37x32xf32> to vector<19x32xf32>
    %c0_72 = arith.constant 0 : index
    %c768_73 = arith.constant 768 : index
    %101 = vector.load %arg13[%c0_72, %c768_73] : memref<56x1152xf32, #tpu.memory_space<vmem>>, vector<19x32xf32>
    tpu.vector_store %arg13[%c0_72, %c768_73], %100 {strides = array<i32>} : memref<56x1152xf32, #tpu.memory_space<vmem>>, vector<19x32xf32>,
    %102 = vector.extract_strided_slice %87 {offsets = [17, 0], sizes = [19, 32], strides = [1, 1]} : vector<37x32xf32> to vector<19x32xf32>
    %c0_74 = arith.constant 0 : index
    %c896_75 = arith.constant 896 : index
    %103 = vector.load %arg13[%c0_74, %c896_75] : memref<56x1152xf32, #tpu.memory_space<vmem>>, vector<19x32xf32>
    tpu.vector_store %arg13[%c0_74, %c896_75], %102 {strides = array<i32>} : memref<56x1152xf32, #tpu.memory_space<vmem>>, vector<19x32xf32>,
    %104 = vector.extract_strided_slice %87 {offsets = [18, 0], sizes = [19, 32], strides = [1, 1]} : vector<37x32xf32> to vector<19x32xf32>
    %c0_76 = arith.constant 0 : index
    %c1024_77 = arith.constant 1024 : index
    %105 = vector.load %arg13[%c0_76, %c1024_77] : memref<56x1152xf32, #tpu.memory_space<vmem>>, vector<19x32xf32>
    tpu.vector_store %arg13[%c0_76, %c1024_77], %104 {strides = array<i32>} : memref<56x1152xf32, #tpu.memory_space<vmem>>, vector<19x32xf32>,
    %c0_78 = arith.constant 0 : index
    %c0_79 = arith.constant 0 : index
    %106 = vector.load %arg13[%c0_78, %c0_79] : memref<56x1152xf32, #tpu.memory_space<vmem>>, vector<19x1152xf32>
    %107 = arith.truncf %106 : vector<19x1152xf32> to vector<19x1152xbf16>
    %c0_80 = arith.constant 0 : index
    %c0_81 = arith.constant 0 : index
    %108 = vector.load %arg7[%c0_80, %c0_81] : memref<1152x32xbf16, #tpu.memory_space<vmem>>, vector<1152x32xbf16>
    %cst_82 = arith.constant dense<0.000000e+00> : vector<19x32xf32>
    %109 = tpu.matmul %107, %108, %cst_82 {dimension_numbers = #tpu.dot_dimension_numbers<[1], [0], [0], [1], [0, 0, 1, 1], [], []>} : vector<19x1152xbf16>, vector<1152x32xbf16>, vector<19x32xf32> -> vector<19x32xf32>
    %c0_83 = arith.constant 0 : index
    %c0_84 = arith.constant 0 : index
    %110 = vector.load %arg8[%c0_83, %c0_84] : memref<1x32xf32, #tpu.memory_space<vmem>>, vector<1x32xf32>
    %111 = vector.broadcast %110 : vector<1x32xf32> to vector<19x32xf32>
    %112 = arith.addf %109, %111 : vector<19x32xf32>
    %cst_85 = arith.constant 0.000000e+00 : f32
    %113 = vector.broadcast %cst_85 : f32 to vector<19x32xf32>
    %114 = arith.maximumf %112, %113 : vector<19x32xf32>
    %115 = vector.extract_strided_slice %114 {offsets = [0, 0], sizes = [1, 32], strides = [1, 1]} : vector<19x32xf32> to vector<1x32xf32>
    %c0_86 = arith.constant 0 : index
    %c0_87 = arith.constant 0 : index
    %116 = vector.load %arg13[%c0_86, %c0_87] : memref<56x1152xf32, #tpu.memory_space<vmem>>, vector<1x32xf32>
    tpu.vector_store %arg13[%c0_86, %c0_87], %115 {strides = array<i32>} : memref<56x1152xf32, #tpu.memory_space<vmem>>, vector<1x32xf32>,
    %117 = vector.extract_strided_slice %114 {offsets = [1, 0], sizes = [1, 32], strides = [1, 1]} : vector<19x32xf32> to vector<1x32xf32>
    %c0_88 = arith.constant 0 : index
    %c128_89 = arith.constant 128 : index
    %118 = vector.load %arg13[%c0_88, %c128_89] : memref<56x1152xf32, #tpu.memory_space<vmem>>, vector<1x32xf32>
    tpu.vector_store %arg13[%c0_88, %c128_89], %117 {strides = array<i32>} : memref<56x1152xf32, #tpu.memory_space<vmem>>, vector<1x32xf32>,
    %119 = vector.extract_strided_slice %114 {offsets = [2, 0], sizes = [1, 32], strides = [1, 1]} : vector<19x32xf32> to vector<1x32xf32>
    %c0_90 = arith.constant 0 : index
    %c256_91 = arith.constant 256 : index
    %120 = vector.load %arg13[%c0_90, %c256_91] : memref<56x1152xf32, #tpu.memory_space<vmem>>, vector<1x32xf32>
    tpu.vector_store %arg13[%c0_90, %c256_91], %119 {strides = array<i32>} : memref<56x1152xf32, #tpu.memory_space<vmem>>, vector<1x32xf32>,
    %121 = vector.extract_strided_slice %114 {offsets = [8, 0], sizes = [1, 32], strides = [1, 1]} : vector<19x32xf32> to vector<1x32xf32>
    %c0_92 = arith.constant 0 : index
    %c384_93 = arith.constant 384 : index
    %122 = vector.load %arg13[%c0_92, %c384_93] : memref<56x1152xf32, #tpu.memory_space<vmem>>, vector<1x32xf32>
    tpu.vector_store %arg13[%c0_92, %c384_93], %121 {strides = array<i32>} : memref<56x1152xf32, #tpu.memory_space<vmem>>, vector<1x32xf32>,
    %123 = vector.extract_strided_slice %114 {offsets = [9, 0], sizes = [1, 32], strides = [1, 1]} : vector<19x32xf32> to vector<1x32xf32>
    %c0_94 = arith.constant 0 : index
    %c512_95 = arith.constant 512 : index
    %124 = vector.load %arg13[%c0_94, %c512_95] : memref<56x1152xf32, #tpu.memory_space<vmem>>, vector<1x32xf32>
    tpu.vector_store %arg13[%c0_94, %c512_95], %123 {strides = array<i32>} : memref<56x1152xf32, #tpu.memory_space<vmem>>, vector<1x32xf32>,
    %125 = vector.extract_strided_slice %114 {offsets = [10, 0], sizes = [1, 32], strides = [1, 1]} : vector<19x32xf32> to vector<1x32xf32>
    %c0_96 = arith.constant 0 : index
    %c640_97 = arith.constant 640 : index
    %126 = vector.load %arg13[%c0_96, %c640_97] : memref<56x1152xf32, #tpu.memory_space<vmem>>, vector<1x32xf32>
    tpu.vector_store %arg13[%c0_96, %c640_97], %125 {strides = array<i32>} : memref<56x1152xf32, #tpu.memory_space<vmem>>, vector<1x32xf32>,
    %127 = vector.extract_strided_slice %114 {offsets = [16, 0], sizes = [1, 32], strides = [1, 1]} : vector<19x32xf32> to vector<1x32xf32>
    %c0_98 = arith.constant 0 : index
    %c768_99 = arith.constant 768 : index
    %128 = vector.load %arg13[%c0_98, %c768_99] : memref<56x1152xf32, #tpu.memory_space<vmem>>, vector<1x32xf32>
    tpu.vector_store %arg13[%c0_98, %c768_99], %127 {strides = array<i32>} : memref<56x1152xf32, #tpu.memory_space<vmem>>, vector<1x32xf32>,
    %129 = vector.extract_strided_slice %114 {offsets = [17, 0], sizes = [1, 32], strides = [1, 1]} : vector<19x32xf32> to vector<1x32xf32>
    %c0_100 = arith.constant 0 : index
    %c896_101 = arith.constant 896 : index
    %130 = vector.load %arg13[%c0_100, %c896_101] : memref<56x1152xf32, #tpu.memory_space<vmem>>, vector<1x32xf32>
    tpu.vector_store %arg13[%c0_100, %c896_101], %129 {strides = array<i32>} : memref<56x1152xf32, #tpu.memory_space<vmem>>, vector<1x32xf32>,
    %131 = vector.extract_strided_slice %114 {offsets = [18, 0], sizes = [1, 32], strides = [1, 1]} : vector<19x32xf32> to vector<1x32xf32>
    %c0_102 = arith.constant 0 : index
    %c1024_103 = arith.constant 1024 : index
    %132 = vector.load %arg13[%c0_102, %c1024_103] : memref<56x1152xf32, #tpu.memory_space<vmem>>, vector<1x32xf32>
    tpu.vector_store %arg13[%c0_102, %c1024_103], %131 {strides = array<i32>} : memref<56x1152xf32, #tpu.memory_space<vmem>>, vector<1x32xf32>,
    %c0_104 = arith.constant 0 : index
    %c0_105 = arith.constant 0 : index
    %133 = vector.load %arg13[%c0_104, %c0_105] : memref<56x1152xf32, #tpu.memory_space<vmem>>, vector<8x1152xf32>
    %134 = arith.truncf %133 : vector<8x1152xf32> to vector<8x1152xbf16>
    %c0_106 = arith.constant 0 : index
    %c0_107 = arith.constant 0 : index
    %135 = vector.load %arg9[%c0_106, %c0_107] : memref<1152x32xbf16, #tpu.memory_space<vmem>>, vector<1152x32xbf16>
    %cst_108 = arith.constant dense<0.000000e+00> : vector<8x32xf32>
    %136 = tpu.matmul %134, %135, %cst_108 {dimension_numbers = #tpu.dot_dimension_numbers<[1], [0], [0], [1], [0, 0, 1, 1], [], []>} : vector<8x1152xbf16>, vector<1152x32xbf16>, vector<8x32xf32> -> vector<8x32xf32>
    %c0_109 = arith.constant 0 : index
    %c0_110 = arith.constant 0 : index
    %137 = vector.load %arg10[%c0_109, %c0_110] : memref<1x32xf32, #tpu.memory_space<vmem>>, vector<1x32xf32>
    %138 = vector.broadcast %137 : vector<1x32xf32> to vector<8x32xf32>
    %139 = arith.addf %136, %138 : vector<8x32xf32>
    %cst_111 = arith.constant 0.000000e+00 : f32
    %140 = vector.broadcast %cst_111 : f32 to vector<8x32xf32>
    %141 = arith.maximumf %139, %140 : vector<8x32xf32>
    %142 = vector.extract_strided_slice %141 {offsets = [0, 0], sizes = [1, 32], strides = [1, 1]} : vector<8x32xf32> to vector<1x32xf32>
    %c0_112 = arith.constant 0 : index
    %c0_113 = arith.constant 0 : index
    %c0_114 = arith.constant 0 : index
    %143 = vector.load %arg11[%c0_112, %c0_113, %c0_114] : memref<1x1x32xf32, #tpu.memory_space<vmem>>, vector<1x1x32xf32>
    %144 = vector.shape_cast %143 : vector<1x1x32xf32> to vector<1x32xf32>
    %145 = vector.shape_cast %142 : vector<1x32xf32> to vector<1x1x32xf32>
    tpu.vector_store %arg11[%c0_112, %c0_113, %c0_114], %145 {strides = array<i32>} : memref<1x1x32xf32, #tpu.memory_space<vmem>>, vector<1x1x32xf32>,
    return
  }
  func.func @transform_0(%arg0: i32) -> (i32, i32, i32, i32) {
    %c0_i32 = arith.constant 0 : i32
    %c0_i32_0 = arith.constant 0 : i32
    %c0_i32_1 = arith.constant 0 : i32
    %c0_i32_2 = arith.constant 0 : i32
    return %arg0, %c0_i32, %c0_i32_0, %c0_i32_1 : i32, i32, i32, i32
  }
  func.func @transform_1(%arg0: i32) -> (i32, i32, i32) {
    %c0_i32 = arith.constant 0 : i32
    %c0_i32_0 = arith.constant 0 : i32
    %c0_i32_1 = arith.constant 0 : i32
    return %arg0, %c0_i32, %c0_i32_0 : i32, i32, i32
  }
  func.func @transform_2(%arg0: i32) -> (i32, i32) {
    %c0_i32 = arith.constant 0 : i32
    %c0_i32_0 = arith.constant 0 : i32
    %c0_i32_1 = arith.constant 0 : i32
    return %c0_i32, %c0_i32_0 : i32, i32
  }
  func.func @transform_3(%arg0: i32) -> (i32, i32) {
    %c0_i32 = arith.constant 0 : i32
    %c0_i32_0 = arith.constant 0 : i32
    %c0_i32_1 = arith.constant 0 : i32
    return %c0_i32, %c0_i32_0 : i32, i32
  }
  func.func @transform_4(%arg0: i32) -> (i32, i32) {
    %c0_i32 = arith.constant 0 : i32
    %c0_i32_0 = arith.constant 0 : i32
    %c0_i32_1 = arith.constant 0 : i32
    return %c0_i32, %c0_i32_0 : i32, i32
  }
  func.func @transform_5(%arg0: i32) -> (i32, i32) {
    %c0_i32 = arith.constant 0 : i32
    %c0_i32_0 = arith.constant 0 : i32
    %c0_i32_1 = arith.constant 0 : i32
    return %c0_i32, %c0_i32_0 : i32, i32
  }
  func.func @transform_6(%arg0: i32) -> (i32, i32) {
    %c0_i32 = arith.constant 0 : i32
    %c0_i32_0 = arith.constant 0 : i32
    %c0_i32_1 = arith.constant 0 : i32
    return %c0_i32, %c0_i32_0 : i32, i32
  }
  func.func @transform_7(%arg0: i32) -> (i32, i32) {
    %c0_i32 = arith.constant 0 : i32
    %c0_i32_0 = arith.constant 0 : i32
    %c0_i32_1 = arith.constant 0 : i32
    return %c0_i32, %c0_i32_0 : i32, i32
  }
  func.func @transform_8(%arg0: i32) -> (i32, i32) {
    %c0_i32 = arith.constant 0 : i32
    %c0_i32_0 = arith.constant 0 : i32
    %c0_i32_1 = arith.constant 0 : i32
    return %c0_i32, %c0_i32_0 : i32, i32
  }
  func.func @transform_9(%arg0: i32) -> (i32, i32) {
    %c0_i32 = arith.constant 0 : i32
    %c0_i32_0 = arith.constant 0 : i32
    %c0_i32_1 = arith.constant 0 : i32
    return %c0_i32, %c0_i32_0 : i32, i32
  }
  func.func @transform_10(%arg0: i32) -> (i32, i32, i32) {
    %c0_i32 = arith.constant 0 : i32
    %c0_i32_0 = arith.constant 0 : i32
    %c0_i32_1 = arith.constant 0 : i32
    return %arg0, %c0_i32, %c0_i32_0 : i32, i32, i32
  }
  func.func @transform_11(%arg0: i32) -> (i32, i32, i32) {
    %c0_i32 = arith.constant 0 : i32
    %c0_i32_0 = arith.constant 0 : i32
    %c0_i32_1 = arith.constant 0 : i32
    return %arg0, %c0_i32, %c0_i32_0 : i32, i32, i32
  }
}

</mosaic_0001>

<bundles_post_ra>
// kernel: tpu_custom_call.1
= control target key start
LH: loop header
LB: loop body
LE: loop exit
PB: predicated region body
PF: predicated region fallthrough
CT: control target
= control target key end

     0   :  { %17 = vsyncpa [#allocation4], 0  ;;  %s7536_s0 = inlined_call_operand.vmem [shape: f32[2,4,64,4], index: 0, kind: input, shape index: {}]   ;;  %s7537_s1 = inlined_call_operand.vmem [shape: f32[2,8,8], index: 1, kind: input, shape index: {}]   ;;  %s7538_s2 = inlined_call_operand.vmem [shape: bf16[1152,32], index: 2, kind: input, shape index: {}]   ;;  %s7539_s3 = inlined_call_operand.vmem [shape: f32[1,32], index: 3, kind: input, shape index: {}]   ;;  %s7540_s4 = inlined_call_operand.vmem [shape: bf16[1152,32], index: 4, kind: input, shape index: {}]   ;;  %s7541_s5 = inlined_call_operand.vmem [shape: f32[1,32], index: 5, kind: input, shape index: {}]   ;;  %s7542_s6 = inlined_call_operand.vmem [shape: bf16[1152,32], index: 6, kind: input, shape index: {}]   ;;  %s7543_s7 = inlined_call_operand.vmem [shape: f32[1,32], index: 7, kind: input, shape index: {}]   ;;  %s7544_s8 = inlined_call_operand.vmem [shape: bf16[1152,32], index: 8, kind: input, shape index: {}]   ;;  %s7545_s9 = inlined_call_operand.vmem [shape: f32[1,32], index: 9, kind: input, shape index: {}]   ;;  %s7546_s10 = inlined_call_operand.hbm [shape: f32[2,1,32], index: 10, kind: output, shape index: {0}]   ;;  %s7547_s11 = inlined_call_operand.vmem [shape: s32[2,1,1], index: 11, kind: output, shape index: {1}]  }
   0x1   :  { %19 = vsyncpa [#allocation4 + $0x1], 0  ;;  %s5965_s17 = smov 0   ;;  %s5967_s18 = smov 0  }
   0x2   :  { %s5969_s19 = smov 0   ;;  %s5971_s20 = smov 0  }
   0x3 LB: > { %7549 = sst [smem:[#allocation6_spill]] %s5897_s19  ;;  %s5986_s21 = sadd.s32 4294967295, %s5901_s20   ;;  %s5901_s20 = sphi %s5971_s20, %s7557_s20   ;;  %s5897_s19 = sphi %s5969_s19, %s7554_s19   ;;  %s5893_s18 = sphi %s5967_s18, %s7556_s18   ;;  %s5889_s17 = sphi %s5965_s17, %s7555_s17  }
   0x4   : > { %s4311_s22 = sadd.s32 4294967294, %s5901_s20   ;;  %s5990_s23 = sadd.s32 1, %s5901_s20  }
   0x5   : > { %s252_s24 = sadd.s32 1, %s5897_s19  ;;  %s249_s25 = ssub.s32 %s5901_s20, %s5990_s23 }
   0x6   : > { %p262_p0 = scmp.ne.s32.totalorder %s5897_s19, %s5893_s18  ;;  %p250_p1 = scmp.eq.s32.totalorder %s249_s25, 0 }
   0x7   : > { %p263_p2 = scmp.eq.s32.totalorder %s5986_s21, 1  ;;  %p268_p3 = scmp.ne.s32.totalorder %s5893_s18, %s5889_s17 }
   0x8   : > { %p269_p4 = scmp.eq.s32.totalorder %s4311_s22, 1  ;;  %p4314_p7 = scmp.ge.s32.totalorder %s5901_s20, 1 }
   0x9   : > { %s6001_s26 = scalar_select %p250_p1, %s5897_s19, %s252_s24  }
   0xa   : > { %p6003_p5 = por %p263_p2, %p262_p0  ;;  %p6007_p6 = por %p269_p4, %p268_p3 }
   0xb   : > { %7550 = sst [smem:[#allocation7_spill]] %s6001_s26  ;;  %p352_p8 = scmp.lt.s32.totalorder %s5901_s20, 3 }
   0xd   : > { %p353_p9 = pnand %p4314_p7, %p352_p8 }
   0xe   : > { %p398_p10 = scmp.lt.s32.totalorder (!%p353_p9), %s5986_s21, 1  ;;  %s4218_s15 = scalar_lea.hbm (!%p353_p9), %s7546_s10, %s5986_s21 }
   0xf   : > { %356 = sbr.rel (%p353_p9) target bundleno = 1017 (0x3f9), region = 60  ;;  %s4222_s29 = sshll.u32 (!%p353_p9), %s4218_s15, 4  ;;  %s4223_s29 = int_to_ptr.hbm [resolvable:$true] %s4222_s29 }
  0x14   : > { %v5511_v0 = vld [vmem:[%s7538_s2 + $0x38] sm:$0xff]  ;;  %v5903_v4 = vmov 0.0   ;;  %v5510_v5 = vld [vmem:[%s7538_s2 + $0x30] sm:$0xff]  ;;  %s6034_s12 = scalar_select %p398_p10, %s5986_s21, 1  ;;  %v5509_v9 = vld [vmem:[%s7538_s2 + $0x28] sm:$0xff]  ;;  %vm583_vm0 = vcmask 31744  }
  0x15   : > { %v5527_v1 = vld [vmem:[%s7538_s2 + $0xb8] sm:$0xff]  ;;  %430 = vst [vmem:[#allocation2] sm:$0xff] %v5903_v4  ;;  %1387 = vmatpush.bf16.msra.mxu0 %v5511_v0  ;;  %v5526_v6 = vld [vmem:[%s7538_s2 + $0xb0] sm:$0xff]  ;;  %v5525_v10 = vld [vmem:[%s7538_s2 + $0xa8] sm:$0xff]  ;;  %vm606_vm1 = vcmask 1046528   ;;  %vm590_vm2 = vcmask 30720  }
  0x16   : > { %v5519_v2 = vld [vmem:[%s7538_s2 + $0x78] sm:$0xff]  ;;  %1443 = vmatpush.bf16.msra.mxu2 %v5527_v1  ;;  %439 = vst [vmem:[#allocation2 + $0x48] sm:$0xff] %v5903_v4  ;;  %v5518_v7 = vld [vmem:[%s7538_s2 + $0x70] sm:$0xff]  ;;  %s5503_s22 = sshll.u32 %s6034_s12, 8  ;;  %v5517_v11 = vld [vmem:[%s7538_s2 + $0x68] sm:$0xff]  ;;  %vm1646_vm3 = vcmask 261120  }
  0x17   : > { %v5535_v3 = vld [vmem:[%s7538_s2 + $0xf8] sm:$0xff]  ;;  %1415 = vmatpush.bf16.msra.mxu1 %v5519_v2  ;;  %v5534_v8 = vld [vmem:[%s7538_s2 + $0xf0] sm:$0xff]  ;;  %431 = vst [vmem:[#allocation2 + $0x8] sm:$0xff] %v5903_v4  ;;  %v5533_v12 = vld [vmem:[%s7538_s2 + $0xe8] sm:$0xff]  ;;  %s6063_s24 = scalar_lea.vmem %s7536_s0, %s5503_s22  ;;  %vm1677_vm4 = vcmask 1045504   ;;  %vm1651_vm5 = vcmask 258048   ;;  %s409_s22 = scalar_lea.vmem %s7547_s11, %s6034_s12 }
  0x18   : > { %1471 = vmatpush.bf16.msra.mxu3 %v5535_v3  ;;  %432 = vst [vmem:[#allocation2 + $0x10] sm:$0xff] %v5903_v4  ;;  %v5508_v13 = vld [vmem:[%s7538_s2 + $0x20] sm:$0xff]  ;;  %v494_v18 = vld [vmem:[%s6063_s24 + $0x8] sm:$0xff]  ;;  %v5507_v22 = vld [vmem:[%s7538_s2 + $0x18] sm:$0xff]  ;;  %vm2611_vm6 = vcmask 256000   ;;  %s4317_s16 = sshll.u32 %s6034_s12, 3 }
  0x19   : > { %433 = vst [vmem:[#allocation2 + $0x18] sm:$0xff] %v5903_v4  ;;  %1388 = vmatpush.bf16.msra.mxu0 %v5510_v5  ;;  %v5524_v14 = vld [vmem:[%s7538_s2 + $0xa0] sm:$0xff]  ;;  %v524_v20 = vmul.f32 0.003921569, %v494_v18  ;;  %v5523_v23 = vld [vmem:[%s7538_s2 + $0x98] sm:$0xff]  ;;  %v5506_v27 = vld [vmem:[%s7538_s2 + $0x10] sm:$0xff]  ;;  %s406_s30 = scalar_lea.vmem %s7537_s1, %s4317_s16 }
  0x1a   : > { %1444 = vmatpush.bf16.msra.mxu2 %v5526_v6  ;;  %434 = vst [vmem:[#allocation2 + $0x20] sm:$0xff] %v5903_v4  ;;  %v493_v15 = vld [vmem:[%s6063_s24] sm:$0xff]  ;;  %v5515_v25 = vld [vmem:[%s7538_s2 + $0x58] sm:$0xff]  ;;  %v5522_v28 = vld [vmem:[%s7538_s2 + $0x90] sm:$0xff]  ;;  %vm414_vm7 = vcmask 64512   ;;  %vm3464_vm9 = vcmask 253952  }
  0x1b   : > { %1416 = vmatpush.bf16.msra.mxu1 %v5518_v7  ;;  %435 = vst [vmem:[#allocation2 + $0x28] sm:$0xff] %v5903_v4  ;;  %v5516_v16 = vld [vmem:[%s7538_s2 + $0x60] sm:$0xff]  ;;  %v523_v19 = vmul.f32 0.003921569, %v493_v15  ;;  %v6094_v24 = vadd.f32 -0.5, %v524_v20  ;;  %v5531_v26 = vld [vmem:[%s7538_s2 + $0xd8] sm:$0xff] }
  0x1c   : > { %1472 = vmatpush.bf16.msra.mxu3 %v5534_v8  ;;  %436 = vst [vmem:[#allocation2 + $0x30] sm:$0xff] %v5903_v4  ;;  %v5532_v17 = vld [vmem:[%s7538_s2 + $0xe0] sm:$0xff]  ;;  %v5514_v29 = vld [vmem:[%s7538_s2 + $0x50] sm:$0xff]  ;;  %v5505_v31 = vld [vmem:[%s7538_s2 + $0x8] sm:$0xff]  ;;  %vm428_vm10 = vcmask 0   ;;  %s391_s12 = sand.u32 1, %s5893_s18  }
  0x1d   : > { %437 = vst [vmem:[#allocation2 + $0x38] sm:$0xff] %v5903_v4  ;;  %1389 = vmatpush.bf16.msra.mxu0 %v5509_v9  ;;  %v6085_v21 = vadd.f32 -0.5, %v523_v19  ;;  %v5530_v30 = vld [vmem:[%s7538_s2 + $0xd0] sm:$0xff]  ;;  %v5521_v32 = vld [vmem:[%s7538_s2 + $0x88] sm:$0xff]  ;;  %v5504_v35 = vld [vmem:[%s7538_s2] sm:$0xff]  ;;  %v608_v48 = vrot.slane %v6094_v24, 1 }
  0x1e   : > { %1445 = vmatpush.bf16.msra.mxu2 %v5525_v10  ;;  %438 = vst [vmem:[#allocation2 + $0x40] sm:$0xff] %v5903_v4  ;;  %v5513_v33 = vld [vmem:[%s7538_s2 + $0x48] sm:$0xff]  ;;  %v5520_v36 = vld [vmem:[%s7538_s2 + $0x80] sm:$0xff]  ;;  %v5543_v42 = vld [vmem:[%s7538_s2 + $0x138] sm:$0xff]  ;;  %s392_s16 = scalar_lea.vmem [#allocation3], %s391_s12 }
  0x1f   : > { %1417 = vmatpush.bf16.msra.mxu1 %v5517_v11  ;;  %440 = vst [vmem:[#allocation2 + $0x50] sm:$0xff] %v5903_v4  ;;  %v5529_v34 = vld [vmem:[%s7538_s2 + $0xc8] sm:$0xff]  ;;  %v5512_v39 = vld [vmem:[%s7538_s2 + $0x40] sm:$0xff]  ;;  %v495_v43 = vld [vmem:[%s6063_s24 + $0x10] sm:$0xff]  ;;  %v607_v47 = vrot.slane %v6085_v21, 1  ;;  %s4220_s25 = sshll.u32 %s392_s16, 4  ;;  %s4221_s25 = int_to_ptr.vmem [resolvable:$true] %s4220_s25 }
  0x20   : > { %1473 = vmatpush.bf16.msra.mxu3 %v5533_v12  ;;  %441 = vst [vmem:[#allocation2 + $0x58] sm:$0xff] %v5903_v4  ;;  %v5528_v40 = vld [vmem:[%s7538_s2 + $0xc0] sm:$0xff]  ;;  %v525_v44 = vmul.f32 0.003921569, %v495_v43  ;;  %v5542_v45 = vld [vmem:[%s7538_s2 + $0x130] sm:$0xff]  ;;  %v496_v51 = vld [vmem:[%s6063_s24 + $0x18] sm:$0xff] }
  0x21   : > { %442 = vst [vmem:[#allocation2 + $0x60] sm:$0xff] %v5903_v4  ;;  %1390 = vmatpush.bf16.msra.mxu0 %v5508_v13  ;;  %v501_v50 = vld [vmem:[%s6063_s24 + $0x40] sm:$0xff]  ;;  %v5541_v52 = vld [vmem:[%s7538_s2 + $0x128] sm:$0xff]  ;;  %v609_v55 = vsel %vm606_vm1, %v607_v47, %v608_v48  ;;  %v526_v59 = vmul.f32 0.003921569, %v496_v51  ;;  %v503_v12 = vld [vmem:[%s6063_s24 + $0x50] sm:$0xff] }
  0x22   : > { %1446 = vmatpush.bf16.msra.mxu2 %v5524_v14  ;;  %443 = vst [vmem:[#allocation2 + $0x68] sm:$0xff] %v5903_v4  ;;  %v4321_v46 = vadd.f32 -0.5, %v525_v44  ;;  %v502_v53 = vld [vmem:[%s6063_s24 + $0x48] sm:$0xff]  ;;  %v497_v54 = vld [vmem:[%s6063_s24 + $0x20] sm:$0xff]  ;;  %v531_v57 = vmul.f32 0.003921569, %v501_v50 }
  0x23   : > { %1418 = vmatpush.bf16.msra.mxu1 %v5516_v16  ;;  %584 = vst.msk [vmem:[#allocation2] sm:$0xff] %vm583_vm0, %v6085_v21  ;;  %v509_v58 = vld [vmem:[%s6063_s24 + $0x80] sm:$0xff]  ;;  %v532_v60 = vmul.f32 0.003921569, %v502_v53  ;;  %v510_v61 = vld [vmem:[%s6063_s24 + $0x88] sm:$0xff]  ;;  %v4322_v2 = vadd.f32 -0.5, %v526_v59 }
  0x24   : > { %1474 = vmatpush.bf16.msra.mxu3 %v5532_v17  ;;  %585 = vst.msk [vmem:[#allocation2 + $0x48] sm:$0xff] %vm583_vm0, %v6094_v24  ;;  %v610_v49 = vrot.slane %v4321_v46, 1  ;;  %v527_v62 = vmul.f32 0.003921569, %v497_v54  ;;  %v539_v63 = vmul.f32 0.003921569, %v509_v58 }
  0x25   : > { %444 = vst [vmem:[#allocation2 + $0x70] sm:$0xff] %v5903_v4  ;;  %1391 = vmatpush.bf16.msra.mxu0 %v5507_v22  ;;  %v4327_v0 = vadd.f32 -0.5, %v531_v57  ;;  %v540_v1 = vmul.f32 0.003921569, %v510_v61  ;;  %v4328_v3 = vadd.f32 -0.5, %v532_v60  ;;  %v5540_v6 = vld [vmem:[%s7538_s2 + $0x120] sm:$0xff] }
  0x26   : > { %1447 = vmatpush.bf16.msra.mxu2 %v5523_v23  ;;  %445 = vst [vmem:[#allocation2 + $0x78] sm:$0xff] %v5903_v4  ;;  %v611_v56 = vsel %vm606_vm1, %v608_v48, %v610_v49  ;;  %v6216_v5 = vadd.f32 -0.5, %v527_v62  ;;  %v6224_v7 = vadd.f32 -0.5, %v539_v63  ;;  %v612_v9 = vrot.slane %v4322_v2, 1  ;;  %v504_v14 = vld [vmem:[%s6063_s24 + $0x58] sm:$0xff]  ;;  %v498_v16 = vld [vmem:[%s6063_s24 + $0x28] sm:$0xff] }
  0x27   : > { %1419 = vmatpush.bf16.msra.mxu1 %v5515_v25  ;;  %446 = vst [vmem:[#allocation2 + $0x80] sm:$0xff] %v5903_v4  ;;  %v6227_v8 = vadd.f32 -0.5, %v540_v1  ;;  %v533_v18 = vmul.f32 0.003921569, %v503_v12  ;;  %v499_v19 = vld [vmem:[%s6063_s24 + $0x30] sm:$0xff]  ;;  %v5539_v22 = vld [vmem:[%s7538_s2 + $0x118] sm:$0xff] }
  0x28   : > { %1475 = vmatpush.bf16.msra.mxu3 %v5531_v26  ;;  %447 = vst [vmem:[#allocation2 + $0x88] sm:$0xff] %v5903_v4  ;;  %v614_v11 = vrot.slane %v6216_v5, 1  ;;  %v613_v17 = vsel %vm606_vm1, %v610_v49, %v612_v9  ;;  %v534_v21 = vmul.f32 0.003921569, %v504_v14  ;;  %v5559_v23 = vld [vmem:[%s7538_s2 + $0x1b8] sm:$0xff]  ;;  %v505_v49 = vld [vmem:[%s6063_s24 + $0x60] sm:$0xff] }
  0x29   : > { %448 = vst [vmem:[#allocation2 + $0x90] sm:$0xff] %v5903_v4  ;;  %1392 = vmatpush.bf16.msra.mxu0 %v5506_v27  ;;  %v528_v25 = vmul.f32 0.003921569, %v498_v16  ;;  %v512_v27 = vld [vmem:[%s6063_s24 + $0x98] sm:$0xff]  ;;  %v5558_v50 = vld [vmem:[%s7538_s2 + $0x1b0] sm:$0xff]  ;;  %v5557_v57 = vld [vmem:[%s7538_s2 + $0x1a8] sm:$0xff] }
  0x2a   : > { %1448 = vmatpush.bf16.msra.mxu2 %v5522_v28  ;;  %449 = vst [vmem:[#allocation2 + $0x98] sm:$0xff] %v5903_v4  ;;  %v708_v37 = vld [vmem:[#allocation2] sm:$0xff]  ;;  %v615_v20 = vsel %vm606_vm1, %v612_v9, %v614_v11  ;;  %v529_v28 = vmul.f32 0.003921569, %v499_v19  ;;  %v5551_v44 = vld [vmem:[%s7538_s2 + $0x178] sm:$0xff]  ;;  %v5550_v53 = vld [vmem:[%s7538_s2 + $0x170] sm:$0xff] }
  0x2b   : > { %1420 = vmatpush.bf16.msra.mxu1 %v5514_v29  ;;  %450 = vst [vmem:[#allocation2 + $0xa0] sm:$0xff] %v5903_v4  ;;  %v717_v38 = vld [vmem:[#allocation2 + $0x48] sm:$0xff]  ;;  %v5538_v54 = vld [vmem:[%s7538_s2 + $0x110] sm:$0xff]  ;;  %v535_v60 = vmul.f32 0.003921569, %v505_v49  ;;  %v513_v63 = vld [vmem:[%s6063_s24 + $0xa0] sm:$0xff] }
  0x2c   : > { %1476 = vmatpush.bf16.msra.mxu3 %v5530_v30  ;;  %451 = vst [vmem:[#allocation2 + $0xa8] sm:$0xff] %v5903_v4  ;;  %v771_v41 = vpack.c.bf16 %v717_v38, %v708_v37  ;;  %v4324_v37 = vadd.f32 -0.5, %v528_v25  ;;  %v5549_v1 = vld [vmem:[%s7538_s2 + $0x168] sm:$0xff]  ;;  %v507_v16 = vld [vmem:[%s6063_s24 + $0x70] sm:$0xff]  ;;  %v5564_v19 = vld [vmem:[%s7538_s2 + $0x1e0] sm:$0xff] }
  0x2d   : > { %452 = vst [vmem:[#allocation2 + $0xb0] sm:$0xff] %v5903_v4  ;;  %1393 = vmatpush.bf16.msra.mxu0 %v5505_v31  ;;  %v4329_v31 = vadd.f32 -0.5, %v533_v18  ;;  %v5537_v9 = vld [vmem:[%s7538_s2 + $0x108] sm:$0xff]  ;;  %v5548_v18 = vld [vmem:[%s7538_s2 + $0x160] sm:$0xff] }
  0x2e   : > { %1449 = vmatpush.bf16.msra.mxu2 %v5521_v32  ;;  %453 = vst [vmem:[#allocation2 + $0xb8] sm:$0xff] %v5903_v4  ;;  %v4330_v32 = vadd.f32 -0.5, %v534_v21  ;;  %v616_v48 = vrot.slane %v4324_v37, 1  ;;  %v5555_v21 = vld [vmem:[%s7538_s2 + $0x198] sm:$0xff] }
  0x2f   : > { %1421 = vmatpush.bf16.msra.mxu1 %v5513_v33  ;;  %454 = vst [vmem:[#allocation2 + $0xc0] sm:$0xff] %v5903_v4 }
  0x30   : > { %1477 = vmatpush.bf16.msra.mxu3 %v5529_v34  ;;  %455 = vst [vmem:[#allocation2 + $0xc8] sm:$0xff] %v5903_v4  ;;  %v617_v59 = vsel %vm606_vm1, %v614_v11, %v616_v48  ;;  %v543_v11 = vmul.f32 0.003921569, %v513_v63 }
  0x31   : > { %456 = vst [vmem:[#allocation2 + $0xd0] sm:$0xff] %v5903_v4  ;;  %1394 = vmatpush.bf16.msra.mxu0 %v5504_v35 }
  0x32   : > { %1450 = vmatpush.bf16.msra.mxu2 %v5520_v36  ;;  %457 = vst [vmem:[#allocation2 + $0xd8] sm:$0xff] %v5903_v4  ;;  %v542_v36 = vmul.f32 0.003921569, %v512_v27  ;;  %v6341_v25 = vadd.f32 -0.5, %v543_v11  ;;  %v5574_v11 = vld [vmem:[%s7538_s2 + $0x230] sm:$0xff] }
  0x33   : > { %1422 = vmatpush.bf16.msra.mxu1 %v5512_v39  ;;  %458 = vst [vmem:[#allocation2 + $0xe0] sm:$0xff] %v5903_v4  ;;  %v6261_v39 = vadd.f32 -0.5, %v529_v28 }
  0x34   : > { %1478 = vmatpush.bf16.msra.mxu3 %v5528_v40  ;;  %459 = vst [vmem:[#allocation2 + $0xe8] sm:$0xff] %v5903_v4  ;;  %1395 = vmatmul.bf16.vlgmr.msra.gmra.mxu0 %v771_v41  ;;  %v6274_v47 = vadd.f32 -0.5, %v542_v36  ;;  %v5536_v36 = vld [vmem:[%s7538_s2 + $0x100] sm:$0xff] }
  0x35   : > { %460 = vst [vmem:[#allocation2 + $0xf0] sm:$0xff] %v5903_v4  ;;  %1499 = vmatpush.bf16.msrb.mxu0 %v5543_v42 }
  0x36   : > { %461 = vst [vmem:[#allocation2 + $0xf8] sm:$0xff] %v5903_v4  ;;  %1555 = vmatpush.bf16.msrb.mxu2 %v5559_v23 }
  0x37   : > { %462 = vst [vmem:[#allocation2 + $0x100] sm:$0xff] %v5903_v4  ;;  %1527 = vmatpush.bf16.msrb.mxu1 %v5551_v44 }
  0x38   : > { %463 = vst [vmem:[#allocation2 + $0x108] sm:$0xff] %v5903_v4 }
  0x39   : > { %464 = vst [vmem:[#allocation2 + $0x110] sm:$0xff] %v5903_v4  ;;  %1500 = vmatpush.bf16.msrb.mxu0 %v5542_v45  ;;  %v5567_v45 = vld [vmem:[%s7538_s2 + $0x1f8] sm:$0xff] }
  0x3a   : > { %465 = vst [vmem:[#allocation2 + $0x118] sm:$0xff] %v5903_v4  ;;  %1583 = vmatpush.bf16.msrb.mxu3 %v5567_v45  ;;  %1556 = vmatpush.bf16.msrb.mxu2 %v5558_v50  ;;  %v516_v45 = vld [vmem:[%s6063_s24 + $0xc0] sm:$0xff] }
  0x3b   : > { %466 = vst [vmem:[#allocation2 + $0x120] sm:$0xff] %v5903_v4  ;;  %1528 = vmatpush.bf16.msrb.mxu1 %v5550_v53  ;;  %v546_v49 = vmul.f32 0.003921569, %v516_v45 }
  0x3c   : > { %467 = vst [vmem:[#allocation2 + $0x128] sm:$0xff] %v5903_v4 }
  0x3d   : > { %468 = vst [vmem:[#allocation2 + $0x130] sm:$0xff] %v5903_v4  ;;  %1501 = vmatpush.bf16.msrb.mxu0 %v5541_v52  ;;  %v6282_v52 = vrot.slane %v6261_v39, 1 }
  0x3e   : > { %469 = vst [vmem:[#allocation2 + $0x138] sm:$0xff] %v5903_v4  ;;  %1557 = vmatpush.bf16.msrb.mxu2 %v5557_v57  ;;  %v5575_v57 = vld [vmem:[%s7538_s2 + $0x238] sm:$0xff] }
  0x3f   : > { %470 = vst [vmem:[#allocation2 + $0x140] sm:$0xff] %v5903_v4  ;;  %v619_v61 = vsel %vm606_vm1, %v616_v48, %v6282_v52  ;;  %1529 = vmatpush.bf16.msrb.mxu1 %v5549_v1  ;;  %v517_v48 = vld [vmem:[%s6063_s24 + $0xc8] sm:$0xff]  ;;  %v5544_v1 = vld [vmem:[%s7538_s2 + $0x140] sm:$0xff] }
  0x40   : > { %471 = vst [vmem:[#allocation2 + $0x148] sm:$0xff] %v5903_v4  ;;  %v547_v50 = vmul.f32 0.003921569, %v517_v48 }
  0x41   : > { %472 = vst [vmem:[#allocation2 + $0x150] sm:$0xff] %v5903_v4  ;;  %1502 = vmatpush.bf16.msrb.mxu0 %v5540_v6 }
  0x42   : > { %473 = vst [vmem:[#allocation2 + $0x158] sm:$0xff] %v5903_v4 }
  0x43   : > { %474 = vst [vmem:[#allocation2 + $0x160] sm:$0xff] %v5903_v4  ;;  %1530 = vmatpush.bf16.msrb.mxu1 %v5548_v18 }
  0x44   : > { %475 = vst [vmem:[#allocation2 + $0x168] sm:$0xff] %v5903_v4 }
  0x45   : > { %476 = vst [vmem:[#allocation2 + $0x170] sm:$0xff] %v5903_v4  ;;  %1503 = vmatpush.bf16.msrb.mxu0 %v5539_v22  ;;  %v515_v22 = vld [vmem:[%s6063_s24 + $0xb0] sm:$0xff] }
  0x46   : > { %477 = vst [vmem:[#allocation2 + $0x178] sm:$0xff] %v5903_v4 }
  0x47   : > { %478 = vst [vmem:[#allocation2 + $0x180] sm:$0xff] %v5903_v4 }
  0x48   : > { %479 = vst [vmem:[#allocation2 + $0x188] sm:$0xff] %v5903_v4 }
  0x49   : > { %480 = vst [vmem:[#allocation2 + $0x190] sm:$0xff] %v5903_v4  ;;  %1504 = vmatpush.bf16.msrb.mxu0 %v5538_v54  ;;  %v5561_v54 = vld [vmem:[%s7538_s2 + $0x1c8] sm:$0xff] }
  0x4a   : > { %481 = vst [vmem:[#allocation2 + $0x198] sm:$0xff] %v5903_v4 }
  0x4b   : > { %482 = vst [vmem:[#allocation2 + $0x1a0] sm:$0xff] %v5903_v4 }
  0x4c   : > { %483 = vst [vmem:[#allocation2 + $0x1a8] sm:$0xff] %v5903_v4 }
  0x4d   : > { %484 = vst [vmem:[#allocation2 + $0x1b0] sm:$0xff] %v5903_v4  ;;  %1505 = vmatpush.bf16.msrb.mxu0 %v5537_v9  ;;  %v518_v9 = vld [vmem:[%s6063_s24 + $0xd0] sm:$0xff] }
  0x4e   : > { %485 = vst [vmem:[#allocation2 + $0x1b8] sm:$0xff] %v5903_v4 }
  0x4f   : > { %486 = vst [vmem:[#allocation2 + $0x1c0] sm:$0xff] %v5903_v4 }
  0x50   : > { %487 = vst [vmem:[#allocation2 + $0x1c8] sm:$0xff] %v5903_v4 }
  0x51   : > { %488 = vst [vmem:[#allocation2 + $0x1d0] sm:$0xff] %v5903_v4  ;;  %1506 = vmatpush.bf16.msrb.mxu0 %v5536_v36 }
  0x52   : > { %489 = vst [vmem:[#allocation2 + $0x1d8] sm:$0xff] %v5903_v4 }
  0x53   : > { %490 = vst [vmem:[#allocation2 + $0x1e0] sm:$0xff] %v5903_v4 }
  0x54   : > { %491 = vst [vmem:[#allocation2 + $0x1e8] sm:$0xff] %v5903_v4 }
  0x55   : > { %492 = vst [vmem:[#allocation2 + $0x1f0] sm:$0xff] %v5903_v4  ;;  %1611 = vmatpush.bf16.msra.mxu0 %v5575_v57 }
  0x56   : > { %627 = vst.msk [vmem:[#allocation2 + $0x10] sm:$0xff] %vm583_vm0, %v609_v55  ;;  %v506_v55 = vld [vmem:[%s6063_s24 + $0x68] sm:$0xff] }
  0x57   : > { %628 = vst.msk [vmem:[#allocation2 + $0x58] sm:$0xff] %vm583_vm0, %v611_v56  ;;  %v536_v62 = vmul.f32 0.003921569, %v506_v55  ;;  %v4342_v55 = vadd.f32 -0.5, %v546_v49 }
  0x58   : > { %701 = vst.msk [vmem:[#allocation2 + $0x40] sm:$0xff] %vm583_vm0, %v611_v56  ;;  %v5566_v56 = vld [vmem:[%s7538_s2 + $0x1f0] sm:$0xff] }
  0x59   : > { %586 = vst.msk [vmem:[#allocation2 + $0x90] sm:$0xff] %vm583_vm0, %v4321_v46  ;;  %1584 = vmatpush.bf16.msrb.mxu3 %v5566_v56  ;;  %v4332_v14 = vadd.f32 -0.5, %v536_v62  ;;  %v4343_v56 = vadd.f32 -0.5, %v547_v50  ;;  %1612 = vmatpush.bf16.msra.mxu0 %v5574_v11 }
  0x5a   : > { %682 = vst.msk [vmem:[#allocation2 + $0x30] sm:$0xff] %vm583_vm0, %v6094_v24  ;;  %v511_v24 = vld [vmem:[%s6063_s24 + $0x90] sm:$0xff] }
  0x5b   : > { %683 = vst.msk [vmem:[#allocation2 + $0x78] sm:$0xff] %vm583_vm0, %v4321_v46  ;;  %v541_v33 = vmul.f32 0.003921569, %v511_v24 }
  0x5c   : > { %592 = vst.msk [vmem:[#allocation2 + $0x8] sm:$0xff] %vm583_vm0, %v4327_v0  ;;  %v514_v0 = vld [vmem:[%s6063_s24 + $0xa8] sm:$0xff] }
  0x5d   : > { %v710_v10 = vld [vmem:[#allocation2 + $0x10] sm:$0xff]  ;;  %593 = vst.msk [vmem:[#allocation2 + $0x50] sm:$0xff] %vm583_vm0, %v4328_v3  ;;  %v6265_v43 = vadd.f32 -0.5, %v541_v33 }
  0x5e   : > { %v719_v13 = vld [vmem:[#allocation2 + $0x58] sm:$0xff]  ;;  %689 = vst.msk [vmem:[#allocation2 + $0x38] sm:$0xff] %vm583_vm0, %v4328_v3  ;;  %v5565_v3 = vld [vmem:[%s7538_s2 + $0x1e8] sm:$0xff] }
  0x5f   : > { %v773_v15 = vpack.c.bf16 %v719_v13, %v710_v10  ;;  %634 = vst.msk [vmem:[#allocation2 + $0x18] sm:$0xff] %vm583_vm0, %v6224_v7  ;;  %v4331_v10 = vadd.f32 -0.5, %v535_v60  ;;  %1585 = vmatpush.bf16.msrb.mxu3 %v5565_v3  ;;  %v658_v44 = vrot.slane %v6265_v43, 1 }
  0x60   : > { %635 = vst.msk [vmem:[#allocation2 + $0x60] sm:$0xff] %vm583_vm0, %v6227_v8  ;;  %v726_v35 = vld [vmem:[#allocation2 + $0x90] sm:$0xff] }
  0x61   : > { %1451 = vmatmul.bf16.vlgmr.msra.gmra.mxu2 %v773_v15  ;;  %587 = vst.msk [vmem:[#allocation2 + $0xd8] sm:$0xff] %vm583_vm0, %v4322_v2  ;;  %v544_v15 = vmul.f32 0.003921569, %v514_v0 }
  0x62   : > { %684 = vst.msk [vmem:[#allocation2 + $0xc0] sm:$0xff] %vm583_vm0, %v4322_v2 }
  0x63   : > { %v709_v26 = vld [vmem:[#allocation2 + $0x8] sm:$0xff]  ;;  %629 = vst.msk [vmem:[#allocation2 + $0xa0] sm:$0xff] %vm583_vm0, %v613_v17  ;;  %v6344_v28 = vadd.f32 -0.5, %v544_v15  ;;  %1586 = vmatpush.bf16.msrb.mxu3 %v5564_v19  ;;  %v662_v15 = vrot.slane %v6341_v25, 1 }
  0x64   : > { %v718_v29 = vld [vmem:[#allocation2 + $0x50] sm:$0xff]  ;;  %630 = vst.msk [vmem:[#allocation2 + $0xe8] sm:$0xff] %vm583_vm0, %v615_v20 }
  0x65   : > { %v772_v30 = vpack.c.bf16 %v718_v29, %v709_v26  ;;  %702 = vst.msk [vmem:[#allocation2 + $0x88] sm:$0xff] %vm583_vm0, %v613_v17  ;;  %v537_v26 = vmul.f32 0.003921569, %v507_v16  ;;  %v545_v29 = vmul.f32 0.003921569, %v515_v22 }
  0x66   : > { %v711_v34 = vld [vmem:[#allocation2 + $0x18] sm:$0xff]  ;;  %588 = vst.msk [vmem:[#allocation2 + $0x120] sm:$0xff] %vm583_vm0, %v6216_v5 }
  0x67   : > { %1423 = vmatmul.bf16.vlgmr.msra.gmra.mxu1 %v772_v30  ;;  %v720_v38 = vld [vmem:[#allocation2 + $0x60] sm:$0xff]  ;;  %685 = vst.msk [vmem:[#allocation2 + $0x108] sm:$0xff] %vm583_vm0, %v6216_v5  ;;  %v5547_v30 = vld [vmem:[%s7538_s2 + $0x158] sm:$0xff] }
  0x68   : > { %v774_v40 = vpack.c.bf16 %v720_v38, %v711_v34  ;;  %v735_v41 = vld [vmem:[#allocation2 + $0xd8] sm:$0xff]  ;;  %703 = vst.msk [vmem:[#allocation2 + $0xd0] sm:$0xff] %vm583_vm0, %v615_v20  ;;  %v5556_v5 = vld [vmem:[%s7538_s2 + $0x1a0] sm:$0xff]  ;;  %v4333_v34 = vadd.f32 -0.5, %v537_v26  ;;  %1531 = vmatpush.bf16.msrb.mxu1 %v5547_v30  ;;  %v5546_v38 = vld [vmem:[%s7538_s2 + $0x150] sm:$0xff] }
  0x69   : > { %v780_v42 = vpack.c.bf16 %v735_v41, %v726_v35  ;;  %594 = vst.msk [vmem:[#allocation2 + $0x98] sm:$0xff] %vm583_vm0, %v4329_v31  ;;  %1558 = vmatpush.bf16.msrb.mxu2 %v5556_v5  ;;  %v5554_v35 = vld [vmem:[%s7538_s2 + $0x190] sm:$0xff]  ;;  %v655_v41 = vrot.slane %v6224_v7, 1  ;;  %v521_v30 = vld [vmem:[%s6063_s24 + $0xe8] sm:$0xff]  ;;  %v732_v50 = vld [vmem:[#allocation2 + $0xc0] sm:$0xff] }
  0x6a   : > { %1479 = vmatmul.bf16.vlgmr.msra.gmra.mxu3 %v774_v40  ;;  %v728_v46 = vld [vmem:[#allocation2 + $0xa0] sm:$0xff]  ;;  %595 = vst.msk [vmem:[#allocation2 + $0xe0] sm:$0xff] %vm583_vm0, %v4330_v32  ;;  %v5562_v40 = vld [vmem:[%s7538_s2 + $0x1d0] sm:$0xff] }
  0x6b   : > { %1400 = vmatmul.bf16.gmra.mxu0 %v780_v42  ;;  %v737_v51 = vld [vmem:[#allocation2 + $0xe8] sm:$0xff]  ;;  %690 = vst.msk [vmem:[#allocation2 + $0x80] sm:$0xff] %vm583_vm0, %v4329_v31  ;;  %v5563_v31 = vld [vmem:[%s7538_s2 + $0x1d8] sm:$0xff]  ;;  %v656_v42 = vrot.slane %v6227_v8, 1 }
  0x6c   : > { %691 = vst.msk [vmem:[#allocation2 + $0xc8] sm:$0xff] %vm583_vm0, %v4330_v32  ;;  %v782_v58 = vpack.c.bf16 %v737_v51, %v728_v46  ;;  %1587 = vmatpush.bf16.msrb.mxu3 %v5563_v31  ;;  %v5553_v46 = vld [vmem:[%s7538_s2 + $0x188] sm:$0xff]  ;;  %1532 = vmatpush.bf16.msrb.mxu1 %v5546_v38  ;;  %v723_v31 = vld [vmem:[#allocation2 + $0x78] sm:$0xff] }
  0x6d   : > { %636 = vst.msk [vmem:[#allocation2 + $0xa8] sm:$0xff] %vm583_vm0, %v6265_v43  ;;  %v744_v13 = vld [vmem:[#allocation2 + $0x120] sm:$0xff]  ;;  %1559 = vmatpush.bf16.msrb.mxu2 %v5555_v21  ;;  %v5545_v8 = vld [vmem:[%s7538_s2 + $0x148] sm:$0xff]  ;;  %v659_v60 = vsel %vm606_vm1, %v656_v42, %v658_v44 }
  0x6e   : > { %637 = vst.msk [vmem:[#allocation2 + $0xf0] sm:$0xff] %vm583_vm0, %v6274_v47  ;;  %v5573_v21 = vld [vmem:[%s7538_s2 + $0x228] sm:$0xff] }
  0x6f   : > { %589 = vst.msk [vmem:[#allocation2 + $0x168] sm:$0xff] %vm583_vm0, %v4324_v37  ;;  %1613 = vmatpush.bf16.msra.mxu0 %v5573_v21 }
  0x70   : > { %v727_v2 = vld [vmem:[#allocation2 + $0x98] sm:$0xff]  ;;  %686 = vst.msk [vmem:[#allocation2 + $0x150] sm:$0xff] %vm583_vm0, %v4324_v37  ;;  %v6366_v37 = vadd.f32 -0.5, %v545_v29  ;;  %1588 = vmatpush.bf16.msrb.mxu3 %v5562_v40  ;;  %1533 = vmatpush.bf16.msrb.mxu1 %v5545_v8  ;;  %v520_v29 = vld [vmem:[%s6063_s24 + $0xe0] sm:$0xff] }
  0x71   : > { %1456 = vmatmul.bf16.gmra.mxu2 %v782_v58  ;;  %v736_v6 = vld [vmem:[#allocation2 + $0xe0] sm:$0xff]  ;;  %631 = vst.msk [vmem:[#allocation2 + $0x130] sm:$0xff] %vm583_vm0, %v617_v59  ;;  %v657_v58 = vsel %vm606_vm1, %v655_v41, %v656_v42 }
  0x72   : > { %632 = vst.msk [vmem:[#allocation2 + $0x178] sm:$0xff] %vm583_vm0, %v619_v61  ;;  %v781_v12 = vpack.c.bf16 %v736_v6, %v727_v2  ;;  %1560 = vmatpush.bf16.msrb.mxu2 %v5554_v35  ;;  %v666_v7 = vrot.slane %v6366_v37, 1  ;;  %v5560_v2 = vld [vmem:[%s7538_s2 + $0x1c0] sm:$0xff]  ;;  %v664_v35 = vrot.slane %v6344_v28, 1 }
  0x73   : > { %687 = vst.msk [vmem:[#allocation2 + $0x198] sm:$0xff] %vm583_vm0, %v6261_v39  ;;  %v724_v48 = vld [vmem:[#allocation2 + $0x80] sm:$0xff] }
  0x74   : > { %v729_v17 = vld [vmem:[#allocation2 + $0xa8] sm:$0xff]  ;;  %704 = vst.msk [vmem:[#allocation2 + $0x118] sm:$0xff] %vm583_vm0, %v617_v59  ;;  %v5552_v59 = vld [vmem:[%s7538_s2 + $0x180] sm:$0xff]  ;;  %1589 = vmatpush.bf16.msrb.mxu3 %v5561_v54  ;;  %1534 = vmatpush.bf16.msrb.mxu1 %v5544_v1  ;;  %v665_v41 = vsel %vm606_vm1, %v662_v15, %v664_v35  ;;  %v667_v42 = vsel %vm606_vm1, %v664_v35, %v666_v7 }
  0x75   : > { %v738_v20 = vld [vmem:[#allocation2 + $0xf0] sm:$0xff]  ;;  %705 = vst.msk [vmem:[#allocation2 + $0x160] sm:$0xff] %vm583_vm0, %v619_v61  ;;  %v741_v54 = vld [vmem:[#allocation2 + $0x108] sm:$0xff]  ;;  %v6472_v35 = vld [vmem:[%s7539_s3] ss:$0 sm:$0xff] }
  0x76   : > { %v783_v23 = vpack.c.bf16 %v738_v20, %v729_v17  ;;  %v753_v24 = vld [vmem:[#allocation2 + $0x168] sm:$0xff]  ;;  %596 = vst.msk [vmem:[#allocation2 + $0x128] sm:$0xff] %vm583_vm0, %v4331_v10  ;;  %1561 = vmatpush.bf16.msrb.mxu2 %v5553_v46  ;;  %v715_v46 = vld [vmem:[#allocation2 + $0x38] sm:$0xff] }
  0x77   : > { %1428 = vmatmul.bf16.gmra.mxu1 %v781_v12  ;;  %v789_v27 = vpack.c.bf16 %v753_v24, %v744_v13  ;;  %597 = vst.msk [vmem:[#allocation2 + $0x170] sm:$0xff] %vm583_vm0, %v4332_v14  ;;  %v548_v12 = vmul.f32 0.003921569, %v518_v9 }
  0x78   : > { %692 = vst.msk [vmem:[#allocation2 + $0x110] sm:$0xff] %vm583_vm0, %v4331_v10  ;;  %v746_v32 = vld [vmem:[#allocation2 + $0x130] sm:$0xff]  ;;  %1590 = vmatpush.bf16.msrb.mxu3 %v5560_v2  ;;  %v519_v10 = vld [vmem:[%s6063_s24 + $0xd8] sm:$0xff] }
  0x79   : > { %693 = vst.msk [vmem:[#allocation2 + $0x158] sm:$0xff] %vm583_vm0, %v4332_v14  ;;  %v755_v33 = vld [vmem:[#allocation2 + $0x178] sm:$0xff]  ;;  %v549_v13 = vmul.f32 0.003921569, %v519_v10  ;;  %v660_v14 = vrot.slane %v6274_v47, 1  ;;  %v4344_v16 = vadd.f32 -0.5, %v548_v12 }
  0x7a   : > { %1484 = vmatmul.bf16.gmra.mxu3 %v783_v23  ;;  %638 = vst.msk [vmem:[#allocation2 + $0x138] sm:$0xff] %vm583_vm0, %v6341_v25  ;;  %1562 = vmatpush.bf16.msrb.mxu2 %v5552_v59 }
  0x7b   : > { %1405 = vmatmul.bf16.gmra.mxu0 %v789_v27  ;;  %639 = vst.msk [vmem:[#allocation2 + $0x180] sm:$0xff] %vm583_vm0, %v6344_v28  ;;  %v4345_v17 = vadd.f32 -0.5, %v549_v13  ;;  %v661_v19 = vsel %vm606_vm1, %v658_v44, %v660_v14  ;;  %v663_v20 = vsel %vm606_vm1, %v660_v14, %v662_v15  ;;  %v714_v27 = vld [vmem:[#allocation2 + $0x30] sm:$0xff]  ;;  %v5571_v28 = vld [vmem:[%s7538_s2 + $0x218] sm:$0xff] }
  0x7c   : > { %591 = vst.msk [vmem:[#allocation2 + $0x1b0] sm:$0x7f] %vm590_vm2, %v6261_v39  ;;  %v791_v39 = vpack.c.bf16 %v755_v33, %v746_v32  ;;  %v5572_v32 = vld [vmem:[%s7538_s2 + $0x220] sm:$0xff]  ;;  %v550_v33 = vmul.f32 0.003921569, %v520_v29  ;;  %v777_v40 = vpack.c.bf16 %v723_v31, %v714_v27  ;;  %v750_v14 = vld [vmem:[#allocation2 + $0x150] sm:$0xff] }
  0x7d   : > { %633 = vst.msk [vmem:[#allocation2 + $0x1c0] sm:$0x7f] %vm590_vm2, %v6282_v52  ;;  %v745_v51 = vld [vmem:[#allocation2 + $0x128] sm:$0xff]  ;;  %1614 = vmatpush.bf16.msra.mxu0 %v5572_v32  ;;  %v759_v15 = vld [vmem:[#allocation2 + $0x198] sm:$0xff]  ;;  %v716_v31 = vld [vmem:[#allocation2 + $0x40] sm:$0xff] }
  0x7e   : > { %598 = vst.msk [vmem:[#allocation2 + $0x1b8] sm:$0x7f] %vm590_vm2, %v4333_v34  ;;  %v754_v53 = vld [vmem:[#allocation2 + $0x170] sm:$0xff]  ;;  %v4346_v36 = vadd.f32 -0.5, %v550_v33  ;;  %v725_v32 = vld [vmem:[#allocation2 + $0x88] sm:$0xff] }
  0x7f   : > { %694 = vst.msk [vmem:[#allocation2 + $0x1a0] sm:$0xff] %vm583_vm0, %v4333_v34  ;;  %v790_v61 = vpack.c.bf16 %v754_v53, %v745_v51  ;;  %v551_v34 = vmul.f32 0.003921569, %v521_v30  ;;  %v522_v51 = vld [vmem:[%s6063_s24 + $0xf0] sm:$0xff]  ;;  %v500_v53 = vld [vmem:[%s6063_s24 + $0x38] sm:$0xff] }
  0x80   : > { %640 = vst.msk [vmem:[#allocation2 + $0x1c8] sm:$0x7f] %vm590_vm2, %v6366_v37  ;;  %v530_v57 = vmul.f32 0.003921569, %v500_v53  ;;  %v742_v9 = vld [vmem:[#allocation2 + $0x110] sm:$0xff] }
  0x81   : > { %1461 = vmatmul.bf16.gmra.mxu2 %v791_v39  ;;  %681 = vst.msk [vmem:[#allocation2 + $0x1d8] sm:$0x7f] %vm590_vm2, %v666_v7  ;;  %v747_v62 = vld [vmem:[#allocation2 + $0x138] sm:$0xff]  ;;  %v4347_v38 = vadd.f32 -0.5, %v551_v34  ;;  %1615 = vmatpush.bf16.msra.mxu0 %v5571_v28  ;;  %v778_v7 = vpack.c.bf16 %v724_v48, %v715_v46  ;;  %v779_v34 = vpack.c.bf16 %v725_v32, %v716_v31 }
  0x82   : > { %641 = vst.msk [vmem:[#allocation2 + $0x20] sm:$0xff] %vm583_vm0, %v4342_v55  ;;  %v756_v63 = vld [vmem:[#allocation2 + $0x180] sm:$0xff]  ;;  %v5570_v55 = vld [vmem:[%s7538_s2 + $0x210] sm:$0xff] }
  0x83   : > { %642 = vst.msk [vmem:[#allocation2 + $0x68] sm:$0xff] %vm583_vm0, %v4343_v56  ;;  %v762_v0 = vld [vmem:[#allocation2 + $0x1b0] sm:$0x7f]  ;;  %v792_v3 = vpack.c.bf16 %v756_v63, %v747_v62  ;;  %v552_v56 = vmul.f32 0.003921569, %v522_v51  ;;  %v786_v62 = vpack.c.bf16 %v741_v54, %v732_v50  ;;  %v752_v54 = vld [vmem:[#allocation2 + $0x160] sm:$0xff] }
  0x84   : > { %675 = vst.msk [vmem:[#allocation2 + $0x28] sm:$0xff] %vm583_vm0, %v657_v58  ;;  %v798_v5 = vpack.c.bf16 %v762_v0, %v762_v0  ;;  %v764_v6 = vld [vmem:[#allocation2 + $0x1c0] sm:$0x7f]  ;;  %v508_v58 = vld [vmem:[%s6063_s24 + $0x78] sm:$0xff] }
  0x85   : > { %676 = vst.msk [vmem:[#allocation2 + $0x70] sm:$0xff] %vm583_vm0, %v659_v60  ;;  %v800_v18 = vpack.c.bf16 %v764_v6, %v764_v6  ;;  %v763_v47 = vld [vmem:[#allocation2 + $0x1b8] sm:$0x7f]  ;;  %1616 = vmatpush.bf16.msra.mxu0 %v5570_v55  ;;  %v4348_v59 = vadd.f32 -0.5, %v552_v56  ;;  %v4326_v60 = vadd.f32 -0.5, %v530_v57  ;;  %v733_v6 = vld [vmem:[#allocation2 + $0xc8] sm:$0xff] }
  0x86   : > { %643 = vst.msk [vmem:[#allocation2 + $0xb0] sm:$0xff] %vm583_vm0, %v4344_v16  ;;  %v799_v22 = vpack.c.bf16 %v763_v47, %v763_v47  ;;  %v787_v12 = vpack.c.bf16 %v742_v9, %v733_v6  ;;  %v5568_v16 = vld [vmem:[%s7538_s2 + $0x200] sm:$0xff]  ;;  %v751_v47 = vld [vmem:[#allocation2 + $0x158] sm:$0xff] }
  0x87   : > { %1433 = vmatmul.bf16.gmra.mxu1 %v790_v61  ;;  %644 = vst.msk [vmem:[#allocation2 + $0xf8] sm:$0xff] %vm583_vm0, %v4345_v17  ;;  %v765_v23 = vld [vmem:[#allocation2 + $0x1c8] sm:$0x7f]  ;;  %v538_v61 = vmul.f32 0.003921569, %v508_v58  ;;  %v697_v63 = vrot.slane %v4326_v60, 1  ;;  %v795_v17 = vpack.c.bf16 %v759_v15, %v750_v14 }
  0x88   : > { %677 = vst.msk [vmem:[#allocation2 + $0xb8] sm:$0xff] %vm583_vm0, %v661_v19  ;;  %v801_v25 = vpack.c.bf16 %v765_v23, %v765_v23  ;;  %v760_v21 = vld [vmem:[#allocation2 + $0x1a0] sm:$0xff] }
  0x89   : > { %678 = vst.msk [vmem:[#allocation2 + $0x100] sm:$0xff] %vm583_vm0, %v663_v20  ;;  %v712_v43 = vld [vmem:[#allocation2 + $0x20] sm:$0xff]  ;;  %v4334_v0 = vadd.f32 -0.5, %v538_v61  ;;  %v796_v23 = vpack.c.bf16 %v760_v21, %v751_v47 }
  0x8a   : > { %1489 = vmatmul.bf16.gmra.mxu3 %v792_v3  ;;  %v721_v24 = vld [vmem:[#allocation2 + $0x68] sm:$0xff]  ;;  %645 = vst.msk [vmem:[#allocation2 + $0x140] sm:$0xff] %vm583_vm0, %v4346_v36  ;;  %v698_v36 = vsel %vm606_vm1, %v6282_v52, %v697_v63 }
  0x8b   : > { %1410 = vmatmul.bf16.gmra.mxu0 %v798_v5  ;;  %v775_v26 = vpack.c.bf16 %v721_v24, %v712_v43  ;;  %646 = vst.msk [vmem:[#allocation2 + $0x188] sm:$0xff] %vm583_vm0, %v4347_v38  ;;  %v713_v44 = vld [vmem:[#allocation2 + $0x28] sm:$0xff] }
  0x8c   : > { %v722_v39 = vld [vmem:[#allocation2 + $0x70] sm:$0xff]  ;;  %679 = vst.msk [vmem:[#allocation2 + $0x148] sm:$0xff] %vm583_vm0, %v665_v41  ;;  %v5569_v3 = vld [vmem:[%s7538_s2 + $0x208] sm:$0xff] }
  0x8d   : > { %680 = vst.msk [vmem:[#allocation2 + $0x190] sm:$0xff] %vm583_vm0, %v667_v42  ;;  %v776_v45 = vpack.c.bf16 %v722_v39, %v713_v44  ;;  %v730_v37 = vld [vmem:[#allocation2 + $0xb0] sm:$0xff]  ;;  %1617 = vmatpush.bf16.msra.mxu0 %v5569_v3  ;;  %v743_v39 = vld [vmem:[#allocation2 + $0x118] sm:$0xff] }
  0x8e   : > { %v739_v49 = vld [vmem:[#allocation2 + $0xf8] sm:$0xff]  ;;  %647 = vst.msk [vmem:[#allocation2 + $0x1d0] sm:$0x7f] %vm590_vm2, %v4348_v59  ;;  %v734_v44 = vld [vmem:[#allocation2 + $0xd0] sm:$0xff] }
  0x8f   : > { %v784_v8 = vpack.c.bf16 %v739_v49, %v730_v37  ;;  %688 = vst.msk [vmem:[#allocation2 + $0x1e0] sm:$0x7f] %vm590_vm2, %v4326_v60  ;;  %v731_v1 = vld [vmem:[#allocation2 + $0xb8] sm:$0xff]  ;;  %v788_v46 = vpack.c.bf16 %v743_v39, %v734_v44  ;;  %v5590_v44 = vld [vmem:[%s7540_s4 + $0x70] sm:$0xff] }
  0x90   : > { %v740_v2 = vld [vmem:[#allocation2 + $0x100] sm:$0xff]  ;;  %707 = vst.msk [vmem:[#allocation2 + $0x1f0] sm:$0x7f] %vm590_vm2, %v697_v63  ;;  %v5582_v39 = vld [vmem:[%s7540_s4 + $0x30] sm:$0xff] }
  0x91   : > { %1466 = vmatmul.bf16.gmra.mxu2 %v800_v18  ;;  %695 = vst.msk [vmem:[#allocation2 + $0x1e8] sm:$0x7f] %vm590_vm2, %v4334_v0  ;;  %v785_v5 = vpack.c.bf16 %v740_v2, %v731_v1  ;;  %v748_v10 = vld [vmem:[#allocation2 + $0x140] sm:$0xff]  ;;  %1618 = vmatpush.bf16.msra.mxu0 %v5568_v16 }
  0x92   : > { %v757_v11 = vld [vmem:[#allocation2 + $0x188] sm:$0xff]  ;;  %706 = vst.msk [vmem:[#allocation2 + $0x1a8] sm:$0xff] %vm583_vm0, %v698_v36 }
  0x93   : > { %v793_v13 = vpack.c.bf16 %v757_v11, %v748_v10  ;;  %v749_v18 = vld [vmem:[#allocation2 + $0x148] sm:$0xff] }
  0x94   : > { %v758_v19 = vld [vmem:[#allocation2 + $0x190] sm:$0xff] }
  0x95   : > { %v794_v20 = vpack.c.bf16 %v758_v19, %v749_v18 }
  0x96   : > { %v768_v24 = vld [vmem:[#allocation2 + $0x1e0] sm:$0x7f] }
  0x97   : > { %1438 = vmatmul.bf16.gmra.mxu1 %v799_v22  ;;  %v766_v22 = vld [vmem:[#allocation2 + $0x1d0] sm:$0x7f] }
  0x98   : > { %v802_v43 = vpack.c.bf16 %v766_v22, %v766_v22  ;;  %v769_v29 = vld [vmem:[#allocation2 + $0x1e8] sm:$0x7f]  ;;  %v770_v6 = vld [vmem:[#allocation2 + $0x1f0] sm:$0x7f] }
  0x99   : > { %v805_v33 = vpack.c.bf16 %v769_v29, %v769_v29  ;;  %v761_v55 = vld [vmem:[#allocation2 + $0x1a8] sm:$0xff] }
  0x9a   : > { %1494 = vmatmul.bf16.gmra.mxu3 %v801_v25  ;;  %v804_v25 = vpack.c.bf16 %v768_v24, %v768_v24  ;;  %v797_v59 = vpack.c.bf16 %v761_v55, %v752_v54 }
  0x9b   : > { %1507 = vmatmul.bf16.vlgmr.msrb.gmra.mxu0 %v775_v26  ;;  %v767_v26 = vld [vmem:[#allocation2 + $0x1d8] sm:$0x7f] }
  0x9c   : > { %v803_v27 = vpack.c.bf16 %v767_v26, %v767_v26 }
  0xa1   : > { %1563 = vmatmul.bf16.vlgmr.msrb.gmra.mxu2 %v777_v40 }
  0xa7   : > { %1535 = vmatmul.bf16.vlgmr.msrb.gmra.mxu1 %v776_v45 }
  0xaa   : > { %1591 = vmatmul.bf16.vlgmr.msrb.gmra.mxu3 %v778_v7 }
  0xab   : > { %1512 = vmatmul.bf16.gmra.mxu0 %v784_v8 }
  0xb1   : > { %1568 = vmatmul.bf16.gmra.mxu2 %v786_v62  ;;  %v1396_v30 = vpop.f32.mrf.mxu0 }
  0xb2   : > { %v1397_v40 = vadd.f32 %v6472_v35, %v1396_v30 }
  0xb7   : > { %1540 = vmatmul.bf16.gmra.mxu1 %v785_v5 }
  0xb9   : > { %v6476_v38 = vpop.f32.mrf.mxu0 }
  0xba   : > { %1596 = vmatmul.bf16.gmra.mxu3 %v787_v12  ;;  %v806_v12 = vpack.c.bf16 %v770_v6, %v770_v6 }
  0xbb   : > { %1517 = vmatmul.bf16.gmra.mxu0 %v793_v13 }
  0xc1   : > { %1573 = vmatmul.bf16.gmra.mxu2 %v795_v17 }
  0xc7   : > { %1545 = vmatmul.bf16.gmra.mxu1 %v794_v20 }
  0xca   : > { %1601 = vmatmul.bf16.gmra.mxu3 %v796_v23 }
  0xcb   : > { %1522 = vmatmul.bf16.gmra.mxu0 %v802_v43 }
  0xd1   : > { %1578 = vmatmul.bf16.gmra.mxu2 %v804_v25 }
  0xd7   : > { %1550 = vmatmul.bf16.gmra.mxu1 %v803_v27 }
  0xda   : > { %1606 = vmatmul.bf16.gmra.mxu3 %v805_v33  ;;  %v5591_v33 = vld [vmem:[%s7540_s4 + $0x78] sm:$0xff] }
  0xdb   : > { %1619 = vmatmul.bf16.vlgmr.msra.gmra.mxu0 %v779_v34  ;;  %v5583_v34 = vld [vmem:[%s7540_s4 + $0x38] sm:$0xff]  ;;  %2420 = vmatpush.bf16.msra.mxu2 %v5591_v33 }
  0xdc   : > { %2397 = vmatpush.bf16.msra.mxu1 %v5583_v34 }
  0xdf   : > { %2421 = vmatpush.bf16.msra.mxu2 %v5590_v44 }
  0xe0   : > { %2398 = vmatpush.bf16.msra.mxu1 %v5582_v39 }
  0xe4   : > { %v1424_v41 = vpop.f32.mrf.mxu1  ;;  %v1452_v42 = vpop.f32.mrf.mxu2 }
  0xe5   : > { %v1425_v28 = vadd.f32 %v1424_v41, %v1397_v40 }
  0xe7   : > { %v1453_v45 = vadd.f32 %v1452_v42, %v1425_v28 }
  0xe8   : > { %v1401_v48 = vpop.f32.mrf.mxu0 }
  0xe9   : > { %v1402_v50 = vadd.f32 %v6472_v35, %v1401_v48 }
  0xeb   : > { %1624 = vmatmul.bf16.gmra.mxu0 %v788_v46 }
  0xec   : > { %v6480_v37 = vpop.f32.mrf.mxu1  ;;  %v6482_v49 = vpop.f32.mrf.mxu2 }
  0xed   : > { %v1480_v52 = vpop.f32.mrf.mxu3 }
  0xee   : > { %v6484_v7 = vadd.f32 %v1480_v52, %v1453_v45  ;;  %v5589_v52 = vld [vmem:[%s7540_s4 + $0x68] sm:$0xff] }
  0xef   : > { %2422 = vmatpush.bf16.msra.mxu2 %v5589_v52  ;;  %v5576_v52 = vld [vmem:[%s7540_s4] sm:$0xff] }
  0xf0   : > { %v6486_v8 = vpop.f32.mrf.mxu0 }
  0xf4   : > { %v1429_v51 = vpop.f32.mrf.mxu1  ;;  %v1457_v53 = vpop.f32.mrf.mxu2 }
  0xf5   : > { %v6489_v56 = vpop.f32.mrf.mxu3  ;;  %v1430_v57 = vadd.f32 %v1429_v51, %v1402_v50  ;;  %v5581_v50 = vld [vmem:[%s7540_s4 + $0x28] sm:$0xff] }
  0xf6   : > { %2399 = vmatpush.bf16.msra.mxu1 %v5581_v50  ;;  %v5628_v50 = vld [vmem:[%s7540_s4 + $0x1a0] sm:$0xff] }
  0xf7   : > { %v1458_v58 = vadd.f32 %v1457_v53, %v1430_v57  ;;  %v5588_v57 = vld [vmem:[%s7540_s4 + $0x60] sm:$0xff] }
  0xf8   : > { %v1406_v60 = vpop.f32.mrf.mxu0  ;;  %2423 = vmatpush.bf16.msra.mxu2 %v5588_v57  ;;  %v5594_v57 = vld [vmem:[%s7540_s4 + $0x90] sm:$0xff] }
  0xf9   : > { %v1407_v2 = vadd.f32 %v6472_v35, %v1406_v60 }
  0xfb   : > { %1629 = vmatmul.bf16.gmra.mxu0 %v797_v59  ;;  %v5599_v59 = vld [vmem:[%s7540_s4 + $0xb8] sm:$0xff] }
  0xfc   : > { %v6491_v61 = vpop.f32.mrf.mxu1  ;;  %v6493_v62 = vpop.f32.mrf.mxu2  ;;  %2443 = vmatpush.bf16.msra.mxu3 %v5599_v59 }
  0xfd   : > { %v1485_v63 = vpop.f32.mrf.mxu3 }
  0xfe   : > { %v6495_v0 = vadd.f32 %v1485_v63, %v1458_v58  ;;  %v5580_v58 = vld [vmem:[%s7540_s4 + $0x20] sm:$0xff]  ;;  %v5587_v63 = vld [vmem:[%s7540_s4 + $0x58] sm:$0xff] }
  0xff   : > { %2400 = vmatpush.bf16.msra.mxu1 %v5580_v58  ;;  %2424 = vmatpush.bf16.msra.mxu2 %v5587_v63  ;;  %v1404_v58 = vadd.f32 %v6472_v35, %v6486_v8 }
 0x100   : > { %v6497_v1 = vpop.f32.mrf.mxu0 }
 0x104   : > { %v1434_v3 = vpop.f32.mrf.mxu1  ;;  %v1462_v5 = vpop.f32.mrf.mxu2 }
 0x105   : > { %v6500_v9 = vpop.f32.mrf.mxu3  ;;  %v1435_v10 = vadd.f32 %v1434_v3, %v1407_v2  ;;  %v5579_v2 = vld [vmem:[%s7540_s4 + $0x18] sm:$0xff]  ;;  %v5598_v3 = vld [vmem:[%s7540_s4 + $0xb0] sm:$0xff] }
 0x106   : > { %2401 = vmatpush.bf16.msra.mxu1 %v5579_v2  ;;  %2444 = vmatpush.bf16.msra.mxu3 %v5598_v3 }
 0x107   : > { %v1463_v11 = vadd.f32 %v1462_v5, %v1435_v10 }
 0x108   : > { %v1411_v13 = vpop.f32.mrf.mxu0 }
 0x109   : > { %v1412_v19 = vadd.f32 %v6472_v35, %v1411_v13  ;;  %v5631_v13 = vld [vmem:[%s7540_s4 + $0x1b8] sm:$0xff] }
 0x10a   : > { %2535 = vmatpush.bf16.msrb.mxu0 %v5631_v13  ;;  %v5627_v13 = vld [vmem:[%s7540_s4 + $0x198] sm:$0xff] }
 0x10b   : > { %1634 = vmatmul.bf16.gmra.mxu0 %v806_v12  ;;  %v1399_v12 = vadd.f32 %v6472_v35, %v6476_v38  ;;  %v5630_v38 = vld [vmem:[%s7540_s4 + $0x1b0] sm:$0xff] }
 0x10c   : > { %v6502_v14 = vpop.f32.mrf.mxu1  ;;  %v6504_v15 = vpop.f32.mrf.mxu2 }
 0x10d   : > { %v1490_v16 = vpop.f32.mrf.mxu3 }
 0x10e   : > { %v6506_v17 = vadd.f32 %v1490_v16, %v1463_v11  ;;  %v5586_v16 = vld [vmem:[%s7540_s4 + $0x50] sm:$0xff]  ;;  %2536 = vmatpush.bf16.msrb.mxu0 %v5630_v38 }
 0x10f   : > { %2425 = vmatpush.bf16.msra.mxu2 %v5586_v16 }
 0x110   : > { %v1413_v18 = vpop.f32.mrf.mxu0 }
 0x111   : > { %v5597_v18 = vld [vmem:[%s7540_s4 + $0xa8] sm:$0xff] }
 0x112   : > { %2445 = vmatpush.bf16.msra.mxu3 %v5597_v18 }
 0x114   : > { %v1439_v20 = vpop.f32.mrf.mxu1  ;;  %v1467_v47 = vpop.f32.mrf.mxu2 }
 0x115   : > { %v6509_v21 = vpop.f32.mrf.mxu3  ;;  %v1440_v22 = vadd.f32 %v1439_v20, %v1412_v19  ;;  %v5578_v19 = vld [vmem:[%s7540_s4 + $0x10] sm:$0xff] }
 0x116   : > { %2402 = vmatpush.bf16.msra.mxu1 %v5578_v19  ;;  %v5593_v19 = vld [vmem:[%s7540_s4 + $0x88] sm:$0xff] }
 0x117   : > { %v1468_v23 = vadd.f32 %v1467_v47, %v1440_v22  ;;  %v5596_v22 = vld [vmem:[%s7540_s4 + $0xa0] sm:$0xff] }
 0x118   : > { %v6511_v43 = vpop.f32.mrf.mxu0  ;;  %2446 = vmatpush.bf16.msra.mxu3 %v5596_v22 }
 0x11c   : > { %v1441_v24 = vpop.f32.mrf.mxu1  ;;  %v1469_v25 = vpop.f32.mrf.mxu2 }
 0x11d   : > { %v1495_v26 = vpop.f32.mrf.mxu3  ;;  %v1509_v24 = vadd.f32 %v6511_v43, %v6484_v7  ;;  %v5629_v7 = vld [vmem:[%s7540_s4 + $0x1a8] sm:$0xff] }
 0x11e   : > { %v6513_v27 = vadd.f32 %v1495_v26, %v1468_v23  ;;  %v1427_v23 = vadd.f32 %v6480_v37, %v1399_v12  ;;  %v5577_v37 = vld [vmem:[%s7540_s4 + $0x8] sm:$0xff]  ;;  %2537 = vmatpush.bf16.msrb.mxu0 %v5629_v7 }
 0x11f   : > { %2403 = vmatpush.bf16.msra.mxu1 %v5577_v37 }
 0x120   : > { %v6515_v29 = vpop.f32.mrf.mxu0  ;;  %v1455_v26 = vadd.f32 %v6482_v49, %v1427_v23  ;;  %v5585_v49 = vld [vmem:[%s7540_s4 + $0x48] sm:$0xff] }
 0x121   : > { %2426 = vmatpush.bf16.msra.mxu2 %v5585_v49 }
 0x122   : > { %v1483_v34 = vadd.f32 %v6489_v56, %v1455_v26  ;;  %v5595_v56 = vld [vmem:[%s7540_s4 + $0x98] sm:$0xff]  ;;  %2538 = vmatpush.bf16.msrb.mxu0 %v5628_v50 }
 0x123   : > { %2447 = vmatpush.bf16.msra.mxu3 %v5595_v56  ;;  %2404 = vmatpush.bf16.msra.mxu1 %v5576_v52  ;;  %v1409_v56 = vadd.f32 %v6472_v35, %v6497_v1  ;;  %v5615_v52 = vld [vmem:[%s7540_s4 + $0x138] sm:$0xff] }
 0x124   : > { %v6517_v30 = vpop.f32.mrf.mxu1  ;;  %v6519_v31 = vpop.f32.mrf.mxu2 }
 0x125   : > { %v1497_v32 = vpop.f32.mrf.mxu3  ;;  %v1537_v33 = vadd.f32 %v6517_v30, %v1509_v24  ;;  %v1511_v30 = vadd.f32 %v6515_v29, %v1483_v34 }
 0x126   : > { %2539 = vmatpush.bf16.msrb.mxu0 %v5627_v13 }
 0x127   : > { %v1565_v44 = vadd.f32 %v6519_v31, %v1537_v33  ;;  %2448 = vmatpush.bf16.msra.mxu3 %v5594_v57 }
 0x128   : > { %v6527_v36 = vpop.f32.mrf.mxu0 }
 0x129   : > { %v1514_v8 = vadd.f32 %v6527_v36, %v6495_v0  ;;  %v5592_v36 = vld [vmem:[%s7540_s4 + $0x80] sm:$0xff] }
 0x12b   : > { %2449 = vmatpush.bf16.msra.mxu3 %v5593_v19 }
 0x12c   : > { %v6529_v40 = vpop.f32.mrf.mxu1  ;;  %v6531_v41 = vpop.f32.mrf.mxu2 }
 0x12d   : > { %v6533_v42 = vpop.f32.mrf.mxu3  ;;  %v1539_v63 = vadd.f32 %v6529_v40, %v1511_v30 }
 0x12e   : > { %v1593_v29 = vadd.f32 %v6533_v42, %v1565_v44  ;;  %v1432_v42 = vadd.f32 %v6491_v61, %v1404_v58  ;;  %v5626_v61 = vld [vmem:[%s7540_s4 + $0x190] sm:$0xff] }
 0x12f   : > { %v1567_v3 = vadd.f32 %v6531_v41, %v1539_v63  ;;  %v5584_v41 = vld [vmem:[%s7540_s4 + $0x40] sm:$0xff]  ;;  %2540 = vmatpush.bf16.msrb.mxu0 %v5626_v61  ;;  %2450 = vmatpush.bf16.msra.mxu3 %v5592_v36 }
 0x130   : > { %v6541_v28 = vpop.f32.mrf.mxu0  ;;  %v1460_v38 = vadd.f32 %v6493_v62, %v1432_v42  ;;  %2427 = vmatpush.bf16.msra.mxu2 %v5584_v41  ;;  %v5625_v62 = vld [vmem:[%s7540_s4 + $0x188] sm:$0xff] }
 0x132   : > { %v1488_v26 = vadd.f32 %v6500_v9, %v1460_v38  ;;  %v5623_v38 = vld [vmem:[%s7540_s4 + $0x178] sm:$0xff] }
 0x133   : > { %2541 = vmatpush.bf16.msrb.mxu0 %v5625_v62  ;;  %2512 = vmatpush.bf16.msrb.mxu3 %v5623_v38  ;;  %v5639_v38 = vld [vmem:[%s7540_s4 + $0x1f8] sm:$0xff] }
 0x134   : > { %v6543_v45 = vpop.f32.mrf.mxu1  ;;  %v6545_v46 = vpop.f32.mrf.mxu2  ;;  %2489 = vmatpush.bf16.msrb.mxu2 %v5615_v52  ;;  %v5602_v52 = vld [vmem:[%s7540_s4 + $0xd0] sm:$0xff] }
 0x135   : > { %v6547_v48 = vpop.f32.mrf.mxu3  ;;  %v1542_v23 = vadd.f32 %v6543_v45, %v1514_v8 }
 0x136   : > { %v1595_v0 = vadd.f32 %v6547_v48, %v1567_v3  ;;  %v1516_v48 = vadd.f32 %v6541_v28, %v1488_v26  ;;  %v5624_v28 = vld [vmem:[%s7540_s4 + $0x180] sm:$0xff] }
 0x137   : > { %2542 = vmatpush.bf16.msrb.mxu0 %v5624_v28 }
 0x138   : > { %v6555_v51 = vpop.f32.mrf.mxu0 }
 0x139   : > { %v1519_v63 = vadd.f32 %v6555_v51, %v6506_v17  ;;  %v5606_v17 = vld [vmem:[%s7540_s4 + $0xf0] sm:$0xff] }
 0x13c   : > { %v6557_v53 = vpop.f32.mrf.mxu1  ;;  %v6559_v54 = vpop.f32.mrf.mxu2 }
 0x13d   : > { %v6561_v55 = vpop.f32.mrf.mxu3  ;;  %v1544_v50 = vadd.f32 %v6557_v53, %v1516_v48  ;;  %v5622_v48 = vld [vmem:[%s7540_s4 + $0x170] sm:$0xff] }
 0x13e   : > { %2513 = vmatpush.bf16.msrb.mxu3 %v5622_v48 }
 0x13f   : > { %v1572_v35 = vadd.f32 %v6559_v54, %v1544_v50 }
 0x140   : > { %v6572_v60 = vpop.f32.mrf.mxu0 }
 0x144   : > { %v6583_v5 = vpop.f32.mrf.mxu1  ;;  %v6585_v6 = vpop.f32.mrf.mxu2 }
 0x145   : > { %v6587_v10 = vpop.f32.mrf.mxu3 }
 0x146   : > { %v1600_v13 = vadd.f32 %v6587_v10, %v1572_v35  ;;  %v1547_v10 = vadd.f32 %v6583_v5, %v1519_v63  ;;  %v5605_v5 = vld [vmem:[%s7540_s4 + $0xe8] sm:$0xff] }
 0x147   : > { %v5601_v63 = vld [vmem:[%s7540_s4 + $0xc8] sm:$0xff] }
 0x148   : > { %v6589_v11 = vpop.f32.mrf.mxu0  ;;  %v1575_v8 = vadd.f32 %v6585_v6, %v1547_v10  ;;  %v5604_v6 = vld [vmem:[%s7540_s4 + $0xe0] sm:$0xff] }
 0x14c   : > { %v6608_v20 = vpop.f32.mrf.mxu1  ;;  %v6610_v47 = vpop.f32.mrf.mxu2 }
 0x14d   : > { %v6618_v25 = vpop.f32.mrf.mxu3 }
 0x150   : > { %v1525_v32 = vpop.f32.mrf.mxu0 }
 0x151   : > { %v1570_v32 = vadd.f32 %v6545_v46, %v1542_v23 }
 0x153   : > { %v1598_v9 = vadd.f32 %v6561_v55, %v1570_v32  ;;  %v5607_v55 = vld [vmem:[%s7540_s4 + $0xf8] sm:$0xff] }
 0x154   : > { %v6633_v43 = vpop.f32.mrf.mxu1  ;;  %v6635_v39 = vpop.f32.mrf.mxu2  ;;  %2466 = vmatpush.bf16.msrb.mxu1 %v5607_v55 }
 0x155   : > { %v6641_v31 = vpop.f32.mrf.mxu3 }
 0x158   : > { %v1620_v59 = vpop.f32.mrf.mxu0  ;;  %2467 = vmatpush.bf16.msrb.mxu1 %v5606_v17 }
 0x159   : > { %v1621_v2 = vadd.f32 %v1620_v59, %v1593_v29  ;;  %v1437_v29 = vadd.f32 %v6502_v14, %v1409_v56 }
 0x15b   : > { %v1639_v12 = vmax.f32 %v1621_v2, 0.0 }
 0x15c   : > { %v1553_v16 = vpop.f32.mrf.mxu1  ;;  %v1581_v18 = vpop.f32.mrf.mxu2  ;;  %2468 = vmatpush.bf16.msrb.mxu1 %v5605_v5 }
 0x15d   : > { %v6663_v40 = vpop.f32.mrf.mxu3  ;;  %1647 = vst.msk [vmem:[#allocation2] sm:$0xff] %vm1646_vm3, %v1639_v12  ;;  %v1658_v34 = vrot.slane %v1639_v12, 1  ;;  %v1678_v44 = vrot.slane %v1639_v12, 2  ;;  %v1465_v12 = vadd.f32 %v6504_v15, %v1437_v29  ;;  %v5614_v15 = vld [vmem:[%s7540_s4 + $0x130] sm:$0xff]  ;;  %v5613_v18 = vld [vmem:[%s7540_s4 + $0x128] sm:$0xff]  ;;  %v5620_v29 = vld [vmem:[%s7540_s4 + $0x160] sm:$0xff] }
 0x15e   : > { %2490 = vmatpush.bf16.msrb.mxu2 %v5614_v15  ;;  %v5618_v15 = vld [vmem:[%s7540_s4 + $0x150] sm:$0xff] }
 0x15f   : > { %v1493_v16 = vadd.f32 %v6509_v21, %v1465_v12 }
 0x160   : > { %v1622_v22 = vpop.f32.mrf.mxu0  ;;  %2469 = vmatpush.bf16.msrb.mxu1 %v5604_v6  ;;  %v5617_v6 = vld [vmem:[%s7540_s4 + $0x148] sm:$0xff] }
 0x161   : > { %v1623_v24 = vadd.f32 %v1622_v22, %v1595_v0  ;;  %v1521_v19 = vadd.f32 %v6572_v60, %v1493_v16  ;;  %v1603_v0 = vadd.f32 %v6618_v25, %v1575_v8 }
 0x162   : > { %2491 = vmatpush.bf16.msrb.mxu2 %v5613_v18 }
 0x163   : > { %v1640_v33 = vmax.f32 %v1623_v24, 0.0  ;;  %v5612_v24 = vld [vmem:[%s7540_s4 + $0x120] sm:$0xff]  ;;  %v1549_v26 = vadd.f32 %v6608_v20, %v1521_v19 }
 0x164   : > { %v1745_v58 = vld [vmem:[#allocation2] sm:$0xff] }
 0x165   : > { %1648 = vst.msk [vmem:[#allocation2 + $0x48] sm:$0xff] %vm1646_vm3, %v1640_v33  ;;  %v1659_v45 = vrot.slane %v1640_v33, 1  ;;  %v1679_v37 = vrot.slane %v1640_v33, 2  ;;  %v1609_v7 = vpop.f32.mrf.mxu3  ;;  %v1577_v20 = vadd.f32 %v6610_v47, %v1549_v26  ;;  %v5621_v47 = vld [vmem:[%s7540_s4 + $0x168] sm:$0xff]  ;;  %v5616_v26 = vld [vmem:[%s7540_s4 + $0x140] sm:$0xff] }
 0x166   : > { %1697 = vst.msk [vmem:[#allocation2 + $0x18] sm:$0xff] %vm1646_vm3, %v1640_v33  ;;  %2492 = vmatpush.bf16.msrb.mxu2 %v5612_v24  ;;  %v5611_v7 = vld [vmem:[%s7540_s4 + $0x118] sm:$0xff]  ;;  %2514 = vmatpush.bf16.msrb.mxu3 %v5621_v47  ;;  %v5638_v24 = vld [vmem:[%s7540_s4 + $0x1f0] sm:$0xff]  ;;  %v5644_v47 = vld [vmem:[%s7540_s4 + $0x220] sm:$0xff] }
 0x167   : > { %v1660_v46 = vsel %vm606_vm1, %v1658_v34, %v1659_v45  ;;  %v1680_v49 = vsel %vm1677_vm4, %v1678_v44, %v1679_v37  ;;  %v1605_v55 = vadd.f32 %v6641_v31, %v1577_v20 }
 0x168   : > { %1672 = vst.msk [vmem:[#allocation2 + $0x8] sm:$0xff] %vm1646_vm3, %v1660_v46  ;;  %v1625_v30 = vpop.f32.mrf.mxu0 }
 0x169   : > { %1692 = vst.msk [vmem:[#allocation2 + $0x10] sm:$0xff] %vm1646_vm3, %v1680_v49  ;;  %v1626_v57 = vadd.f32 %v1625_v30, %v1598_v9  ;;  %v1524_v49 = vadd.f32 %v6589_v11, %v6513_v27 }
 0x16a   : > { %2493 = vmatpush.bf16.msrb.mxu2 %v5611_v7  ;;  %2515 = vmatpush.bf16.msrb.mxu3 %v5620_v29 }
 0x16b   : > { %v1641_v1 = vmax.f32 %v1626_v57, 0.0 }
 0x16c   : > { %v1754_v59 = vld [vmem:[#allocation2 + $0x48] sm:$0xff] }
 0x16d   : > { %1649 = vst.msk [vmem:[#allocation2 + $0x90] sm:$0xff] %vm1646_vm3, %v1641_v1  ;;  %v1661_v2 = vrot.slane %v1641_v1, 1  ;;  %v1681_v53 = vrot.slane %v1641_v1, 2  ;;  %v1790_v3 = vpack.c.bf16 %v1754_v59, %v1745_v58  ;;  %v1552_v58 = vadd.f32 %v6633_v43, %v1524_v49  ;;  %v5609_v43 = vld [vmem:[%s7540_s4 + $0x108] sm:$0xff]  ;;  %v1748_v49 = vld [vmem:[#allocation2 + $0x18] sm:$0xff] }
 0x16e   : > { %1698 = vst.msk [vmem:[#allocation2 + $0x60] sm:$0xff] %vm1646_vm3, %v1641_v1 }
 0x16f   : > { %v1662_v54 = vsel %vm606_vm1, %v1659_v45, %v1661_v2  ;;  %v1682_v14 = vsel %vm1677_vm4, %v1679_v37, %v1681_v53  ;;  %1721 = vst.msk [vmem:[#allocation2 + $0x30] sm:$0xff] %vm1646_vm3, %v1641_v1  ;;  %2405 = vmatmul.bf16.vlgmr.msra.gmra.mxu1 %v1790_v3  ;;  %v1746_v22 = vld [vmem:[#allocation2 + $0x8] sm:$0xff]  ;;  %v5603_v45 = vld [vmem:[%s7540_s4 + $0xd8] sm:$0xff]  ;;  %v5610_v1 = vld [vmem:[%s7540_s4 + $0x110] sm:$0xff] }
 0x170   : > { %1673 = vst.msk [vmem:[#allocation2 + $0x50] sm:$0xff] %vm1646_vm3, %v1662_v54  ;;  %v1627_v51 = vpop.f32.mrf.mxu0  ;;  %v1747_v25 = vld [vmem:[#allocation2 + $0x10] sm:$0xff]  ;;  %2470 = vmatpush.bf16.msrb.mxu1 %v5603_v45  ;;  %2494 = vmatpush.bf16.msrb.mxu2 %v5610_v1  ;;  %v5619_v3 = vld [vmem:[%s7540_s4 + $0x158] sm:$0xff] }
 0x171   : > { %1693 = vst.msk [vmem:[#allocation2 + $0x58] sm:$0xff] %vm1646_vm3, %v1682_v14  ;;  %v1628_v42 = vadd.f32 %v1627_v51, %v1600_v13  ;;  %2516 = vmatpush.bf16.msrb.mxu3 %v5619_v3  ;;  %v5640_v3 = vld [vmem:[%s7540_s4 + $0x200] sm:$0xff] }
 0x172   : > { %1707 = vst.msk [vmem:[#allocation2 + $0x20] sm:$0xff] %vm1646_vm3, %v1662_v54 }
 0x173   : > { %1716 = vst.msk [vmem:[#allocation2 + $0x28] sm:$0xff] %vm1646_vm3, %v1682_v14  ;;  %v1642_v41 = vmax.f32 %v1628_v42, 0.0 }
 0x174   : > { %v1763_v9 = vld [vmem:[#allocation2 + $0x90] sm:$0xff]  ;;  %2471 = vmatpush.bf16.msrb.mxu1 %v5602_v52  ;;  %2495 = vmatpush.bf16.msrb.mxu2 %v5609_v43 }
 0x175   : > { %1650 = vst.msk [vmem:[#allocation2 + $0xd8] sm:$0xff] %vm1646_vm3, %v1642_v41  ;;  %v1663_v21 = vrot.slane %v1642_v41, 1  ;;  %v1683_v61 = vrot.slane %v1642_v41, 2  ;;  %2517 = vmatpush.bf16.msrb.mxu3 %v5618_v15  ;;  %v5634_v52 = vld [vmem:[%s7540_s4 + $0x1d0] sm:$0xff] }
 0x176   : > { %1699 = vst.msk [vmem:[#allocation2 + $0xa8] sm:$0xff] %vm1646_vm3, %v1642_v41  ;;  %v1751_v50 = vld [vmem:[#allocation2 + $0x30] sm:$0xff] }
 0x177   : > { %v1664_v60 = vsel %vm606_vm1, %v1661_v2, %v1663_v21  ;;  %v1684_v36 = vsel %vm1677_vm4, %v1681_v53, %v1683_v61  ;;  %1722 = vst.msk [vmem:[#allocation2 + $0x78] sm:$0xff] %vm1646_vm3, %v1642_v41  ;;  %v1755_v23 = vld [vmem:[#allocation2 + $0x50] sm:$0xff]  ;;  %v1580_v2 = vadd.f32 %v6635_v39, %v1552_v58  ;;  %v5600_v39 = vld [vmem:[%s7540_s4 + $0xc0] sm:$0xff] }
 0x178   : > { %1674 = vst.msk [vmem:[#allocation2 + $0x98] sm:$0xff] %vm1646_vm3, %v1664_v60  ;;  %v1630_v32 = vpop.f32.mrf.mxu0  ;;  %v1791_v33 = vpack.c.bf16 %v1755_v23, %v1746_v22  ;;  %v1756_v62 = vld [vmem:[#allocation2 + $0x58] sm:$0xff]  ;;  %2472 = vmatpush.bf16.msrb.mxu1 %v5601_v63  ;;  %v5646_v23 = vld [vmem:[%s7540_s4 + $0x230] sm:$0xff]  ;;  %v5632_v63 = vld [vmem:[%s7540_s4 + $0x1c0] sm:$0xff] }
 0x179   : > { %1694 = vst.msk [vmem:[#allocation2 + $0xa0] sm:$0xff] %vm1646_vm3, %v1684_v36  ;;  %v1631_v34 = vadd.f32 %v1630_v32, %v1603_v0  ;;  %v1792_v44 = vpack.c.bf16 %v1756_v62, %v1747_v25  ;;  %v1608_v54 = vadd.f32 %v6663_v40, %v1580_v2  ;;  %v5608_v40 = vld [vmem:[%s7540_s4 + $0x100] sm:$0xff]  ;;  %2518 = vmatpush.bf16.msrb.mxu3 %v5617_v6  ;;  %v5645_v25 = vld [vmem:[%s7540_s4 + $0x228] sm:$0xff] }
 0x17a   : > { %1708 = vst.msk [vmem:[#allocation2 + $0x68] sm:$0xff] %vm1646_vm3, %v1664_v60  ;;  %2428 = vmatmul.bf16.vlgmr.msra.gmra.mxu2 %v1791_v33  ;;  %v5637_v62 = vld [vmem:[%s7540_s4 + $0x1e8] sm:$0xff]  ;;  %v1749_v1 = vld [vmem:[#allocation2 + $0x20] sm:$0xff] }
 0x17b   : > { %1717 = vst.msk [vmem:[#allocation2 + $0x70] sm:$0xff] %vm1646_vm3, %v1684_v36  ;;  %v1643_v37 = vmax.f32 %v1631_v34, 0.0  ;;  %2451 = vmatmul.bf16.vlgmr.msra.gmra.mxu3 %v1792_v44  ;;  %2496 = vmatpush.bf16.msrb.mxu2 %v5608_v40  ;;  %v1750_v29 = vld [vmem:[#allocation2 + $0x28] sm:$0xff] }
 0x17c   : > { %1731 = vst.msk [vmem:[#allocation2 + $0x38] sm:$0xff] %vm1646_vm3, %v1664_v60  ;;  %v1772_v46 = vld [vmem:[#allocation2 + $0xd8] sm:$0xff]  ;;  %2473 = vmatpush.bf16.msrb.mxu1 %v5600_v39  ;;  %v5641_v2 = vld [vmem:[%s7540_s4 + $0x208] sm:$0xff] }
 0x17d   : > { %1740 = vst.msk [vmem:[#allocation2 + $0x40] sm:$0xff] %vm1646_vm3, %v1684_v36  ;;  %v1665_v28 = vrot.slane %v1643_v37, 1  ;;  %v1685_v56 = vrot.slane %v1643_v37, 2  ;;  %v1799_v30 = vpack.c.bf16 %v1772_v46, %v1763_v9  ;;  %2519 = vmatpush.bf16.msrb.mxu3 %v5616_v26  ;;  %v1757_v9 = vld [vmem:[#allocation2 + $0x60] sm:$0xff] }
 0x17e   : > { %1652 = vst.msk [vmem:[#allocation2 + $0x120] sm:$0x1f] %vm1651_vm5, %v1643_v37  ;;  %v1760_v57 = vld [vmem:[#allocation2 + $0x78] sm:$0xff]  ;;  %v5636_v46 = vld [vmem:[%s7540_s4 + $0x1e0] sm:$0xff] }
 0x17f   : > { %v1666_v35 = vsel %vm606_vm1, %v1663_v21, %v1665_v28  ;;  %1676 = vst.msk [vmem:[#allocation2 + $0x128] sm:$0x1f] %vm1651_vm5, %v1665_v28  ;;  %v1686_v27 = vsel %vm1677_vm4, %v1683_v61, %v1685_v56  ;;  %2410 = vmatmul.bf16.gmra.mxu1 %v1799_v30  ;;  %v1796_v11 = vpack.c.bf16 %v1760_v57, %v1751_v50  ;;  %v1764_v17 = vld [vmem:[#allocation2 + $0x98] sm:$0xff] }
 0x180   : > { %1675 = vst.msk [vmem:[#allocation2 + $0xe0] sm:$0xff] %vm1646_vm3, %v1666_v35  ;;  %v1632_v31 = vpop.f32.mrf.mxu0  ;;  %v1765_v16 = vld [vmem:[#allocation2 + $0xa0] sm:$0xff]  ;;  %v5647_v61 = vld [vmem:[%s7540_s4 + $0x238] sm:$0xff]  ;;  %2558 = vmatpush.bf16.msra.mxu1 %v5639_v38 }
 0x181   : > { %1695 = vst.msk [vmem:[#allocation2 + $0xe8] sm:$0xff] %vm1646_vm3, %v1686_v27  ;;  %2543 = vmatmul.bf16.vlgmr.msrb.gmra.mxu0 %v1796_v11  ;;  %v1633_v59 = vadd.f32 %v1632_v31, %v1605_v55  ;;  %2581 = vmatpush.bf16.msra.mxu2 %v5647_v61  ;;  %v5643_v30 = vld [vmem:[%s7540_s4 + $0x218] sm:$0xff]  ;;  %v5642_v55 = vld [vmem:[%s7540_s4 + $0x210] sm:$0xff]  ;;  %v1758_v57 = vld [vmem:[#allocation2 + $0x68] sm:$0xff] }
 0x182   : > { %1696 = vst.msk [vmem:[#allocation2 + $0x130] sm:$0x1f] %vm1651_vm5, %v1685_v56  ;;  %v1759_v11 = vld [vmem:[#allocation2 + $0x70] sm:$0xff]  ;;  %v1794_v31 = vpack.c.bf16 %v1758_v57, %v1749_v1 }
 0x183   : > { %1700 = vst.msk [vmem:[#allocation2 + $0xf0] sm:$0xff] %vm1646_vm3, %v1643_v37  ;;  %v1644_v53 = vmax.f32 %v1633_v59, 0.0  ;;  %v1795_v58 = vpack.c.bf16 %v1759_v11, %v1750_v29 }
 0x184   : > { %1709 = vst.msk [vmem:[#allocation2 + $0xb0] sm:$0xff] %vm1646_vm3, %v1666_v35  ;;  %2559 = vmatpush.bf16.msra.mxu1 %v5638_v24 }
 0x185   : > { %1718 = vst.msk [vmem:[#allocation2 + $0xb8] sm:$0xff] %vm1646_vm3, %v1686_v27  ;;  %v1703_v12 = vrot.slane %v1644_v53, 1  ;;  %v1712_v13 = vrot.slane %v1644_v53, 2  ;;  %v1781_v19 = vld [vmem:[#allocation2 + $0x120] sm:$0x1f]  ;;  %2582 = vmatpush.bf16.msra.mxu2 %v5646_v23 }
 0x186   : > { %1723 = vst.msk [vmem:[#allocation2 + $0xc0] sm:$0xff] %vm1646_vm3, %v1643_v37  ;;  %v1808_v36 = vpack.c.bf16 %v1781_v19, %v1781_v19  ;;  %v1782_v44 = vld [vmem:[#allocation2 + $0x128] sm:$0x1f]  ;;  %v1753_v19 = vld [vmem:[#allocation2 + $0x40] sm:$0xff] }
 0x187   : > { %1732 = vst.msk [vmem:[#allocation2 + $0x80] sm:$0xff] %vm1646_vm3, %v1666_v35  ;;  %v1704_v14 = vsel %vm606_vm1, %v1665_v28, %v1703_v12  ;;  %v1773_v51 = vld [vmem:[#allocation2 + $0xe0] sm:$0xff]  ;;  %v1713_v8 = vsel %vm1677_vm4, %v1685_v56, %v1712_v13  ;;  %v1809_v37 = vpack.c.bf16 %v1782_v44, %v1782_v44  ;;  %v1793_v28 = vpack.c.bf16 %v1757_v9, %v1748_v49  ;;  %v5635_v56 = vld [vmem:[%s7540_s4 + $0x1d8] sm:$0xff]  ;;  %v5633_v35 = vld [vmem:[%s7540_s4 + $0x1c8] sm:$0xff] }
 0x188   : > { %1741 = vst.msk [vmem:[#allocation2 + $0x88] sm:$0xff] %vm1646_vm3, %v1686_v27  ;;  %v1635_v10 = vpop.f32.mrf.mxu0  ;;  %v1800_v42 = vpack.c.bf16 %v1773_v51, %v1764_v17  ;;  %v1774_v18 = vld [vmem:[#allocation2 + $0xe8] sm:$0xff]  ;;  %2560 = vmatpush.bf16.msra.mxu1 %v5637_v62 }
 0x189   : > { %1701 = vst.msk [vmem:[#allocation2 + $0x138] sm:$0x1f] %vm1651_vm5, %v1644_v53  ;;  %v1636_v41 = vadd.f32 %v1635_v10, %v1608_v54  ;;  %v1801_v5 = vpack.c.bf16 %v1774_v18, %v1765_v16  ;;  %2583 = vmatpush.bf16.msra.mxu2 %v5645_v25  ;;  %v1783_v20 = vld [vmem:[#allocation2 + $0x130] sm:$0x1f] }
 0x18a   : > { %1710 = vst.msk [vmem:[#allocation2 + $0xf8] sm:$0xff] %vm1646_vm3, %v1704_v14  ;;  %2433 = vmatmul.bf16.gmra.mxu2 %v1800_v42  ;;  %v1810_v7 = vpack.c.bf16 %v1783_v20, %v1783_v20  ;;  %v1775_v59 = vld [vmem:[#allocation2 + $0xf0] sm:$0xff] }
 0x18b   : > { %1711 = vst.msk [vmem:[#allocation2 + $0x140] sm:$0x1f] %vm1651_vm5, %v1703_v12  ;;  %v1645_v21 = vmax.f32 %v1636_v41, 0.0  ;;  %2456 = vmatmul.bf16.gmra.mxu3 %v1801_v5  ;;  %v1767_v39 = vld [vmem:[#allocation2 + $0xb0] sm:$0xff] }
 0x18c   : > { %1719 = vst.msk [vmem:[#allocation2 + $0x100] sm:$0xff] %vm1646_vm3, %v1713_v8  ;;  %2561 = vmatpush.bf16.msra.mxu1 %v5636_v46 }
 0x18d   : > { %1720 = vst.msk [vmem:[#allocation2 + $0x148] sm:$0x1f] %vm1651_vm5, %v1712_v13  ;;  %v1727_v0 = vrot.slane %v1645_v21, 1  ;;  %v1736_v60 = vrot.slane %v1645_v21, 2  ;;  %v1769_v48 = vld [vmem:[#allocation2 + $0xc0] sm:$0xff]  ;;  %2584 = vmatpush.bf16.msra.mxu2 %v5644_v47 }
 0x18e   : > { %1724 = vst.msk [vmem:[#allocation2 + $0x108] sm:$0xff] %vm1646_vm3, %v1644_v53  ;;  %v1766_v53 = vld [vmem:[#allocation2 + $0xa8] sm:$0xff]  ;;  %v1761_v40 = vld [vmem:[#allocation2 + $0x80] sm:$0xff] }
 0x18f   : > { %1733 = vst.msk [vmem:[#allocation2 + $0xc8] sm:$0xff] %vm1646_vm3, %v1704_v14  ;;  %v1728_v22 = vsel %vm606_vm1, %v1703_v12, %v1727_v0  ;;  %2415 = vmatmul.bf16.gmra.mxu1 %v1808_v36  ;;  %v1737_v33 = vsel %vm1677_vm4, %v1712_v13, %v1736_v60  ;;  %v1802_v43 = vpack.c.bf16 %v1775_v59, %v1766_v53  ;;  %v1768_v14 = vld [vmem:[#allocation2 + $0xb8] sm:$0xff]  ;;  %v1762_v5 = vld [vmem:[#allocation2 + $0x88] sm:$0xff] }
 0x190   : > { %1742 = vst.msk [vmem:[#allocation2 + $0xd0] sm:$0xff] %vm1646_vm3, %v1713_v8  ;;  %v1637_v32 = vpop.f32.mrf.mxu0  ;;  %2562 = vmatpush.bf16.msra.mxu1 %v5635_v56  ;;  %v1784_v51 = vld [vmem:[#allocation2 + $0x138] sm:$0x1f] }
 0x191   : > { %1725 = vst.msk [vmem:[#allocation2 + $0x150] sm:$0x1f] %vm1651_vm5, %v1645_v21  ;;  %2585 = vmatpush.bf16.msra.mxu2 %v5643_v30  ;;  %v1776_v12 = vld [vmem:[#allocation2 + $0xf8] sm:$0xff]  ;;  %v1811_v15 = vpack.c.bf16 %v1784_v51, %v1784_v51  ;;  %v1798_v21 = vpack.c.bf16 %v1762_v5, %v1753_v19  ;;  %v5662_v5 = vld [vmem:[%s7542_s6 + $0x70] sm:$0xff]  ;;  %v5652_v19 = vld [vmem:[%s7542_s6 + $0x20] sm:$0xff] }
 0x192   : > { %1734 = vst.msk [vmem:[#allocation2 + $0x110] sm:$0xff] %vm1646_vm3, %v1728_v22  ;;  %v1803_v54 = vpack.c.bf16 %v1776_v12, %v1767_v39  ;;  %v1785_v10 = vld [vmem:[#allocation2 + $0x140] sm:$0x1f]  ;;  %v1752_v8 = vld [vmem:[#allocation2 + $0x38] sm:$0xff] }
 0x193   : > { %1735 = vst.msk [vmem:[#allocation2 + $0x158] sm:$0x1f] %vm1651_vm5, %v1727_v0  ;;  %v1777_v13 = vld [vmem:[#allocation2 + $0x100] sm:$0xff]  ;;  %v1812_v16 = vpack.c.bf16 %v1785_v10, %v1785_v10  ;;  %v1797_v41 = vpack.c.bf16 %v1761_v40, %v1752_v8  ;;  %v5655_v12 = vld [vmem:[%s7542_s6 + $0x38] sm:$0xff]  ;;  %v5654_v10 = vld [vmem:[%s7542_s6 + $0x30] sm:$0xff] }
 0x194   : > { %1743 = vst.msk [vmem:[#allocation2 + $0x118] sm:$0xff] %vm1646_vm3, %v1737_v33  ;;  %2563 = vmatpush.bf16.msra.mxu1 %v5634_v52  ;;  %v1804_v17 = vpack.c.bf16 %v1777_v13, %v1768_v14  ;;  %v1786_v42 = vld [vmem:[#allocation2 + $0x148] sm:$0x1f]  ;;  %v6894_v33 = vld [vmem:[%s7541_s5] ss:$0 sm:$0xff]  ;;  %3299 = vmatpush.bf16.msra.mxu3 %v5655_v12 }
 0x195   : > { %1744 = vst.msk [vmem:[#allocation2 + $0x160] sm:$0x1f] %vm1651_vm5, %v1736_v60  ;;  %v1778_v34 = vld [vmem:[#allocation2 + $0x108] sm:$0xff]  ;;  %2586 = vmatpush.bf16.msra.mxu2 %v5642_v55  ;;  %v1813_v18 = vpack.c.bf16 %v1786_v42, %v1786_v42  ;;  %v5663_v42 = vld [vmem:[%s7542_s6 + $0x78] sm:$0xff] }
 0x196   : > { %v1805_v45 = vpack.c.bf16 %v1778_v34, %v1769_v48  ;;  %v1770_v38 = vld [vmem:[#allocation2 + $0xc8] sm:$0xff]  ;;  %3317 = vmatpush.bf16.msra.mxu0 %v5663_v42  ;;  %v5671_v42 = vld [vmem:[%s7542_s6 + $0xb8] sm:$0xff] }
 0x197   : > { %v1771_v60 = vld [vmem:[#allocation2 + $0xd0] sm:$0xff] }
 0x198   : > { %2548 = vmatmul.bf16.gmra.mxu0 %v1805_v45  ;;  %v1787_v50 = vld [vmem:[#allocation2 + $0x150] sm:$0x1f]  ;;  %2564 = vmatpush.bf16.msra.mxu1 %v5633_v35 }
 0x199   : > { %v1814_v27 = vpack.c.bf16 %v1787_v50, %v1787_v50  ;;  %2587 = vmatpush.bf16.msra.mxu2 %v5641_v2  ;;  %v1779_v61 = vld [vmem:[#allocation2 + $0x110] sm:$0xff]  ;;  %3300 = vmatpush.bf16.msra.mxu3 %v5654_v10 }
 0x19a   : > { %2438 = vmatmul.bf16.gmra.mxu2 %v1809_v37  ;;  %v1806_v6 = vpack.c.bf16 %v1779_v61, %v1770_v38  ;;  %v1788_v22 = vld [vmem:[#allocation2 + $0x158] sm:$0x1f]  ;;  %3318 = vmatpush.bf16.msra.mxu0 %v5662_v5  ;;  %v5682_v5 = vld [vmem:[%s7542_s6 + $0x110] sm:$0xff] }
 0x19b   : > { %2461 = vmatmul.bf16.gmra.mxu3 %v1810_v7  ;;  %v1780_v0 = vld [vmem:[#allocation2 + $0x118] sm:$0xff]  ;;  %v1815_v24 = vpack.c.bf16 %v1788_v22, %v1788_v22 }
 0x19c   : > { %2565 = vmatpush.bf16.msra.mxu1 %v5632_v63  ;;  %v1807_v36 = vpack.c.bf16 %v1780_v0, %v1771_v60  ;;  %v1789_v32 = vld [vmem:[#allocation2 + $0x160] sm:$0x1f] }
 0x19d   : > { %2588 = vmatpush.bf16.msra.mxu2 %v5640_v3  ;;  %v1816_v25 = vpack.c.bf16 %v1789_v32, %v1789_v32 }
 0x19f   : > { %2474 = vmatmul.bf16.vlgmr.msrb.gmra.mxu1 %v1793_v28 }
 0x1a8   : > { %2553 = vmatmul.bf16.gmra.mxu0 %v1814_v27 }
 0x1aa   : > { %2497 = vmatmul.bf16.vlgmr.msrb.gmra.mxu2 %v1794_v31 }
 0x1ab   : > { %2520 = vmatmul.bf16.vlgmr.msrb.gmra.mxu3 %v1795_v58 }
 0x1af   : > { %2479 = vmatmul.bf16.gmra.mxu1 %v1802_v43 }
 0x1ba   : > { %2502 = vmatmul.bf16.gmra.mxu2 %v1803_v54 }
 0x1bb   : > { %2525 = vmatmul.bf16.gmra.mxu3 %v1804_v17 }
 0x1bf   : > { %2484 = vmatmul.bf16.gmra.mxu1 %v1811_v15 }
 0x1ca   : > { %2507 = vmatmul.bf16.gmra.mxu2 %v1812_v16 }
 0x1cb   : > { %2530 = vmatmul.bf16.gmra.mxu3 %v1813_v18  ;;  %v5653_v18 = vld [vmem:[%s7542_s6 + $0x28] sm:$0xff] }
 0x1cc   : > { %3301 = vmatpush.bf16.msra.mxu3 %v5653_v18 }
 0x1cf   : > { %2566 = vmatmul.bf16.vlgmr.msra.gmra.mxu1 %v1797_v41 }
 0x1d0   : > { %3302 = vmatpush.bf16.msra.mxu3 %v5652_v19 }
 0x1da   : > { %2589 = vmatmul.bf16.vlgmr.msra.gmra.mxu2 %v1798_v21  ;;  %v5661_v21 = vld [vmem:[%s7542_s6 + $0x68] sm:$0xff] }
 0x1db   : > { %3319 = vmatpush.bf16.msra.mxu0 %v5661_v21 }
 0x1df   : > { %2571 = vmatmul.bf16.gmra.mxu1 %v1806_v6 }
 0x1ea   : > { %2594 = vmatmul.bf16.gmra.mxu2 %v1807_v36 }
 0x1ec   : > { %v2406_v23 = vpop.f32.mrf.mxu1 }
 0x1ed   : > { %v2407_v62 = vadd.f32 %v6894_v33, %v2406_v23  ;;  %v5651_v23 = vld [vmem:[%s7542_s6 + $0x18] sm:$0xff] }
 0x1ee   : > { %3303 = vmatpush.bf16.msra.mxu3 %v5651_v23 }
 0x1ef   : > { %2576 = vmatmul.bf16.gmra.mxu1 %v1815_v24  ;;  %v5660_v24 = vld [vmem:[%s7542_s6 + $0x60] sm:$0xff] }
 0x1f0   : > { %3320 = vmatpush.bf16.msra.mxu0 %v5660_v24  ;;  %v5678_v24 = vld [vmem:[%s7542_s6 + $0xf0] sm:$0xff] }
 0x1f4   : > { %v6889_v26 = vpop.f32.mrf.mxu1 }
 0x1fa   : > { %2599 = vmatmul.bf16.gmra.mxu2 %v1816_v25 }
 0x1fc   : > { %v2411_v48 = vpop.f32.mrf.mxu1 }
 0x1fd   : > { %v2429_v34 = vpop.f32.mrf.mxu2  ;;  %v2412_v49 = vadd.f32 %v6894_v33, %v2411_v48 }
 0x1fe   : > { %v2430_v44 = vadd.f32 %v2429_v34, %v2407_v62  ;;  %v2452_v45 = vpop.f32.mrf.mxu3  ;;  %v2544_v37 = vpop.f32.mrf.mxu0 }
 0x200   : > { %v2453_v20 = vadd.f32 %v2452_v45, %v2430_v44 }
 0x204   : > { %v6897_v7 = vpop.f32.mrf.mxu1 }
 0x205   : > { %v6899_v9 = vpop.f32.mrf.mxu2 }
 0x206   : > { %v6901_v46 = vpop.f32.mrf.mxu3  ;;  %v6903_v47 = vpop.f32.mrf.mxu0 }
 0x20c   : > { %v2416_v28 = vpop.f32.mrf.mxu1 }
 0x20d   : > { %v2434_v56 = vpop.f32.mrf.mxu2  ;;  %v2417_v11 = vadd.f32 %v6894_v33, %v2416_v28  ;;  %v5687_v28 = vld [vmem:[%s7542_s6 + $0x138] sm:$0xff] }
 0x20e   : > { %v2435_v30 = vadd.f32 %v2434_v56, %v2412_v49  ;;  %v2457_v52 = vpop.f32.mrf.mxu3  ;;  %v5659_v49 = vld [vmem:[%s7542_s6 + $0x58] sm:$0xff]  ;;  %3371 = vmatpush.bf16.msrb.mxu1 %v5687_v28  ;;  %v5680_v28 = vld [vmem:[%s7542_s6 + $0x100] sm:$0xff] }
 0x20f   : > { %v5695_v56 = vld [vmem:[%s7542_s6 + $0x178] sm:$0xff]  ;;  %3321 = vmatpush.bf16.msra.mxu0 %v5659_v49 }
 0x210   : > { %v2458_v55 = vadd.f32 %v2457_v52, %v2435_v30  ;;  %v2409_v30 = vadd.f32 %v6894_v33, %v6889_v26  ;;  %3389 = vmatpush.bf16.msrb.mxu2 %v5695_v56 }
 0x214   : > { %v2418_v50 = vpop.f32.mrf.mxu1 }
 0x215   : > { %v2549_v57 = vpop.f32.mrf.mxu0  ;;  %v6906_v35 = vpop.f32.mrf.mxu2  ;;  %v5686_v50 = vld [vmem:[%s7542_s6 + $0x130] sm:$0xff] }
 0x216   : > { %v6908_v27 = vpop.f32.mrf.mxu3  ;;  %3372 = vmatpush.bf16.msrb.mxu1 %v5686_v50  ;;  %v5667_v50 = vld [vmem:[%s7542_s6 + $0x98] sm:$0xff] }
 0x21c   : > { %v2475_v1 = vpop.f32.mrf.mxu1 }
 0x21d   : > { %v6911_v31 = vpop.f32.mrf.mxu0  ;;  %v2439_v29 = vpop.f32.mrf.mxu2  ;;  %v2476_v13 = vadd.f32 %v2475_v1, %v2453_v20 }
 0x21e   : > { %v2440_v58 = vadd.f32 %v2439_v29, %v2417_v11  ;;  %v2462_v59 = vpop.f32.mrf.mxu3  ;;  %v2432_v11 = vadd.f32 %v6899_v9, %v2409_v30  ;;  %v5685_v9 = vld [vmem:[%s7542_s6 + $0x128] sm:$0xff] }
 0x21f   : > { %3373 = vmatpush.bf16.msrb.mxu1 %v5685_v9  ;;  %v5677_v30 = vld [vmem:[%s7542_s6 + $0xe8] sm:$0xff]  ;;  %v5718_v9 = vld [vmem:[%s7542_s6 + $0x230] sm:$0xff] }
 0x220   : > { %v2463_v63 = vadd.f32 %v2462_v59, %v2440_v58  ;;  %v2455_v58 = vadd.f32 %v6901_v46, %v2432_v11  ;;  %v5648_v46 = vld [vmem:[%s7542_s6] sm:$0xff] }
 0x224   : > { %v6913_v2 = vpop.f32.mrf.mxu1 }
 0x225   : > { %v2554_v53 = vpop.f32.mrf.mxu0  ;;  %v2441_v43 = vpop.f32.mrf.mxu2 }
 0x226   : > { %v2464_v3 = vpop.f32.mrf.mxu3 }
 0x227   : > { %v5658_v3 = vld [vmem:[%s7542_s6 + $0x50] sm:$0xff] }
 0x228   : > { %3322 = vmatpush.bf16.msra.mxu0 %v5658_v3  ;;  %v5666_v3 = vld [vmem:[%s7542_s6 + $0x90] sm:$0xff] }
 0x22c   : > { %v2480_v39 = vpop.f32.mrf.mxu1 }
 0x22d   : > { %v2556_v54 = vpop.f32.mrf.mxu0  ;;  %v2498_v14 = vpop.f32.mrf.mxu2  ;;  %v2481_v61 = vadd.f32 %v2480_v39, %v2458_v55  ;;  %v5649_v55 = vld [vmem:[%s7542_s6 + $0x8] sm:$0xff]  ;;  %v5684_v39 = vld [vmem:[%s7542_s6 + $0x120] sm:$0xff] }
 0x22e   : > { %v2499_v17 = vadd.f32 %v2498_v14, %v2476_v13  ;;  %v2521_v51 = vpop.f32.mrf.mxu3  ;;  %v5692_v14 = vld [vmem:[%s7542_s6 + $0x160] sm:$0xff]  ;;  %3374 = vmatpush.bf16.msrb.mxu1 %v5684_v39 }
 0x230   : > { %v2522_v15 = vadd.f32 %v2521_v51, %v2499_v17 }
 0x232   : > { %v2545_v16 = vadd.f32 %v2544_v37, %v2522_v15  ;;  %v5650_v37 = vld [vmem:[%s7542_s6 + $0x10] sm:$0xff]  ;;  %v2414_v15 = vadd.f32 %v6894_v33, %v6897_v7  ;;  %v5691_v33 = vld [vmem:[%s7542_s6 + $0x158] sm:$0xff]  ;;  %v5656_v7 = vld [vmem:[%s7542_s6 + $0x40] sm:$0xff] }
 0x233   : > { %3304 = vmatpush.bf16.msra.mxu3 %v5650_v37 }
 0x234   : > { %v6927_v40 = vpop.f32.mrf.mxu1 }
 0x235   : > { %v2500_v8 = vpop.f32.mrf.mxu2 }
 0x236   : > { %v6929_v41 = vpop.f32.mrf.mxu3 }
 0x237   : > { %3305 = vmatpush.bf16.msra.mxu3 %v5649_v55 }
 0x23b   : > { %3306 = vmatpush.bf16.msra.mxu3 %v5648_v46 }
 0x23c   : > { %v2485_v38 = vpop.f32.mrf.mxu1 }
 0x23d   : > { %v2503_v6 = vpop.f32.mrf.mxu2  ;;  %v2486_v48 = vadd.f32 %v2485_v38, %v2463_v63  ;;  %v2478_v63 = vadd.f32 %v6913_v2, %v2455_v58  ;;  %v5657_v2 = vld [vmem:[%s7542_s6 + $0x48] sm:$0xff] }
 0x23e   : > { %v2504_v0 = vadd.f32 %v2503_v6, %v2481_v61  ;;  %v2526_v60 = vpop.f32.mrf.mxu3  ;;  %3323 = vmatpush.bf16.msra.mxu0 %v5657_v2  ;;  %v5690_v61 = vld [vmem:[%s7542_s6 + $0x150] sm:$0xff]  ;;  %v5675_v2 = vld [vmem:[%s7542_s6 + $0xd8] sm:$0xff] }
 0x23f   : > { %v2501_v43 = vadd.f32 %v2500_v8, %v2478_v63  ;;  %3335 = vmatpush.bf16.msrb.mxu3 %v5671_v42  ;;  %v5683_v8 = vld [vmem:[%s7542_s6 + $0x118] sm:$0xff]  ;;  %v5664_v42 = vld [vmem:[%s7542_s6 + $0x80] sm:$0xff] }
 0x240   : > { %v2527_v36 = vadd.f32 %v2526_v60, %v2504_v0  ;;  %3375 = vmatpush.bf16.msrb.mxu1 %v5683_v8  ;;  %v5669_v0 = vld [vmem:[%s7542_s6 + $0xa8] sm:$0xff]  ;;  %v5679_v60 = vld [vmem:[%s7542_s6 + $0xf8] sm:$0xff] }
 0x241   : > { %v2524_v17 = vadd.f32 %v6929_v41, %v2501_v43 }
 0x242   : > { %v6940_v22 = vadd.f32 %v2549_v57, %v2527_v36  ;;  %v5694_v57 = vld [vmem:[%s7542_s6 + $0x170] sm:$0xff]  ;;  %3324 = vmatpush.bf16.msra.mxu0 %v5656_v7 }
 0x243   : > { %3390 = vmatpush.bf16.msrb.mxu2 %v5694_v57  ;;  %v2547_v18 = vadd.f32 %v6903_v47, %v2524_v17  ;;  %v5719_v57 = vld [vmem:[%s7542_s6 + $0x238] sm:$0xff] }
 0x244   : > { %v2487_v32 = vpop.f32.mrf.mxu1  ;;  %3376 = vmatpush.bf16.msrb.mxu1 %v5682_v5 }
 0x245   : > { %v6948_v25 = vpop.f32.mrf.mxu2 }
 0x246   : > { %v6950_v62 = vpop.f32.mrf.mxu3  ;;  %3353 = vmatpush.bf16.msrb.mxu0 %v5679_v60 }
 0x24a   : > { %3354 = vmatpush.bf16.msrb.mxu0 %v5678_v24  ;;  %v5701_v24 = vld [vmem:[%s7542_s6 + $0x1a8] sm:$0xff] }
 0x24c   : > { %v2567_v34 = vpop.f32.mrf.mxu1 }
 0x24d   : > { %v2508_v44 = vpop.f32.mrf.mxu2  ;;  %v2568_v12 = vadd.f32 %v2567_v34, %v2545_v16  ;;  %v2437_v16 = vadd.f32 %v6906_v35, %v2414_v15  ;;  %v5670_v35 = vld [vmem:[%s7542_s6 + $0xb0] sm:$0xff] }
 0x24e   : > { %v2509_v45 = vadd.f32 %v2508_v44, %v2486_v48  ;;  %v2531_v20 = vpop.f32.mrf.mxu3  ;;  %3336 = vmatpush.bf16.msrb.mxu3 %v5670_v35  ;;  %3355 = vmatpush.bf16.msrb.mxu0 %v5677_v30 }
 0x24f   : > { %v2460_v19 = vadd.f32 %v6908_v27, %v2437_v16  ;;  %v5681_v27 = vld [vmem:[%s7542_s6 + $0x108] sm:$0xff]  ;;  %v5716_v16 = vld [vmem:[%s7542_s6 + $0x220] sm:$0xff] }
 0x250   : > { %v2532_v52 = vadd.f32 %v2531_v20, %v2509_v45  ;;  %3377 = vmatpush.bf16.msrb.mxu1 %v5681_v27 }
 0x251   : > { %v2483_v6 = vadd.f32 %v6927_v40, %v2460_v19  ;;  %v5689_v40 = vld [vmem:[%s7542_s6 + $0x148] sm:$0xff] }
 0x252   : > { %v6976_v26 = vadd.f32 %v2554_v53, %v2532_v52  ;;  %v5693_v53 = vld [vmem:[%s7542_s6 + $0x168] sm:$0xff]  ;;  %3337 = vmatpush.bf16.msrb.mxu3 %v5669_v0  ;;  %v5672_v0 = vld [vmem:[%s7542_s6 + $0xc0] sm:$0xff] }
 0x253   : > { %3391 = vmatpush.bf16.msrb.mxu2 %v5693_v53  ;;  %v2506_v23 = vadd.f32 %v6948_v25, %v2483_v6  ;;  %v5668_v25 = vld [vmem:[%s7542_s6 + $0xa0] sm:$0xff]  ;;  %v5673_v19 = vld [vmem:[%s7542_s6 + $0xc8] sm:$0xff] }
 0x254   : > { %v2569_v1 = vpop.f32.mrf.mxu1  ;;  %3378 = vmatpush.bf16.msrb.mxu1 %v5680_v28  ;;  %v5713_v28 = vld [vmem:[%s7542_s6 + $0x208] sm:$0xff] }
 0x255   : > { %v2510_v29 = vpop.f32.mrf.mxu2  ;;  %v2570_v47 = vadd.f32 %v2569_v1, %v2547_v18  ;;  %v2529_v52 = vadd.f32 %v6950_v62, %v2506_v23  ;;  %v5676_v62 = vld [vmem:[%s7542_s6 + $0xe0] sm:$0xff]  ;;  %v5703_v18 = vld [vmem:[%s7542_s6 + $0x1b8] sm:$0xff]  ;;  %v5714_v23 = vld [vmem:[%s7542_s6 + $0x210] sm:$0xff] }
 0x256   : > { %v2533_v59 = vpop.f32.mrf.mxu3  ;;  %3338 = vmatpush.bf16.msrb.mxu3 %v5668_v25  ;;  %3356 = vmatpush.bf16.msrb.mxu0 %v5676_v62 }
 0x257   : > { %3392 = vmatpush.bf16.msrb.mxu2 %v5692_v14  ;;  %v2552_v58 = vadd.f32 %v6911_v31, %v2529_v52  ;;  %v5717_v14 = vld [vmem:[%s7542_s6 + $0x228] sm:$0xff]  ;;  %v5712_v52 = vld [vmem:[%s7542_s6 + $0x200] sm:$0xff] }
 0x258   : > { %3443 = vmatpush.bf16.msra.mxu1 %v5719_v57 }
 0x25a   : > { %3339 = vmatpush.bf16.msrb.mxu3 %v5667_v50  ;;  %3357 = vmatpush.bf16.msrb.mxu0 %v5675_v2  ;;  %v5699_v50 = vld [vmem:[%s7542_s6 + $0x198] sm:$0xff] }
 0x25b   : > { %3393 = vmatpush.bf16.msrb.mxu2 %v5691_v33 }
 0x25c   : > { %v2572_v13 = vpop.f32.mrf.mxu1  ;;  %3444 = vmatpush.bf16.msra.mxu1 %v5718_v9 }
 0x25d   : > { %v2590_v54 = vpop.f32.mrf.mxu2  ;;  %v2573_v45 = vadd.f32 %v2572_v13, %v6940_v22  ;;  %v5688_v22 = vld [vmem:[%s7542_s6 + $0x140] sm:$0xff] }
 0x25e   : > { %v2591_v51 = vadd.f32 %v2590_v54, %v2568_v12  ;;  %3340 = vmatpush.bf16.msrb.mxu3 %v5666_v3  ;;  %v5665_v54 = vld [vmem:[%s7542_s6 + $0x88] sm:$0xff] }
 0x25f   : > { %3394 = vmatpush.bf16.msrb.mxu2 %v5690_v61  ;;  %v5697_v3 = vld [vmem:[%s7542_s6 + $0x188] sm:$0xff] }
 0x260   : > { %v2604_v10 = vmax.f32 %v2591_v51, 0.0  ;;  %v5674_v51 = vld [vmem:[%s7542_s6 + $0xd0] sm:$0xff]  ;;  %3445 = vmatpush.bf16.msra.mxu1 %v5717_v14 }
 0x261   : > { %3358 = vmatpush.bf16.msrb.mxu0 %v5674_v51 }
 0x262   : > { %2609 = vst.msk [vmem:[#allocation2] sm:$0xff] %vm1646_vm3, %v2604_v10  ;;  %v2616_v32 = vrot.slane %v2604_v10, 1  ;;  %v2627_v48 = vrot.slane %v2604_v10, 2  ;;  %3341 = vmatpush.bf16.msrb.mxu3 %v5665_v54  ;;  %v5704_v54 = vld [vmem:[%s7542_s6 + $0x1c0] sm:$0xff] }
 0x263   : > { %3395 = vmatpush.bf16.msrb.mxu2 %v5689_v40  ;;  %v5711_v40 = vld [vmem:[%s7542_s6 + $0x1f8] sm:$0xff] }
 0x264   : > { %v7022_v41 = vpop.f32.mrf.mxu1  ;;  %3446 = vmatpush.bf16.msra.mxu1 %v5716_v16 }
 0x265   : > { %v2592_v21 = vpop.f32.mrf.mxu2  ;;  %v2575_v53 = vadd.f32 %v7022_v41, %v2552_v58  ;;  %3359 = vmatpush.bf16.msrb.mxu0 %v5673_v19 }
 0x266   : > { %v2593_v38 = vadd.f32 %v2592_v21, %v2570_v47  ;;  %3342 = vmatpush.bf16.msrb.mxu3 %v5664_v42  ;;  %v5715_v21 = vld [vmem:[%s7542_s6 + $0x218] sm:$0xff] }
 0x267   : > { %3396 = vmatpush.bf16.msrb.mxu2 %v5688_v22  ;;  %v5700_v22 = vld [vmem:[%s7542_s6 + $0x1a0] sm:$0xff] }
 0x268   : > { %v2605_v36 = vmax.f32 %v2593_v38, 0.0  ;;  %v5702_v38 = vld [vmem:[%s7542_s6 + $0x1b0] sm:$0xff]  ;;  %3447 = vmatpush.bf16.msra.mxu1 %v5715_v21 }
 0x269   : > { %v2674_v1 = vld [vmem:[#allocation2] sm:$0xff]  ;;  %3360 = vmatpush.bf16.msrb.mxu0 %v5672_v0  ;;  %v5726_v0 = vld [vmem:[%s7544_s8 + $0x30] sm:$0xff] }
 0x26a   : > { %2610 = vst.msk [vmem:[#allocation2 + $0x48] sm:$0xff] %vm1646_vm3, %v2605_v36  ;;  %v2617_v34 = vrot.slane %v2605_v36, 1  ;;  %v2628_v44 = vrot.slane %v2605_v36, 2 }
 0x26b   : > { %2638 = vst.msk [vmem:[#allocation2 + $0x18] sm:$0xff] %vm1646_vm3, %v2605_v36 }
 0x26c   : > { %v2618_v20 = vsel %vm606_vm1, %v2616_v32, %v2617_v34  ;;  %v2629_v37 = vsel %vm1677_vm4, %v2627_v48, %v2628_v44  ;;  %v7056_v49 = vpop.f32.mrf.mxu1  ;;  %3448 = vmatpush.bf16.msra.mxu1 %v5714_v23  ;;  %v5724_v23 = vld [vmem:[%s7544_s8 + $0x20] sm:$0xff] }
 0x26d   : > { %2624 = vst.msk [vmem:[#allocation2 + $0x8] sm:$0xff] %vm1646_vm3, %v2618_v20  ;;  %v2595_v56 = vpop.f32.mrf.mxu2  ;;  %v2578_v8 = vadd.f32 %v7056_v49, %v6976_v26 }
 0x26e   : > { %2635 = vst.msk [vmem:[#allocation2 + $0x10] sm:$0xff] %vm1646_vm3, %v2629_v37  ;;  %v2596_v55 = vadd.f32 %v2595_v56, %v2573_v45  ;;  %v5710_v56 = vld [vmem:[%s7542_s6 + $0x1f0] sm:$0xff] }
 0x270   : > { %v2606_v11 = vmax.f32 %v2596_v55, 0.0  ;;  %3449 = vmatpush.bf16.msra.mxu1 %v5713_v28  ;;  %v5709_v55 = vld [vmem:[%s7542_s6 + $0x1e8] sm:$0xff] }
 0x271   : > { %v2683_v29 = vld [vmem:[#allocation2 + $0x48] sm:$0xff] }
 0x272   : > { %2612 = vst.msk [vmem:[#allocation2 + $0x90] sm:$0x7] %vm2611_vm6, %v2606_v11  ;;  %v2619_v59 = vrot.slane %v2606_v11, 1  ;;  %v2630_v63 = vrot.slane %v2606_v11, 2  ;;  %v2701_v43 = vpack.c.bf16 %v2683_v29, %v2674_v1  ;;  %v5698_v29 = vld [vmem:[%s7542_s6 + $0x190] sm:$0xff]  ;;  %v2677_v2 = vld [vmem:[#allocation2 + $0x18] sm:$0xff] }
 0x273   : > { %2639 = vst.msk [vmem:[#allocation2 + $0x60] sm:$0xff] %vm1646_vm3, %v2606_v11  ;;  %v5741_v28 = vld [vmem:[%s7544_s8 + $0xa8] sm:$0xff] }
 0x274   : > { %v2620_v31 = vsel %vm606_vm1, %v2617_v34, %v2619_v59  ;;  %2626 = vst.msk [vmem:[#allocation2 + $0x98] sm:$0x7] %vm2611_vm6, %v2619_v59  ;;  %v2631_v46 = vsel %vm1677_vm4, %v2628_v44, %v2630_v63  ;;  %v2579_v12 = vpop.f32.mrf.mxu1  ;;  %3307 = vmatmul.bf16.vlgmr.msra.gmra.mxu3 %v2701_v43  ;;  %v2675_v35 = vld [vmem:[#allocation2 + $0x8] sm:$0xff]  ;;  %3450 = vmatpush.bf16.msra.mxu1 %v5712_v52 }
 0x275   : > { %2625 = vst.msk [vmem:[#allocation2 + $0x50] sm:$0xff] %vm1646_vm3, %v2620_v31  ;;  %v2597_v13 = vpop.f32.mrf.mxu2  ;;  %3407 = vmatpush.bf16.msra.mxu3 %v5703_v18  ;;  %v2676_v62 = vld [vmem:[#allocation2 + $0x10] sm:$0xff] }
 0x276   : > { %2636 = vst.msk [vmem:[#allocation2 + $0x58] sm:$0xff] %vm1646_vm3, %v2631_v46  ;;  %v2598_v39 = vadd.f32 %v2597_v13, %v2575_v53  ;;  %v5705_v13 = vld [vmem:[%s7542_s6 + $0x1c8] sm:$0xff] }
 0x277   : > { %2637 = vst.msk [vmem:[#allocation2 + $0xa0] sm:$0x7] %vm2611_vm6, %v2630_v63 }
 0x278   : > { %2646 = vst.msk [vmem:[#allocation2 + $0x20] sm:$0xff] %vm1646_vm3, %v2620_v31  ;;  %v2607_v17 = vmax.f32 %v2598_v39, 0.0  ;;  %v5706_v31 = vld [vmem:[%s7542_s6 + $0x1d0] sm:$0xff] }
 0x279   : > { %2653 = vst.msk [vmem:[#allocation2 + $0x28] sm:$0xff] %vm1646_vm3, %v2631_v46  ;;  %v2692_v61 = vld [vmem:[#allocation2 + $0x90] sm:$0x7]  ;;  %3408 = vmatpush.bf16.msra.mxu3 %v5702_v38  ;;  %v5696_v46 = vld [vmem:[%s7542_s6 + $0x180] sm:$0xff]  ;;  %v5727_v38 = vld [vmem:[%s7544_s8 + $0x38] sm:$0xff] }
 0x27a   : > { %2656 = vst.msk [vmem:[#allocation2 + $0x30] sm:$0xff] %vm1646_vm3, %v2606_v11  ;;  %v2642_v15 = vrot.slane %v2607_v17, 1  ;;  %v2649_v10 = vrot.slane %v2607_v17, 2  ;;  %v2710_v27 = vpack.c.bf16 %v2692_v61, %v2692_v61  ;;  %v5708_v11 = vld [vmem:[%s7542_s6 + $0x1e0] sm:$0xff]  ;;  %4087 = vmatpush.bf16.msra.mxu2 %v5727_v38 }
 0x27b   : > { %2640 = vst.msk [vmem:[#allocation2 + $0xa8] sm:$0x7] %vm2611_vm6, %v2607_v17  ;;  %v2693_v30 = vld [vmem:[#allocation2 + $0x98] sm:$0x7]  ;;  %v2686_v12 = vld [vmem:[#allocation2 + $0x60] sm:$0xff] }
 0x27c   : > { %v2643_v33 = vsel %vm606_vm1, %v2619_v59, %v2642_v15  ;;  %2648 = vst.msk [vmem:[#allocation2 + $0xb0] sm:$0x7] %vm2611_vm6, %v2642_v15  ;;  %v2650_v7 = vsel %vm1677_vm4, %v2630_v63, %v2649_v10  ;;  %v2684_v47 = vld [vmem:[#allocation2 + $0x50] sm:$0xff]  ;;  %v2711_v57 = vpack.c.bf16 %v2693_v30, %v2693_v30  ;;  %v5707_v63 = vld [vmem:[%s7542_s6 + $0x1d8] sm:$0xff]  ;;  %v2704_v39 = vpack.c.bf16 %v2686_v12, %v2677_v2  ;;  %v5757_v2 = vld [vmem:[%s7544_s8 + $0x128] sm:$0xff] }
 0x27d   : > { %2647 = vst.msk [vmem:[#allocation2 + $0x68] sm:$0xff] %vm1646_vm3, %v2643_v33  ;;  %v2600_v41 = vpop.f32.mrf.mxu2  ;;  %v2702_v5 = vpack.c.bf16 %v2684_v47, %v2675_v35  ;;  %3409 = vmatpush.bf16.msra.mxu3 %v5701_v24  ;;  %v2685_v1 = vld [vmem:[#allocation2 + $0x58] sm:$0xff]  ;;  %v5738_v12 = vld [vmem:[%s7544_s8 + $0x90] sm:$0xff] }
 0x27e   : > { %2654 = vst.msk [vmem:[#allocation2 + $0x70] sm:$0xff] %vm1646_vm3, %v2650_v7  ;;  %v2601_v26 = vadd.f32 %v2600_v41, %v2578_v8  ;;  %v2703_v58 = vpack.c.bf16 %v2685_v1, %v2676_v62  ;;  %v2694_v14 = vld [vmem:[#allocation2 + $0xa0] sm:$0x7]  ;;  %4088 = vmatpush.bf16.msra.mxu2 %v5726_v0  ;;  %v5743_v24 = vld [vmem:[%s7544_s8 + $0xb8] sm:$0xff] }
 0x27f   : > { %2655 = vst.msk [vmem:[#allocation2 + $0xb8] sm:$0x7] %vm2611_vm6, %v2649_v10  ;;  %3325 = vmatmul.bf16.vlgmr.msra.gmra.mxu0 %v2702_v5  ;;  %v2678_v34 = vld [vmem:[#allocation2 + $0x20] sm:$0xff]  ;;  %v5759_v62 = vld [vmem:[%s7544_s8 + $0x138] sm:$0xff] }
 0x280   : > { %2657 = vst.msk [vmem:[#allocation2 + $0x78] sm:$0xff] %vm1646_vm3, %v2607_v17  ;;  %v2608_v6 = vmax.f32 %v2601_v26, 0.0  ;;  %v2679_v20 = vld [vmem:[#allocation2 + $0x28] sm:$0xff]  ;;  %3425 = vmatpush.bf16.msra.mxu0 %v5711_v40  ;;  %v2712_v17 = vpack.c.bf16 %v2694_v14, %v2694_v14  ;;  %v5735_v40 = vld [vmem:[%s7544_s8 + $0x78] sm:$0xff]  ;;  %v5720_v1 = vld [vmem:[%s7544_s8] sm:$0xff] }
 0x281   : > { %2664 = vst.msk [vmem:[#allocation2 + $0x38] sm:$0xff] %vm1646_vm3, %v2643_v33  ;;  %3410 = vmatpush.bf16.msra.mxu3 %v5700_v22  ;;  %v2680_v8 = vld [vmem:[#allocation2 + $0x30] sm:$0xff]  ;;  %v5737_v14 = vld [vmem:[%s7544_s8 + $0x88] sm:$0xff] }
 0x282   : > { %2671 = vst.msk [vmem:[#allocation2 + $0x40] sm:$0xff] %vm1646_vm3, %v2650_v7  ;;  %v2660_v60 = vrot.slane %v2608_v6, 1  ;;  %v2667_v36 = vrot.slane %v2608_v6, 2  ;;  %v2695_v42 = vld [vmem:[#allocation2 + $0xa8] sm:$0x7] }
 0x283   : > { %2658 = vst.msk [vmem:[#allocation2 + $0xc0] sm:$0x7] %vm2611_vm6, %v2608_v6  ;;  %v2696_v59 = vld [vmem:[#allocation2 + $0xb0] sm:$0x7]  ;;  %v2713_v16 = vpack.c.bf16 %v2695_v42, %v2695_v42 }
 0x284   : > { %v2661_v32 = vsel %vm606_vm1, %v2642_v15, %v2660_v60  ;;  %2666 = vst.msk [vmem:[#allocation2 + $0xc8] sm:$0x7] %vm2611_vm6, %v2660_v60  ;;  %v2668_v48 = vsel %vm1677_vm4, %v2649_v10, %v2667_v36  ;;  %3312 = vmatmul.bf16.gmra.mxu3 %v2710_v27  ;;  %v2687_v44 = vld [vmem:[#allocation2 + $0x68] sm:$0xff]  ;;  %3426 = vmatpush.bf16.msra.mxu0 %v5710_v56 }
 0x285   : > { %2665 = vst.msk [vmem:[#allocation2 + $0x80] sm:$0xff] %vm1646_vm3, %v2661_v32  ;;  %v2602_v25 = vpop.f32.mrf.mxu2  ;;  %v2705_v45 = vpack.c.bf16 %v2687_v44, %v2678_v34  ;;  %v2688_v37 = vld [vmem:[#allocation2 + $0x70] sm:$0xff]  ;;  %3411 = vmatpush.bf16.msra.mxu3 %v5699_v50  ;;  %v2714_v9 = vpack.c.bf16 %v2696_v59, %v2696_v59  ;;  %v5725_v27 = vld [vmem:[%s7544_s8 + $0x28] sm:$0xff]  ;;  %v5723_v44 = vld [vmem:[%s7544_s8 + $0x18] sm:$0xff] }
 0x286   : > { %2672 = vst.msk [vmem:[#allocation2 + $0x88] sm:$0xff] %vm1646_vm3, %v2668_v48  ;;  %v2706_v49 = vpack.c.bf16 %v2688_v37, %v2679_v20  ;;  %v2697_v43 = vld [vmem:[#allocation2 + $0xb8] sm:$0x7]  ;;  %4089 = vmatpush.bf16.msra.mxu2 %v5725_v27  ;;  %v5734_v25 = vld [vmem:[%s7544_s8 + $0x70] sm:$0xff] }
 0x287   : > { %2673 = vst.msk [vmem:[#allocation2 + $0xd0] sm:$0x7] %vm2611_vm6, %v2667_v36  ;;  %3379 = vmatmul.bf16.vlgmr.msrb.gmra.mxu1 %v2705_v45  ;;  %v2715_v53 = vpack.c.bf16 %v2697_v43, %v2697_v43  ;;  %v2689_v18 = vld [vmem:[#allocation2 + $0x78] sm:$0xff]  ;;  %v5742_v45 = vld [vmem:[%s7544_s8 + $0xb0] sm:$0xff] }
 0x288   : > { %3397 = vmatmul.bf16.vlgmr.msrb.gmra.mxu2 %v2706_v49  ;;  %3427 = vmatpush.bf16.msra.mxu0 %v5709_v55  ;;  %v2707_v33 = vpack.c.bf16 %v2689_v18, %v2680_v8  ;;  %v2681_v41 = vld [vmem:[#allocation2 + $0x38] sm:$0xff]  ;;  %v5722_v20 = vld [vmem:[%s7544_s8 + $0x10] sm:$0xff]  ;;  %v5733_v49 = vld [vmem:[%s7544_s8 + $0x68] sm:$0xff] }
 0x289   : > { %3412 = vmatpush.bf16.msra.mxu3 %v5698_v29  ;;  %v2682_v15 = vld [vmem:[#allocation2 + $0x40] sm:$0xff]  ;;  %v5751_v37 = vld [vmem:[%s7544_s8 + $0xf8] sm:$0xff]  ;;  %v5721_v55 = vld [vmem:[%s7544_s8 + $0x8] sm:$0xff] }
 0x28a   : > { %v2698_v19 = vld [vmem:[#allocation2 + $0xc0] sm:$0x7]  ;;  %4090 = vmatpush.bf16.msra.mxu2 %v5724_v23  ;;  %4126 = vmatpush.bf16.msrb.mxu1 %v5751_v37  ;;  %v5750_v50 = vld [vmem:[%s7544_s8 + $0xf0] sm:$0xff]  ;;  %v5749_v29 = vld [vmem:[%s7544_s8 + $0xe8] sm:$0xff] }
 0x28b   : > { %v2716_v26 = vpack.c.bf16 %v2698_v19, %v2698_v19  ;;  %v2699_v21 = vld [vmem:[#allocation2 + $0xc8] sm:$0x7]  ;;  %v7328_v18 = vld [vmem:[%s7543_s7] ss:$0 sm:$0xff] }
 0x28c   : > { %3428 = vmatpush.bf16.msra.mxu0 %v5708_v11  ;;  %v2690_v47 = vld [vmem:[#allocation2 + $0x80] sm:$0xff]  ;;  %v2717_v61 = vpack.c.bf16 %v2699_v21, %v2699_v21  ;;  %v5745_v21 = vld [vmem:[%s7544_s8 + $0xc8] sm:$0xff] }
 0x28d   : > { %3413 = vmatpush.bf16.msra.mxu3 %v5697_v3  ;;  %v2691_v51 = vld [vmem:[#allocation2 + $0x88] sm:$0xff]  ;;  %v2708_v5 = vpack.c.bf16 %v2690_v47, %v2681_v41  ;;  %v5740_v11 = vld [vmem:[%s7544_s8 + $0xa0] sm:$0xff] }
 0x28e   : > { %v2709_v10 = vpack.c.bf16 %v2691_v51, %v2682_v15  ;;  %v2700_v7 = vld [vmem:[#allocation2 + $0xd0] sm:$0x7]  ;;  %4091 = vmatpush.bf16.msra.mxu2 %v5723_v44  ;;  %4127 = vmatpush.bf16.msrb.mxu1 %v5750_v50  ;;  %v410_v8 = vld [vmem:[%s406_s30] sm:$0xff]  ;;  %v5773_v37 = vld [vmem:[%s7544_s8 + $0x1a8] sm:$0xff]  ;;  %s4207_s30 = scalar_lea.sflag [#allocation4], %s391_s12 }
 0x28f   : > { %3330 = vmatmul.bf16.gmra.mxu0 %v2711_v57  ;;  %v2718_v35 = vpack.c.bf16 %v2700_v7, %v2700_v7  ;;  %v5732_v57 = vld [vmem:[%s7544_s8 + $0x60] sm:$0xff]  ;;  %vm411_vm8 = vcmp.gt.f32.partialorder %v410_v8, -0.99 }
 0x290   : > { %3429 = vmatpush.bf16.msra.mxu0 %v5707_v63  ;;  %v5739_v63 = vld [vmem:[%s7544_s8 + $0x98] sm:$0xff]  ;;  %v5756_v7 = vld [vmem:[%s7544_s8 + $0x120] sm:$0xff]  ;;  %v4318_v19 = vsel %vm411_vm8, 1.0, %v5903_v4 }
 0x291   : > { %3414 = vmatpush.bf16.msra.mxu3 %v5696_v46  ;;  %v5730_v46 = vld [vmem:[%s7544_s8 + $0x50] sm:$0xff]  ;;  %v5728_v47 = vld [vmem:[%s7544_s8 + $0x40] sm:$0xff]  ;;  %v415_v38 = vsel %vm414_vm7, %v4318_v19, 0.0 }
 0x292   : > { %4092 = vmatpush.bf16.msra.mxu2 %v5722_v20  ;;  %4128 = vmatpush.bf16.msrb.mxu1 %v5749_v29  ;;  %v5736_v41 = vld [vmem:[%s7544_s8 + $0x80] sm:$0xff]  ;;  %v5765_v20 = vld [vmem:[%s7544_s8 + $0x168] sm:$0xff] }
 0x293   : > { %416 = vadd.xlane.f32.xlu0 %v415_v38  ;;  %v5764_v29 = vld [vmem:[%s7544_s8 + $0x160] sm:$0xff] }
 0x294   : > { %3343 = vmatmul.bf16.vlgmr.msrb.gmra.mxu3 %v2703_v58  ;;  %3430 = vmatpush.bf16.msra.mxu0 %v5706_v31  ;;  %v5731_v58 = vld [vmem:[%s7544_s8 + $0x58] sm:$0xff] }
 0x295   : > { %4100 = vmatpush.bf16.msrb.mxu3 %v5735_v40  ;;  %v5766_v40 = vld [vmem:[%s7544_s8 + $0x170] sm:$0xff] }
 0x296   : > { %4093 = vmatpush.bf16.msra.mxu2 %v5721_v55 }
 0x297   : > { %3384 = vmatmul.bf16.gmra.mxu1 %v2714_v9  ;;  %v5748_v9 = vld [vmem:[%s7544_s8 + $0xe0] sm:$0xff] }
 0x298   : > { %3402 = vmatmul.bf16.gmra.mxu2 %v2715_v53  ;;  %3431 = vmatpush.bf16.msra.mxu0 %v5705_v13  ;;  %v5758_v53 = vld [vmem:[%s7544_s8 + $0x130] sm:$0xff]  ;;  %v5747_v13 = vld [vmem:[%s7544_s8 + $0xd8] sm:$0xff] }
 0x299   : > { %4101 = vmatpush.bf16.msrb.mxu3 %v5734_v25  ;;  %4129 = vmatpush.bf16.msrb.mxu1 %v5748_v9 }
 0x29a   : > { %4094 = vmatpush.bf16.msra.mxu2 %v5720_v1 }
 0x29c   : > { %3432 = vmatpush.bf16.msra.mxu0 %v5704_v54 }
 0x29d   : > { %4102 = vmatpush.bf16.msrb.mxu3 %v5733_v49  ;;  %4130 = vmatpush.bf16.msrb.mxu1 %v5747_v13 }
 0x29e   : > { %4139 = vmatpush.bf16.msrb.mxu2 %v5759_v62  ;;  %v5772_v62 = vld [vmem:[%s7544_s8 + $0x1a0] sm:$0xff] }
 0x29f   : > { %3361 = vmatmul.bf16.vlgmr.msrb.gmra.mxu0 %v2704_v39  ;;  %v5729_v39 = vld [vmem:[%s7544_s8 + $0x48] sm:$0xff] }
 0x2a0   : > { %4113 = vmatpush.bf16.msrb.mxu0 %v5743_v24  ;;  %v5774_v24 = vld [vmem:[%s7544_s8 + $0x1b0] sm:$0xff] }
 0x2a1   : > { %4103 = vmatpush.bf16.msrb.mxu3 %v5732_v57 }
 0x2a2   : > { %4140 = vmatpush.bf16.msrb.mxu2 %v5758_v53 }
 0x2a4   : > { %3348 = vmatmul.bf16.gmra.mxu3 %v2712_v17  ;;  %4114 = vmatpush.bf16.msrb.mxu0 %v5742_v45  ;;  %v5754_v45 = vld [vmem:[%s7544_s8 + $0x110] sm:$0xff] }
 0x2a5   : > { %4104 = vmatpush.bf16.msrb.mxu3 %v5731_v58 }
 0x2a6   : > { %4141 = vmatpush.bf16.msrb.mxu2 %v5757_v2 }
 0x2a7   : > { %3451 = vmatmul.bf16.vlgmr.msra.gmra.mxu1 %v2709_v10 }
 0x2a8   : > { %4115 = vmatpush.bf16.msrb.mxu0 %v5741_v28  ;;  %v5753_v28 = vld [vmem:[%s7544_s8 + $0x108] sm:$0xff] }
 0x2a9   : > { %4105 = vmatpush.bf16.msrb.mxu3 %v5730_v46 }
 0x2aa   : > { %4142 = vmatpush.bf16.msrb.mxu2 %v5756_v7 }
 0x2ac   : > { %4116 = vmatpush.bf16.msrb.mxu0 %v5740_v11 }
 0x2ad   : > { %4106 = vmatpush.bf16.msrb.mxu3 %v5729_v39  ;;  %v5762_v39 = vld [vmem:[%s7544_s8 + $0x150] sm:$0xff] }
 0x2af   : > { %3366 = vmatmul.bf16.gmra.mxu0 %v2713_v16 }
 0x2b0   : > { %4117 = vmatpush.bf16.msrb.mxu0 %v5739_v63 }
 0x2b1   : > { %4107 = vmatpush.bf16.msrb.mxu3 %v5728_v47 }
 0x2b4   : > { %3415 = vmatmul.bf16.vlgmr.msra.gmra.mxu3 %v2707_v33  ;;  %4118 = vmatpush.bf16.msrb.mxu0 %v5738_v12  ;;  %v5746_v33 = vld [vmem:[%s7544_s8 + $0xd0] sm:$0xff] }
 0x2b5   : > { %4131 = vmatpush.bf16.msrb.mxu1 %v5746_v33 }
 0x2b7   : > { %3456 = vmatmul.bf16.gmra.mxu1 %v2718_v35 }
 0x2b8   : > { %4119 = vmatpush.bf16.msrb.mxu0 %v5737_v14 }
 0x2b9   : > { %4132 = vmatpush.bf16.msrb.mxu1 %v5745_v21  ;;  %v5777_v21 = vld [vmem:[%s7544_s8 + $0x1c8] sm:$0xff] }
 0x2bc   : > { %4120 = vmatpush.bf16.msrb.mxu0 %v5736_v41 }
 0x2bf   : > { %3433 = vmatmul.bf16.vlgmr.msra.gmra.mxu0 %v2708_v5  ;;  %v5767_v5 = vld [vmem:[%s7544_s8 + $0x178] sm:$0xff] }
 0x2c0   : > { %4152 = vmatpush.bf16.msra.mxu3 %v5767_v5  ;;  %v5760_v5 = vld [vmem:[%s7544_s8 + $0x140] sm:$0xff] }
 0x2c4   : > { %3420 = vmatmul.bf16.gmra.mxu3 %v2716_v26  ;;  %v5775_v26 = vld [vmem:[%s7544_s8 + $0x1b8] sm:$0xff] }
 0x2c5   : > { %4165 = vmatpush.bf16.msra.mxu0 %v5775_v26  ;;  %4153 = vmatpush.bf16.msra.mxu3 %v5766_v40  ;;  %v5776_v40 = vld [vmem:[%s7544_s8 + $0x1c0] sm:$0xff] }
 0x2c9   : > { %4166 = vmatpush.bf16.msra.mxu0 %v5774_v24  ;;  %4154 = vmatpush.bf16.msra.mxu3 %v5765_v20 }
 0x2cd   : > { %4167 = vmatpush.bf16.msra.mxu0 %v5773_v37  ;;  %4155 = vmatpush.bf16.msra.mxu3 %v5764_v29 }
 0x2cf   : > { %3438 = vmatmul.bf16.gmra.mxu0 %v2717_v61  ;;  %v5755_v61 = vld [vmem:[%s7544_s8 + $0x118] sm:$0xff] }
 0x2d0   : > { %4143 = vmatpush.bf16.msrb.mxu2 %v5755_v61 }
 0x2d1   : > { %4168 = vmatpush.bf16.msra.mxu0 %v5772_v62 }
 0x2d4   : > { %4144 = vmatpush.bf16.msrb.mxu2 %v5754_v45 }
 0x2d8   : > { %4145 = vmatpush.bf16.msrb.mxu2 %v5753_v28 }
 0x2f7   : > { %v7204_v6 = vpop.f32.mrf.mxu3 }
 0x2f8   : > { %v3309_v4 = vadd.f32 %v7328_v18, %v7204_v6  ;;  %v5744_v6 = vld [vmem:[%s7544_s8 + $0xc0] sm:$0xff] }
 0x2f9   : > { %4133 = vmatpush.bf16.msrb.mxu1 %v5744_v6 }
 0x2fc   : > { %v7209_v60 = vpop.f32.mrf.mxu0 }
 0x2fd   : > { %v3327_v23 = vadd.f32 %v7209_v60, %v3309_v4  ;;  %v5783_v60 = vld [vmem:[%s7544_s8 + $0x1f8] sm:$0xff] }
 0x2fe   : > { %4178 = vmatpush.bf16.msra.mxu1 %v5783_v60 }
 0x2ff   : > { %v7211_v36 = vpop.f32.mrf.mxu3 }
 0x300   : > { %v3311_v55 = vadd.f32 %v7328_v18, %v7211_v36  ;;  %v5752_v36 = vld [vmem:[%s7544_s8 + $0x100] sm:$0xff] }
 0x301   : > { %4146 = vmatpush.bf16.msrb.mxu2 %v5752_v36 }
 0x304   : > { %v7225_v32 = vpop.f32.mrf.mxu0  ;;  %v7227_v48 = vpop.f32.mrf.mxu1 }
 0x305   : > { %v3329_v11 = vadd.f32 %v7225_v32, %v3311_v55  ;;  %v5781_v32 = vld [vmem:[%s7544_s8 + $0x1e8] sm:$0xff] }
 0x307   : > { %v7229_v34 = vpop.f32.mrf.mxu3 }
 0x308   : > { %v3314_v46 = vadd.f32 %v7328_v18, %v7229_v34  ;;  %v5779_v34 = vld [vmem:[%s7544_s8 + $0x1d8] sm:$0xff] }
 0x30b   : > { %v7252_v56 = vpop.f32.mrf.mxu2 }
 0x30c   : > { %v7254_v22 = vpop.f32.mrf.mxu0  ;;  %v7256_v30 = vpop.f32.mrf.mxu1 }
 0x30d   : > { %v3332_v14 = vadd.f32 %v7254_v22, %v3314_v46  ;;  %v5761_v22 = vld [vmem:[%s7544_s8 + $0x148] sm:$0xff] }
 0x30f   : > { %v3315_v52 = vpop.f32.mrf.mxu3 }
 0x310   : > { %v5782_v52 = vld [vmem:[%s7544_s8 + $0x1f0] sm:$0xff] }
 0x311   : > { %4179 = vmatpush.bf16.msra.mxu1 %v5782_v52 }
 0x313   : > { %v7282_v59 = vpop.f32.mrf.mxu2 }
 0x314   : > { %v3333_v43 = vpop.f32.mrf.mxu0  ;;  %v7287_v3 = vpop.f32.mrf.mxu1 }
 0x315   : > { %v5771_v43 = vld [vmem:[%s7544_s8 + $0x198] sm:$0xff]  ;;  %4180 = vmatpush.bf16.msra.mxu1 %v5781_v32 }
 0x316   : > { %4169 = vmatpush.bf16.msra.mxu0 %v5771_v43 }
 0x317   : > { %v3344_v31 = vpop.f32.mrf.mxu3 }
 0x318   : > { %v3345_v44 = vadd.f32 %v3344_v31, %v3327_v23  ;;  %v5780_v31 = vld [vmem:[%s7544_s8 + $0x1e0] sm:$0xff] }
 0x319   : > { %4181 = vmatpush.bf16.msra.mxu1 %v5780_v31  ;;  %v5786_v31 = vld [vmem:[%s7544_s8 + $0x210] sm:$0xff] }
 0x31b   : > { %v7310_v54 = vpop.f32.mrf.mxu2 }
 0x31c   : > { %v3362_v17 = vpop.f32.mrf.mxu0  ;;  %v3387_v51 = vpop.f32.mrf.mxu1 }
 0x31d   : > { %v3363_v49 = vadd.f32 %v3362_v17, %v3345_v44  ;;  %4182 = vmatpush.bf16.msra.mxu1 %v5779_v34 }
 0x31f   : > { %v7315_v15 = vpop.f32.mrf.mxu3  ;;  %v3381_v1 = vadd.f32 %v7227_v48, %v3363_v49  ;;  %v5763_v48 = vld [vmem:[%s7544_s8 + $0x158] sm:$0xff]  ;;  %v5790_v49 = vld [vmem:[%s7544_s8 + $0x230] sm:$0xff] }
 0x320   : > { %v3347_v58 = vadd.f32 %v7315_v15, %v3329_v11  ;;  %4156 = vmatpush.bf16.msra.mxu3 %v5763_v48  ;;  %v5789_v11 = vld [vmem:[%s7544_s8 + $0x228] sm:$0xff] }
 0x321   : > { %v3399_v53 = vadd.f32 %v7252_v56, %v3381_v1  ;;  %v5770_v56 = vld [vmem:[%s7544_s8 + $0x190] sm:$0xff] }
 0x322   : > { %4170 = vmatpush.bf16.msra.mxu0 %v5770_v56 }
 0x323   : > { %v3405_v10 = vpop.f32.mrf.mxu2 }
 0x324   : > { %v7321_v42 = vpop.f32.mrf.mxu0  ;;  %v7323_v16 = vpop.f32.mrf.mxu1  ;;  %4157 = vmatpush.bf16.msra.mxu3 %v5762_v39 }
 0x325   : > { %v3365_v9 = vadd.f32 %v7321_v42, %v3347_v58 }
 0x327   : > { %v7336_v35 = vpop.f32.mrf.mxu3  ;;  %v3383_v17 = vadd.f32 %v7256_v30, %v3365_v9  ;;  %v5769_v30 = vld [vmem:[%s7544_s8 + $0x188] sm:$0xff] }
 0x328   : > { %v3350_v15 = vadd.f32 %v7336_v35, %v3332_v14  ;;  %4158 = vmatpush.bf16.msra.mxu3 %v5761_v22  ;;  %4171 = vmatpush.bf16.msra.mxu0 %v5769_v30  ;;  %v417_v14 = vpop.xlane.xlu0 %416 }
 0x329   : > { %v3401_v33 = vadd.f32 %v7282_v59, %v3383_v17  ;;  %v5768_v59 = vld [vmem:[%s7544_s8 + $0x180] sm:$0xff]  ;;  %v418_v17 = vrot.slane %v417_v14, 4 }
 0x32c   : > { %v7359_v0 = vpop.f32.mrf.mxu0  ;;  %v7361_v27 = vpop.f32.mrf.mxu1  ;;  %4159 = vmatpush.bf16.msra.mxu3 %v5760_v5  ;;  %4172 = vmatpush.bf16.msra.mxu0 %v5768_v59 }
 0x32d   : > { %v3368_v18 = vadd.f32 %v7359_v0, %v3350_v15 }
 0x32f   : > { %v3351_v25 = vpop.f32.mrf.mxu3  ;;  %v3386_v19 = vadd.f32 %v7287_v3, %v3368_v18  ;;  %v5791_v3 = vld [vmem:[%s7544_s8 + $0x238] sm:$0xff]  ;;  %v5838_v18 = vld [vmem:[%s7545_s9] ss:$0 sm:$0xff] }
 0x331   : > { %v3404_v0 = vadd.f32 %v7310_v54, %v3386_v19 }
 0x334   : > { %v3369_v50 = vpop.f32.mrf.mxu0  ;;  %v7393_v57 = vpop.f32.mrf.mxu1 }
 0x337   : > { %v3416_v63 = vpop.f32.mrf.mxu3 }
 0x338   : > { %v3417_v12 = vadd.f32 %v3416_v63, %v3399_v53  ;;  %v5787_v63 = vld [vmem:[%s7544_s8 + $0x218] sm:$0xff] }
 0x33c   : > { %v3434_v13 = vpop.f32.mrf.mxu0  ;;  %v3459_v2 = vpop.f32.mrf.mxu1 }
 0x33d   : > { %v3435_v51 = vadd.f32 %v3434_v13, %v3417_v12  ;;  %v5785_v12 = vld [vmem:[%s7544_s8 + $0x208] sm:$0xff]  ;;  %v5784_v2 = vld [vmem:[%s7544_s8 + $0x200] sm:$0xff] }
 0x33f   : > { %v3453_v10 = vadd.f32 %v7323_v16, %v3435_v51  ;;  %v3418_v42 = vpop.f32.mrf.mxu3  ;;  %v5778_v16 = vld [vmem:[%s7544_s8 + $0x1d0] sm:$0xff]  ;;  %v419_v51 = vadd.f32 %v418_v17, %v417_v14 }
 0x340   : > { %v3419_v47 = vadd.f32 %v3418_v42, %v3401_v33  ;;  %4183 = vmatpush.bf16.msra.mxu1 %v5778_v16 }
 0x341   : > { %v3461_v8 = vmax.f32 %v3453_v10, 0.0  ;;  %v420_v34 = vrot.slane %v419_v51, 2 }
 0x343   : > { %3465 = vst.msk [vmem:[#allocation2] sm:$0x1] %vm3464_vm9, %v3461_v8  ;;  %v3467_v7 = vrot.slane %v3461_v8, 1  ;;  %v3470_v35 = vrot.slane %v3461_v8, 2  ;;  %v421_v15 = vadd.f32 %v420_v34, %v419_v51 }
 0x344   : > { %v3436_v41 = vpop.f32.mrf.mxu0  ;;  %4184 = vmatpush.bf16.msra.mxu1 %v5777_v21  ;;  %v5904_v21 = vmov 0  }
 0x345   : > { %3469 = vst.msk [vmem:[#allocation2 + $0x8] sm:$0x1] %vm3464_vm9, %v3467_v7  ;;  %v3437_v26 = vadd.f32 %v3436_v41, %v3419_v47  ;;  %v422_v10 = vrot.slane %v421_v15, 1 }
 0x346   : > { %3472 = vst.msk [vmem:[#allocation2 + $0x10] sm:$0x1] %vm3464_vm9, %v3470_v35 }
 0x347   : > { %v3455_v61 = vadd.f32 %v7361_v27, %v3437_v26  ;;  %v3421_v38 = vpop.f32.mrf.mxu3  ;;  %v423_v42 = vadd.f32 %v422_v10, %v421_v15 }
 0x348   : > { %v3422_v6 = vadd.f32 %v3421_v38, %v3404_v0  ;;  %4185 = vmatpush.bf16.msra.mxu1 %v5776_v40 }
 0x349   : > { %v3462_v4 = vmax.f32 %v3455_v61, 0.0  ;;  %5792 = vpush %v423_v42 }
 0x34a   : > { %v3489_v23 = vld [vmem:[#allocation2] sm:$0xff] }
 0x34b   : > { %3473 = vst.msk [vmem:[#allocation2 + $0x18] sm:$0x1] %vm3464_vm9, %v3462_v4  ;;  %v3475_v24 = vrot.slane %v3462_v4, 1  ;;  %v3478_v27 = vrot.slane %v3462_v4, 2  ;;  %v3498_v44 = vpack.c.bf16 %v3489_v23, %v3489_v23 }
 0x34c   : > { %v3439_v25 = vpop.f32.mrf.mxu0  ;;  %v3490_v45 = vld [vmem:[#allocation2 + $0x8] sm:$0xff] }
 0x34d   : > { %3477 = vst.msk [vmem:[#allocation2 + $0x20] sm:$0x1] %vm3464_vm9, %v3475_v24  ;;  %v3440_v54 = vadd.f32 %v3439_v25, %v3422_v6  ;;  %4095 = vmatmul.bf16.vlgmr.msra.gmra.mxu2 %v3498_v44  ;;  %v3499_v60 = vpack.c.bf16 %v3490_v45, %v3490_v45  ;;  %v3491_v20 = vld [vmem:[#allocation2 + $0x10] sm:$0xff] }
 0x34e   : > { %3480 = vst.msk [vmem:[#allocation2 + $0x28] sm:$0x1] %vm3464_vm9, %v3478_v27  ;;  %4191 = vmatpush.bf16.msra.mxu2 %v5791_v3  ;;  %v3500_v37 = vpack.c.bf16 %v3491_v20, %v3491_v20 }
 0x34f   : > { %v3458_v28 = vadd.f32 %v7393_v57, %v3440_v54  ;;  %v3423_v52 = vpop.f32.mrf.mxu3  ;;  %4108 = vmatmul.bf16.vlgmr.msrb.gmra.mxu3 %v3499_v60  ;;  %v5788_v57 = vld [vmem:[%s7544_s8 + $0x220] sm:$0xff] }
 0x350   : > { %4121 = vmatmul.bf16.vlgmr.msrb.gmra.mxu0 %v3500_v37 }
 0x351   : > { %v3463_v55 = vmax.f32 %v3458_v28, 0.0 }
 0x352   : > { %4192 = vmatpush.bf16.msra.mxu2 %v5790_v49  ;;  %v3492_v50 = vld [vmem:[#allocation2 + $0x18] sm:$0xff] }
 0x353   : > { %3481 = vst.msk [vmem:[#allocation2 + $0x30] sm:$0x1] %vm3464_vm9, %v3463_v55  ;;  %v3483_v1 = vrot.slane %v3463_v55, 1  ;;  %v3486_v29 = vrot.slane %v3463_v55, 2  ;;  %v3501_v62 = vpack.c.bf16 %v3492_v50, %v3492_v50 }
 0x354   : > { %v3441_v36 = vpop.f32.mrf.mxu0  ;;  %v3493_v58 = vld [vmem:[#allocation2 + $0x20] sm:$0xff] }
 0x355   : > { %3485 = vst.msk [vmem:[#allocation2 + $0x38] sm:$0x1] %vm3464_vm9, %v3483_v1  ;;  %4134 = vmatmul.bf16.vlgmr.msrb.gmra.mxu1 %v3501_v62  ;;  %v3494_v32 = vld [vmem:[#allocation2 + $0x28] sm:$0xff]  ;;  %v3502_v48 = vpack.c.bf16 %v3493_v58, %v3493_v58 }
 0x356   : > { %3488 = vst.msk [vmem:[#allocation2 + $0x40] sm:$0x1] %vm3464_vm9, %v3486_v29  ;;  %4193 = vmatpush.bf16.msra.mxu2 %v5789_v11  ;;  %v3503_v9 = vpack.c.bf16 %v3494_v32, %v3494_v32 }
 0x35a   : > { %4194 = vmatpush.bf16.msra.mxu2 %v5788_v57  ;;  %v3495_v43 = vld [vmem:[#allocation2 + $0x30] sm:$0xff] }
 0x35b   : > { %v3504_v53 = vpack.c.bf16 %v3495_v43, %v3495_v43 }
 0x35c   : > { %v3496_v46 = vld [vmem:[#allocation2 + $0x38] sm:$0xff] }
 0x35d   : > { %4147 = vmatmul.bf16.vlgmr.msrb.gmra.mxu2 %v3502_v48  ;;  %v3505_v13 = vpack.c.bf16 %v3496_v46, %v3496_v46  ;;  %v3497_v39 = vld [vmem:[#allocation2 + $0x40] sm:$0xff] }
 0x35e   : > { %4195 = vmatpush.bf16.msra.mxu2 %v5787_v63  ;;  %v3506_v56 = vpack.c.bf16 %v3497_v39, %v3497_v39 }
 0x35f   : > { %4160 = vmatmul.bf16.vlgmr.msra.gmra.mxu3 %v3503_v9 }
 0x360   : > { %4173 = vmatmul.bf16.vlgmr.msra.gmra.mxu0 %v3504_v53 }
 0x362   : > { %4196 = vmatpush.bf16.msra.mxu2 %v5786_v31 }
 0x365   : > { %4186 = vmatmul.bf16.vlgmr.msra.gmra.mxu1 %v3505_v13 }
 0x366   : > { %4197 = vmatpush.bf16.msra.mxu2 %v5785_v12 }
 0x36a   : > { %4198 = vmatpush.bf16.msra.mxu2 %v5784_v2 }
 0x36d   : > { %4199 = vmatmul.bf16.vlgmr.msra.gmra.mxu2 %v3506_v56 }
 0x37a   : > { %s5793_s13 = spop %5792 }
 0x37b   : > { %v425_v59 = vstv %s5793_s13  ;;  %s5853_s13 = sshra.s32 %s4223_s29, 4  ;;  %s5854_s13 = int_to_ptr.hbm [resolvable:$true] %s5853_s13 }
 0x37c   : > { %vm426_vm11 = vcmp.gt.f32.partialorder %v425_v59, 1.0  ;;  %s5855_s19 = scalar_lea.hbm %s5854_s13, 1  ;;  %p5860_p0 = scmp.lt.s32.totalorder %s5854_s13, %s7546_s10 }
 0x37d   : > { %v427_v61 = vsel %vm426_vm11, 1, %v5904_v21  ;;  %p5856_p11 = scmp.ne.s32.totalorder %s5854_s13, %s5855_s19 }
 0x37e   : > { %429 = vst.msk [vmem:[%s409_s22] sm:$0x1] %vm428_vm10, %v427_v61  ;;  %s5859_s22 = scalar_lea.hbm %s7546_s10, 2 }
 0x37f   : > { %p5857_p12 = pnand %p5856_p11, %p6003_p5  ;;  %p5861_p1 = scmp.lt.s32.totalorder %s5859_s22, %s5855_s19 }
 0x381   : > { %p5858_p13 = pneg %p5857_p12  ;;  %p5862_p2 = por %p5861_p1, %p5860_p0 }
 0x383   : > { %p5863_p3 = pnand %p5862_p2, %p5858_p13 }
 0x3cd   : > { %v4122_v22 = vpop.f32.mrf.mxu0 }
 0x3d0   : > { %v4096_v30 = vpop.f32.mrf.mxu2 }
 0x3d1   : > { %v4097_v16 = vadd.f32 %v5838_v18, %v4096_v30 }
 0x3d2   : > { %v4109_v8 = vpop.f32.mrf.mxu3  ;;  %v4135_v33 = vpop.f32.mrf.mxu1 }
 0x3d3   : > { %v4110_v47 = vadd.f32 %v4109_v8, %v4097_v16 }
 0x3d5   : > { %v4124_v7 = vpop.f32.mrf.mxu0  ;;  %v4123_v19 = vadd.f32 %v4122_v22, %v4110_v47 }
 0x3d7   : > { %v4136_v4 = vadd.f32 %v4135_v33, %v4123_v19 }
 0x3d8   : > { %v4098_v35 = vpop.f32.mrf.mxu2 }
 0x3da   : > { %v4111_v41 = vpop.f32.mrf.mxu3  ;;  %v4137_v5 = vpop.f32.mrf.mxu1 }
 0x3dd   : > { %v4174_v26 = vpop.f32.mrf.mxu0 }
 0x3e0   : > { %v4148_v38 = vpop.f32.mrf.mxu2 }
 0x3e1   : > { %v4149_v3 = vadd.f32 %v4148_v38, %v4136_v4 }
 0x3e2   : > { %v4161_v0 = vpop.f32.mrf.mxu3  ;;  %v4187_v23 = vpop.f32.mrf.mxu1 }
 0x3e3   : > { %v4162_v24 = vadd.f32 %v4161_v0, %v4149_v3 }
 0x3e5   : > { %v4176_v40 = vpop.f32.mrf.mxu0  ;;  %v4175_v25 = vadd.f32 %v4174_v26, %v4162_v24 }
 0x3e7   : > { %v4188_v45 = vadd.f32 %v4187_v23, %v4175_v25 }
 0x3e8   : > { %v4150_v27 = vpop.f32.mrf.mxu2 }
 0x3ea   : > { %v4163_v6 = vpop.f32.mrf.mxu3  ;;  %v4189_v44 = vpop.f32.mrf.mxu1 }
 0x3f0   : > { %v4200_v54 = vpop.f32.mrf.mxu2 }
 0x3f1   : > { %v4201_v60 = vadd.f32 %v4200_v54, %v4188_v45 }
 0x3f3   : > { %v4204_v20 = vmax.f32 %v4201_v60, 0.0 }
 0x3f5   : > { %4205 = vst.msk [vmem:[%s392_s16] sm:$0x1] %vm3464_vm9, %v4204_v20 }
 0x3f6   : > { %5866 = shalt.err (!%p5863_p3)
}
 0x3f7   : > { %5794 = dma.vmem_to_hbm [thread:$0]  (%p6003_p5), %s4221_s25, 16, %s4223_s29, %s4207_s30  }
 0x3f8   : > { %v4202_v37 = vpop.f32.mrf.mxu2 }
 0x3f9 PF: > { %p5800_p4 = scmp.ge.s32.totalorder %s5901_s20, 2  ;;  %s4237_s12 = sand.u32 1, %s5889_s17  }
 0x3fa   : > { %s4238_s15 = scalar_lea.sflag [#allocation4], %s4237_s12 }
 0x3fb   : > { %p5797_p7 = pnand %p5800_p4, %p6007_p6 }
 0x3fd   : > { %p5798_p8 = pneg %p5797_p7 }
 0x3ff   : > { %5884 = dma.done.wait (%p5798_p8), %s4238_s15, 16  }
 0x400   : > { %5886 = vsyncadd (%p5798_p8), %s4238_s15, 4294967280  ;;  %s7553_s16 = sld [smem:[#allocation6_spill]]  ;;  %p22_p9 = scmp.ge.s32.totalorder %s5990_s23, 4  }
 0x401   : > { %s7554_s19 = sld [smem:[#allocation7_spill]]  ;;  %s7555_s17 = smov %s5893_s18 }
 0x402   : > { %s7557_s20 = smov %s5990_s23  ;;  %24 = sbr.rel (!%p22_p9) target bundleno = 3 (0x3), region = 110 }
 0x406   : > { %s7556_s18 = smov %s7553_s16 }
 0x407   :  { %4249 = vsyncpa [#allocation4], 1 }
 0x408   :  { %4251 = vsyncpa [#allocation4 + $0x1], 1 }

</bundles_post_ra>
